<compile_context>
chip_gen: v6e
topology: v6e:2x2x1
jax: 0.10.0
libtpu: 0.0.40
codegen_flags: <defaults>
</compile_context>

<pallas_src>
import functools

import jax
import jax.numpy as jnp
from jax.experimental import pallas as pl
from jax.experimental.pallas import tpu as pltpu

HIDDEN = 256   # LSTM hidden size from the module
C1 = 32        # conv1 out channels
C2 = 64        # conv2 out channels


def avn_kernel(xcol_ref, mask_ref, w1_ref, b1_ref, s1_ref, t1_ref,
               w2_ref, b2_ref, s2_ref, t2_ref,
               wih_ref, whh_ref, bl_ref,
               wf1_ref, bf1_ref, wf2_ref, bf2_ref,
               out_ref, *, B, T3, use_bf16_h):
    f32 = jnp.float32
    bf16 = jnp.bfloat16
    H = HIDDEN

    # --- conv1 (k=2, pad=1) on the VPU: two lane-broadcast multiply-adds, then
    #     ReLU -> folded BatchNorm1d(32) (module order: relu(conv) then bn).
    #     `mask` zeroes conv2's zero-pad rows (t=0, t=T1+1) and alignment-pad rows. ---
    xc = xcol_ref[...]                                      # (N, 2)
    w1 = w1_ref[...]                                        # (2, 32)
    h1 = xc[:, 0:1] * w1[0:1, :] + xc[:, 1:2] * w1[1:2, :] + b1_ref[...]
    h1 = (jnp.maximum(h1, 0.0) * s1_ref[...] + t1_ref[...]) * mask_ref[...]     # (N, 32)

    # --- conv2 (k=2, pad=1) as ONE lane-dense matmul: W2 = [w2_tap0 | w2_tap1] (32,128).
    #     Rows are time-major (row = t*B + b), so the second tap is "shift up by B rows";
    #     the B rows that wrap around come from h1's t=0 block, which the mask forces to
    #     exactly zero, so the wrap needs no extra masking. ---
    p = jnp.dot(h1, w2_ref[...], preferred_element_type=f32)                    # (N, 128)
    pa = p[:, :C2]
    pb = p[:, C2:]
    pb_shift = jnp.concatenate([pb[B:, :], pb[:B, :]], axis=0)                  # roll up by B
    h2 = pa + pb_shift + b2_ref[...]
    h2 = jnp.maximum(h2, 0.0) * s2_ref[...] + t2_ref[...]                       # (N, 64)

    # --- MaxPool1d(kernel=2, stride=2), compacting: pooled step u = max(conv2 rows
    #     2u, 2u+1).  Only the first 2*T3 row-blocks are read (rows t >= T2 never touch
    #     anything) and the result has exactly the T3*B rows the recurrence consumes. ---
    pooled = jnp.concatenate(
        [jnp.maximum(h2[(2 * u) * B:(2 * u + 1) * B, :],
                     h2[(2 * u + 1) * B:(2 * u + 2) * B, :]) for u in range(T3)],
        axis=0)                                                                  # (T3*B, 64)

    # --- LSTM input projection hoisted off the recurrent critical path. ---
    xin = (jnp.dot(pooled.astype(bf16), wih_ref[...], preferred_element_type=f32)
           + bl_ref[...])                                                        # (T3*B, 4H)

    # --- single-layer LSTM (batch_first); gates laid out [i, f, o | g] (permuted in the
    #     wrapper from PyTorch's [i, f, g, o]).  h stays bf16 between steps on chips with
    #     bf16 VALUs (v6e/v7x); c stays f32 everywhere. ---
    whh = whh_ref[...]
    h_dtype = bf16 if use_bf16_h else f32
    h = jnp.zeros((B, H), h_dtype)
    c = jnp.zeros((B, H), f32)
    for u in range(T3):                                     # static, short (T3 = 5)
        r0 = u * B                                          # sublane-aligned start
        hh = h if use_bf16_h else h.astype(bf16)
        gates = xin[r0:r0 + B, :] + jnp.dot(hh, whh, preferred_element_type=f32)  # (B, 4H)
        sig = jax.nn.sigmoid(gates[:, :3 * H])
        i_g = sig[:, 0:H]
        f_g = sig[:, H:2 * H]
        o_g = sig[:, 2 * H:3 * H]
        g_g = jnp.tanh(gates[:, 3 * H:])
        c = f_g * c + i_g * g_g
        h = (o_g * jnp.tanh(c)).astype(h_dtype)
    # output[:, -1, :] of the LSTM is the final hidden state h

    # --- fc1 + ReLU, fc2 (fc2 weight lane-padded to 128; wrapper slices [:, :3]) ---
    y1 = jnp.maximum(
        jnp.dot(h.astype(bf16), wf1_ref[...], preferred_element_type=f32) + bf1_ref[...],
        0.0)
    out_ref[...] = (jnp.dot(y1.astype(bf16), wf2_ref[...], preferred_element_type=f32)
                    + bf2_ref[...])


@jax.jit
def action_value_net_forward(x, params):
    """x: (B, L) single request, or (R, B, L) stacked independent requests."""
    single = (x.ndim == 2)
    if single:
        x = x[None]
    R, B, L = x.shape
    T1 = L + 1                      # conv1 output length (k=2, pad=1)
    T2 = L + 2                      # conv2 output length
    T3 = T2 // 2                    # pooled length / LSTM steps
    Tp = ((T2 + 1 + 7) // 8) * 8    # rows per example: >= T1+2, multiple of 8 (aligned)
    N = Tp * B
    f32 = jnp.float32

    # Glue (fused / constant-folded under jit): time-major conv1 taps.  Row t of an
    # example holds the two conv1 taps for conv1-output time t-1; rows 0 and T1+1 are
    # conv2's zero-pad rows, rows >= T1+2 are alignment padding (all zeroed via `mask`).
    xpad = jnp.pad(x.astype(f32), ((0, 0), (0, 0), (2, Tp + 1 - (L + 2))))   # (R,B,Tp+1)
    tap0 = jnp.transpose(xpad[:, :, 0:Tp], (0, 2, 1))                        # (R,Tp,B)
    tap1 = jnp.transpose(xpad[:, :, 1:Tp + 1], (0, 2, 1))
    xcol = jnp.stack([tap0, tap1], axis=-1).reshape(R, N, 2)                 # row = t*B+b

    t_idx = jnp.arange(Tp)
    mrow = ((t_idx >= 1) & (t_idx <= T1)).astype(f32)                        # valid rows
    mask = jnp.broadcast_to(mrow[:, None, None], (Tp, B, C1)).reshape(N, C1)  # lane-dense

    p = params
    weights = (p["w1"], p["b1"], p["s1"], p["t1"],
               p["w2"], p["b2"], p["s2"], p["t2"],
               p["wih"], p["whh"], p["bl"],
               p["wf1"], p["bf1"], p["wf2"], p["bf2"])

    # bf16 h between LSTM steps only where the VPU has bf16 VALUs (v6e / v7x).
    dk = jax.devices()[0].device_kind.lower()
    use_bf16_h = ("v6" in dk) or ("v7" in dk)

    kern = functools.partial(avn_kernel, B=B, T3=T3, use_bf16_h=use_bf16_h)

    req_map3 = lambda r: (r, 0, 0)        # blocked on the request axis
    const_map2 = lambda r: (0, 0)         # same block every step -> resident weights

    out = pl.pallas_call(
        kern,
        out_shape=jax.ShapeDtypeStruct((R, B, 128), f32),
        grid=(R,),
        in_specs=[pl.BlockSpec((None, N, 2), req_map3),
                  pl.BlockSpec(mask.shape, const_map2)]
                 + [pl.BlockSpec(w.shape, const_map2) for w in weights],
        out_specs=pl.BlockSpec((None, B, 128), req_map3),
        compiler_params=pltpu.CompilerParams(dimension_semantics=("parallel",)),
    )(xcol, mask, *weights)

    out = out[:, :, :3]
    return out[0] if single else out


def init_params(key):
    eps = 1e-5
    ks = jax.random.split(key, 16)

    def rn(k, shape, scale=0.1):
        return (scale * jax.random.normal(k, shape)).astype(jnp.float32)

    # PyTorch-shaped parameters (deterministic synthetic init)
    conv1_w = rn(ks[0], (32, 1, 2))
    conv1_b = rn(ks[1], (32,))
    g1 = 1.0 + rn(ks[2], (32,))
    be1 = rn(ks[3], (32,))
    rm1, rv1 = jnp.zeros((32,), jnp.float32), jnp.ones((32,), jnp.float32)
    conv2_w = rn(ks[4], (64, 32, 2))
    conv2_b = rn(ks[5], (64,))
    g2 = 1.0 + rn(ks[6], (64,))
    be2 = rn(ks[7], (64,))
    rm2, rv2 = jnp.zeros((64,), jnp.float32), jnp.ones((64,), jnp.float32)
    w_ih = rn(ks[8], (4 * HIDDEN, 64))
    w_hh = rn(ks[9], (4 * HIDDEN, HIDDEN))
    b_ih = rn(ks[10], (4 * HIDDEN,))
    b_hh = rn(ks[11], (4 * HIDDEN,))
    fc1_w = rn(ks[12], (128, HIDDEN))
    fc1_b = rn(ks[13], (128,))
    fc2_w = rn(ks[14], (3, 128))
    fc2_b = rn(ks[15], (3,))

    # fold eval-mode BatchNorm1d (running stats) into per-channel scale/shift
    s1 = g1 / jnp.sqrt(rv1 + eps)
    t1 = be1 - rm1 * s1
    s2 = g2 / jnp.sqrt(rv2 + eps)
    t2 = be2 - rm2 * s2

    # permute LSTM gate blocks from PyTorch [i, f, g, o] to [i, f, o, g] so the kernel
    # applies one sigmoid over a contiguous 3*HIDDEN slab and one tanh over HIDDEN.
    H = HIDDEN
    perm = jnp.concatenate([jnp.arange(0, 2 * H),
                            jnp.arange(3 * H, 4 * H),
                            jnp.arange(2 * H, 3 * H)])
    w_ih_p = w_ih[perm]
    w_hh_p = w_hh[perm]
    b_p = (b_ih + b_hh)[perm]

    # fc2 weight lane-padded to 128 output columns (bf16 to halve its DMA);
    # the wrapper slices the first 3 columns of the lane-dense kernel output.
    wf2 = jnp.zeros((128, 128), jnp.float32).at[:, :3].set(fc2_w.T)
    bf2 = jnp.zeros((128,), jnp.float32).at[:3].set(fc2_b)

    bf16 = jnp.bfloat16
    return dict(
        w1=conv1_w[:, 0, :].T,                                                  # (2, 32)
        b1=conv1_b[None, :], s1=s1[None, :], t1=t1[None, :],
        w2=jnp.concatenate([conv2_w[:, :, 0].T, conv2_w[:, :, 1].T], axis=1),   # (32, 128)
        b2=conv2_b[None, :], s2=s2[None, :], t2=t2[None, :],
        wih=w_ih_p.T.astype(bf16), whh=w_hh_p.T.astype(bf16), bl=b_p[None, :],
        wf1=fc1_w.T.astype(bf16), bf1=fc1_b[None, :],
        wf2=wf2.astype(bf16), bf2=bf2[None, :],
    )


if __name__ == "__main__":
    key = jax.random.PRNGKey(0)
    kx, kp = jax.random.split(key)
    R, B, L = 2, 8, 8                   # stacked requests, batch, seq_len (input_size=8)
    params = init_params(kp)
    xs = jax.random.normal(kx, (R, B, L), jnp.float32)

    out_stacked = action_value_net_forward(xs, params)        # (R, B, 3), grid=(2,)
    out_single = action_value_net_forward(xs[0], params)      # (B, 3),    grid=(1,)
    jax.block_until_ready((out_stacked, out_single))

    assert out_stacked.shape == (R, B, 3) and out_stacked.dtype == jnp.float32
    assert out_single.shape == (B, 3) and out_single.dtype == jnp.float32
    assert bool(jnp.all(jnp.isfinite(out_stacked)))
    assert bool(jnp.all(jnp.isfinite(out_single)))
    # request-grid path must agree with the single-request path
    assert bool(jnp.allclose(out_stacked[0], out_single, atol=1e-5, rtol=1e-5))
    print("KERNEL_OK")
</pallas_src>

<mosaic_0001>
module attributes {stable_mosaic.version = 11 : i64} {
  func.func @avn_kernel(%arg0: i32, %arg1: memref<1x128x2xf32, #tpu.memory_space<vmem>>, %arg2: memref<128x32xf32, #tpu.memory_space<vmem>>, %arg3: memref<2x32xf32, #tpu.memory_space<vmem>>, %arg4: memref<1x32xf32, #tpu.memory_space<vmem>>, %arg5: memref<1x32xf32, #tpu.memory_space<vmem>>, %arg6: memref<1x32xf32, #tpu.memory_space<vmem>>, %arg7: memref<32x128xf32, #tpu.memory_space<vmem>>, %arg8: memref<1x64xf32, #tpu.memory_space<vmem>>, %arg9: memref<1x64xf32, #tpu.memory_space<vmem>>, %arg10: memref<1x64xf32, #tpu.memory_space<vmem>>, %arg11: memref<64x1024xbf16, #tpu.memory_space<vmem>>, %arg12: memref<256x1024xbf16, #tpu.memory_space<vmem>>, %arg13: memref<1x1024xf32, #tpu.memory_space<vmem>>, %arg14: memref<256x128xbf16, #tpu.memory_space<vmem>>, %arg15: memref<1x128xf32, #tpu.memory_space<vmem>>, %arg16: memref<128x128xbf16, #tpu.memory_space<vmem>>, %arg17: memref<1x128xf32, #tpu.memory_space<vmem>>, %arg18: memref<1x8x128xf32, #tpu.memory_space<vmem>>) attributes {dimension_semantics = [#tpu.dimension_semantics<parallel>], iteration_bounds = array<i64: 2>, scalar_prefetch = 0 : i64, scratch_operands = 0 : i64, tpu.core_type = #tpu.core_type<tc>, window_params = [{transform_indices = @transform_0, window_bounds = array<i64: 1, 128, 2>}, {pipeline_mode = #tpu.pipeline_mode<synchronous>, transform_indices = @transform_1, window_bounds = array<i64: 128, 32>}, {pipeline_mode = #tpu.pipeline_mode<synchronous>, transform_indices = @transform_2, window_bounds = array<i64: 2, 32>}, {pipeline_mode = #tpu.pipeline_mode<synchronous>, transform_indices = @transform_3, window_bounds = array<i64: 1, 32>}, {pipeline_mode = #tpu.pipeline_mode<synchronous>, transform_indices = @transform_4, window_bounds = array<i64: 1, 32>}, {pipeline_mode = #tpu.pipeline_mode<synchronous>, transform_indices = @transform_5, window_bounds = array<i64: 1, 32>}, {pipeline_mode = #tpu.pipeline_mode<synchronous>, transform_indices = @transform_6, window_bounds = array<i64: 32, 128>}, {pipeline_mode = #tpu.pipeline_mode<synchronous>, transform_indices = @transform_7, window_bounds = array<i64: 1, 64>}, {pipeline_mode = #tpu.pipeline_mode<synchronous>, transform_indices = @transform_8, window_bounds = array<i64: 1, 64>}, {pipeline_mode = #tpu.pipeline_mode<synchronous>, transform_indices = @transform_9, window_bounds = array<i64: 1, 64>}, {pipeline_mode = #tpu.pipeline_mode<synchronous>, transform_indices = @transform_10, window_bounds = array<i64: 64, 1024>}, {pipeline_mode = #tpu.pipeline_mode<synchronous>, transform_indices = @transform_11, window_bounds = array<i64: 256, 1024>}, {pipeline_mode = #tpu.pipeline_mode<synchronous>, transform_indices = @transform_12, window_bounds = array<i64: 1, 1024>}, {pipeline_mode = #tpu.pipeline_mode<synchronous>, transform_indices = @transform_13, window_bounds = array<i64: 256, 128>}, {pipeline_mode = #tpu.pipeline_mode<synchronous>, transform_indices = @transform_14, window_bounds = array<i64: 1, 128>}, {pipeline_mode = #tpu.pipeline_mode<synchronous>, transform_indices = @transform_15, window_bounds = array<i64: 128, 128>}, {pipeline_mode = #tpu.pipeline_mode<synchronous>, transform_indices = @transform_16, window_bounds = array<i64: 1, 128>}, {transform_indices = @transform_17, window_bounds = array<i64: 1, 8, 128>}]} {
    %c0 = arith.constant 0 : index
    %c0_0 = arith.constant 0 : index
    %c0_1 = arith.constant 0 : index
    %0 = vector.load %arg1[%c0, %c0_0, %c0_1] : memref<1x128x2xf32, #tpu.memory_space<vmem>>, vector<1x128x2xf32>
    %1 = vector.shape_cast %0 : vector<1x128x2xf32> to vector<128x2xf32>
    %c0_2 = arith.constant 0 : index
    %c0_3 = arith.constant 0 : index
    %2 = vector.load %arg3[%c0_2, %c0_3] : memref<2x32xf32, #tpu.memory_space<vmem>>, vector<2x32xf32>
    %3 = vector.extract_strided_slice %1 {offsets = [0, 0], sizes = [128, 1], strides = [1, 1]} : vector<128x2xf32> to vector<128x1xf32>
    %4 = vector.extract_strided_slice %2 {offsets = [0, 0], sizes = [1, 32], strides = [1, 1]} : vector<2x32xf32> to vector<1x32xf32>
    %5 = vector.broadcast %3 : vector<128x1xf32> to vector<128x32xf32>
    %6 = vector.broadcast %4 : vector<1x32xf32> to vector<128x32xf32>
    %7 = arith.mulf %5, %6 : vector<128x32xf32>
    %8 = vector.extract_strided_slice %1 {offsets = [0, 1], sizes = [128, 1], strides = [1, 1]} : vector<128x2xf32> to vector<128x1xf32>
    %9 = vector.extract_strided_slice %2 {offsets = [1, 0], sizes = [1, 32], strides = [1, 1]} : vector<2x32xf32> to vector<1x32xf32>
    %10 = vector.broadcast %8 : vector<128x1xf32> to vector<128x32xf32>
    %11 = vector.broadcast %9 : vector<1x32xf32> to vector<128x32xf32>
    %12 = arith.mulf %10, %11 : vector<128x32xf32>
    %13 = arith.addf %7, %12 : vector<128x32xf32>
    %c0_4 = arith.constant 0 : index
    %c0_5 = arith.constant 0 : index
    %14 = vector.load %arg4[%c0_4, %c0_5] : memref<1x32xf32, #tpu.memory_space<vmem>>, vector<1x32xf32>
    %15 = vector.broadcast %14 : vector<1x32xf32> to vector<128x32xf32>
    %16 = arith.addf %13, %15 : vector<128x32xf32>
    %cst = arith.constant 0.000000e+00 : f32
    %17 = vector.broadcast %cst : f32 to vector<128x32xf32>
    %18 = arith.maximumf %16, %17 : vector<128x32xf32>
    %c0_6 = arith.constant 0 : index
    %c0_7 = arith.constant 0 : index
    %19 = vector.load %arg5[%c0_6, %c0_7] : memref<1x32xf32, #tpu.memory_space<vmem>>, vector<1x32xf32>
    %20 = vector.broadcast %19 : vector<1x32xf32> to vector<128x32xf32>
    %21 = arith.mulf %18, %20 : vector<128x32xf32>
    %c0_8 = arith.constant 0 : index
    %c0_9 = arith.constant 0 : index
    %22 = vector.load %arg6[%c0_8, %c0_9] : memref<1x32xf32, #tpu.memory_space<vmem>>, vector<1x32xf32>
    %23 = vector.broadcast %22 : vector<1x32xf32> to vector<128x32xf32>
    %24 = arith.addf %21, %23 : vector<128x32xf32>
    %c0_10 = arith.constant 0 : index
    %c0_11 = arith.constant 0 : index
    %25 = vector.load %arg2[%c0_10, %c0_11] : memref<128x32xf32, #tpu.memory_space<vmem>>, vector<128x32xf32>
    %26 = arith.mulf %24, %25 : vector<128x32xf32>
    %c0_12 = arith.constant 0 : index
    %c0_13 = arith.constant 0 : index
    %27 = vector.load %arg7[%c0_12, %c0_13] : memref<32x128xf32, #tpu.memory_space<vmem>>, vector<32x128xf32>
    %cst_14 = arith.constant dense<0.000000e+00> : vector<128x128xf32>
    %28 = tpu.matmul %26, %27, %cst_14 {dimension_numbers = #tpu.dot_dimension_numbers<[1], [0], [0], [1], [0, 0, 1, 1], [], []>} : vector<128x32xf32>, vector<32x128xf32>, vector<128x128xf32> -> vector<128x128xf32>
    %29 = vector.extract_strided_slice %28 {offsets = [0, 0], sizes = [128, 64], strides = [1, 1]} : vector<128x128xf32> to vector<128x64xf32>
    %30 = vector.extract_strided_slice %28 {offsets = [0, 64], sizes = [128, 64], strides = [1, 1]} : vector<128x128xf32> to vector<128x64xf32>
    %31 = vector.extract_strided_slice %30 {offsets = [8, 0], sizes = [120, 64], strides = [1, 1]} : vector<128x64xf32> to vector<120x64xf32>
    %32 = vector.extract_strided_slice %30 {offsets = [0, 0], sizes = [8, 64], strides = [1, 1]} : vector<128x64xf32> to vector<8x64xf32>
    %33 = tpu.concatenate %31, %32 in 0 : vector<120x64xf32>, vector<8x64xf32> -> vector<128x64xf32>
    %34 = arith.addf %29, %33 : vector<128x64xf32>
    %c0_15 = arith.constant 0 : index
    %c0_16 = arith.constant 0 : index
    %35 = vector.load %arg8[%c0_15, %c0_16] : memref<1x64xf32, #tpu.memory_space<vmem>>, vector<1x64xf32>
    %36 = vector.broadcast %35 : vector<1x64xf32> to vector<128x64xf32>
    %37 = arith.addf %34, %36 : vector<128x64xf32>
    %cst_17 = arith.constant 0.000000e+00 : f32
    %38 = vector.broadcast %cst_17 : f32 to vector<128x64xf32>
    %39 = arith.maximumf %37, %38 : vector<128x64xf32>
    %c0_18 = arith.constant 0 : index
    %c0_19 = arith.constant 0 : index
    %40 = vector.load %arg9[%c0_18, %c0_19] : memref<1x64xf32, #tpu.memory_space<vmem>>, vector<1x64xf32>
    %41 = vector.broadcast %40 : vector<1x64xf32> to vector<128x64xf32>
    %42 = arith.mulf %39, %41 : vector<128x64xf32>
    %c0_20 = arith.constant 0 : index
    %c0_21 = arith.constant 0 : index
    %43 = vector.load %arg10[%c0_20, %c0_21] : memref<1x64xf32, #tpu.memory_space<vmem>>, vector<1x64xf32>
    %44 = vector.broadcast %43 : vector<1x64xf32> to vector<128x64xf32>
    %45 = arith.addf %42, %44 : vector<128x64xf32>
    %46 = vector.extract_strided_slice %45 {offsets = [0, 0], sizes = [8, 64], strides = [1, 1]} : vector<128x64xf32> to vector<8x64xf32>
    %47 = vector.extract_strided_slice %45 {offsets = [8, 0], sizes = [8, 64], strides = [1, 1]} : vector<128x64xf32> to vector<8x64xf32>
    %48 = arith.maximumf %46, %47 : vector<8x64xf32>
    %49 = vector.extract_strided_slice %45 {offsets = [16, 0], sizes = [8, 64], strides = [1, 1]} : vector<128x64xf32> to vector<8x64xf32>
    %50 = vector.extract_strided_slice %45 {offsets = [24, 0], sizes = [8, 64], strides = [1, 1]} : vector<128x64xf32> to vector<8x64xf32>
    %51 = arith.maximumf %49, %50 : vector<8x64xf32>
    %52 = vector.extract_strided_slice %45 {offsets = [32, 0], sizes = [8, 64], strides = [1, 1]} : vector<128x64xf32> to vector<8x64xf32>
    %53 = vector.extract_strided_slice %45 {offsets = [40, 0], sizes = [8, 64], strides = [1, 1]} : vector<128x64xf32> to vector<8x64xf32>
    %54 = arith.maximumf %52, %53 : vector<8x64xf32>
    %55 = vector.extract_strided_slice %45 {offsets = [48, 0], sizes = [8, 64], strides = [1, 1]} : vector<128x64xf32> to vector<8x64xf32>
    %56 = vector.extract_strided_slice %45 {offsets = [56, 0], sizes = [8, 64], strides = [1, 1]} : vector<128x64xf32> to vector<8x64xf32>
    %57 = arith.maximumf %55, %56 : vector<8x64xf32>
    %58 = vector.extract_strided_slice %45 {offsets = [64, 0], sizes = [8, 64], strides = [1, 1]} : vector<128x64xf32> to vector<8x64xf32>
    %59 = vector.extract_strided_slice %45 {offsets = [72, 0], sizes = [8, 64], strides = [1, 1]} : vector<128x64xf32> to vector<8x64xf32>
    %60 = arith.maximumf %58, %59 : vector<8x64xf32>
    %61 = tpu.concatenate %48, %51, %54, %57, %60 in 0 : vector<8x64xf32>, vector<8x64xf32>, vector<8x64xf32>, vector<8x64xf32>, vector<8x64xf32> -> vector<40x64xf32>
    %62 = arith.truncf %61 : vector<40x64xf32> to vector<40x64xbf16>
    %c0_22 = arith.constant 0 : index
    %c0_23 = arith.constant 0 : index
    %63 = vector.load %arg11[%c0_22, %c0_23] : memref<64x1024xbf16, #tpu.memory_space<vmem>>, vector<64x1024xbf16>
    %cst_24 = arith.constant dense<0.000000e+00> : vector<40x1024xf32>
    %64 = tpu.matmul %62, %63, %cst_24 {dimension_numbers = #tpu.dot_dimension_numbers<[1], [0], [0], [1], [0, 0, 1, 1], [], []>} : vector<40x64xbf16>, vector<64x1024xbf16>, vector<40x1024xf32> -> vector<40x1024xf32>
    %c0_25 = arith.constant 0 : index
    %c0_26 = arith.constant 0 : index
    %65 = vector.load %arg13[%c0_25, %c0_26] : memref<1x1024xf32, #tpu.memory_space<vmem>>, vector<1x1024xf32>
    %66 = vector.broadcast %65 : vector<1x1024xf32> to vector<40x1024xf32>
    %67 = arith.addf %64, %66 : vector<40x1024xf32>
    %c0_27 = arith.constant 0 : index
    %c0_28 = arith.constant 0 : index
    %68 = vector.load %arg12[%c0_27, %c0_28] : memref<256x1024xbf16, #tpu.memory_space<vmem>>, vector<256x1024xbf16>
    %cst_29 = arith.constant 0.000000e+00 : f32
    %69 = vector.broadcast %cst_29 : f32 to vector<8x256xf32>
    %cst_30 = arith.constant 0.000000e+00 : f32
    %70 = vector.broadcast %cst_30 : f32 to vector<8x256xf32>
    %71 = arith.truncf %69 : vector<8x256xf32> to vector<8x256xbf16>
    %72 = vector.extract_strided_slice %67 {offsets = [0, 0], sizes = [8, 1024], strides = [1, 1]} : vector<40x1024xf32> to vector<8x1024xf32>
    %cst_31 = arith.constant dense<0.000000e+00> : vector<8x1024xf32>
    %73 = tpu.matmul %71, %68, %cst_31 {dimension_numbers = #tpu.dot_dimension_numbers<[1], [0], [0], [1], [0, 0, 1, 1], [], []>} : vector<8x256xbf16>, vector<256x1024xbf16>, vector<8x1024xf32> -> vector<8x1024xf32>
    %74 = arith.addf %72, %73 : vector<8x1024xf32>
    %75 = vector.extract_strided_slice %74 {offsets = [0, 0], sizes = [8, 768], strides = [1, 1]} : vector<8x1024xf32> to vector<8x768xf32>
    %76 = arith.negf %75 : vector<8x768xf32>
    %77 = math.exp %76 : vector<8x768xf32>
    %cst_32 = arith.constant 1.000000e+00 : f32
    %78 = vector.broadcast %cst_32 : f32 to vector<8x768xf32>
    %79 = arith.addf %78, %77 : vector<8x768xf32>
    %80 = arith.divf %78, %79 : vector<8x768xf32>
    %81 = vector.extract_strided_slice %80 {offsets = [0, 0], sizes = [8, 256], strides = [1, 1]} : vector<8x768xf32> to vector<8x256xf32>
    %82 = vector.extract_strided_slice %80 {offsets = [0, 256], sizes = [8, 256], strides = [1, 1]} : vector<8x768xf32> to vector<8x256xf32>
    %83 = vector.extract_strided_slice %80 {offsets = [0, 512], sizes = [8, 256], strides = [1, 1]} : vector<8x768xf32> to vector<8x256xf32>
    %84 = vector.extract_strided_slice %74 {offsets = [0, 768], sizes = [8, 256], strides = [1, 1]} : vector<8x1024xf32> to vector<8x256xf32>
    %85 = math.tanh %84 : vector<8x256xf32>
    %86 = arith.mulf %82, %70 : vector<8x256xf32>
    %87 = arith.mulf %81, %85 : vector<8x256xf32>
    %88 = arith.addf %86, %87 : vector<8x256xf32>
    %89 = math.tanh %88 : vector<8x256xf32>
    %90 = arith.mulf %83, %89 : vector<8x256xf32>
    %91 = arith.truncf %90 : vector<8x256xf32> to vector<8x256xbf16>
    %92 = vector.extract_strided_slice %67 {offsets = [8, 0], sizes = [8, 1024], strides = [1, 1]} : vector<40x1024xf32> to vector<8x1024xf32>
    %cst_33 = arith.constant dense<0.000000e+00> : vector<8x1024xf32>
    %93 = tpu.matmul %91, %68, %cst_33 {dimension_numbers = #tpu.dot_dimension_numbers<[1], [0], [0], [1], [0, 0, 1, 1], [], []>} : vector<8x256xbf16>, vector<256x1024xbf16>, vector<8x1024xf32> -> vector<8x1024xf32>
    %94 = arith.addf %92, %93 : vector<8x1024xf32>
    %95 = vector.extract_strided_slice %94 {offsets = [0, 0], sizes = [8, 768], strides = [1, 1]} : vector<8x1024xf32> to vector<8x768xf32>
    %96 = arith.negf %95 : vector<8x768xf32>
    %97 = math.exp %96 : vector<8x768xf32>
    %cst_34 = arith.constant 1.000000e+00 : f32
    %98 = vector.broadcast %cst_34 : f32 to vector<8x768xf32>
    %99 = arith.addf %98, %97 : vector<8x768xf32>
    %100 = arith.divf %98, %99 : vector<8x768xf32>
    %101 = vector.extract_strided_slice %100 {offsets = [0, 0], sizes = [8, 256], strides = [1, 1]} : vector<8x768xf32> to vector<8x256xf32>
    %102 = vector.extract_strided_slice %100 {offsets = [0, 256], sizes = [8, 256], strides = [1, 1]} : vector<8x768xf32> to vector<8x256xf32>
    %103 = vector.extract_strided_slice %100 {offsets = [0, 512], sizes = [8, 256], strides = [1, 1]} : vector<8x768xf32> to vector<8x256xf32>
    %104 = vector.extract_strided_slice %94 {offsets = [0, 768], sizes = [8, 256], strides = [1, 1]} : vector<8x1024xf32> to vector<8x256xf32>
    %105 = math.tanh %104 : vector<8x256xf32>
    %106 = arith.mulf %102, %88 : vector<8x256xf32>
    %107 = arith.mulf %101, %105 : vector<8x256xf32>
    %108 = arith.addf %106, %107 : vector<8x256xf32>
    %109 = math.tanh %108 : vector<8x256xf32>
    %110 = arith.mulf %103, %109 : vector<8x256xf32>
    %111 = arith.truncf %110 : vector<8x256xf32> to vector<8x256xbf16>
    %112 = vector.extract_strided_slice %67 {offsets = [16, 0], sizes = [8, 1024], strides = [1, 1]} : vector<40x1024xf32> to vector<8x1024xf32>
    %cst_35 = arith.constant dense<0.000000e+00> : vector<8x1024xf32>
    %113 = tpu.matmul %111, %68, %cst_35 {dimension_numbers = #tpu.dot_dimension_numbers<[1], [0], [0], [1], [0, 0, 1, 1], [], []>} : vector<8x256xbf16>, vector<256x1024xbf16>, vector<8x1024xf32> -> vector<8x1024xf32>
    %114 = arith.addf %112, %113 : vector<8x1024xf32>
    %115 = vector.extract_strided_slice %114 {offsets = [0, 0], sizes = [8, 768], strides = [1, 1]} : vector<8x1024xf32> to vector<8x768xf32>
    %116 = arith.negf %115 : vector<8x768xf32>
    %117 = math.exp %116 : vector<8x768xf32>
    %cst_36 = arith.constant 1.000000e+00 : f32
    %118 = vector.broadcast %cst_36 : f32 to vector<8x768xf32>
    %119 = arith.addf %118, %117 : vector<8x768xf32>
    %120 = arith.divf %118, %119 : vector<8x768xf32>
    %121 = vector.extract_strided_slice %120 {offsets = [0, 0], sizes = [8, 256], strides = [1, 1]} : vector<8x768xf32> to vector<8x256xf32>
    %122 = vector.extract_strided_slice %120 {offsets = [0, 256], sizes = [8, 256], strides = [1, 1]} : vector<8x768xf32> to vector<8x256xf32>
    %123 = vector.extract_strided_slice %120 {offsets = [0, 512], sizes = [8, 256], strides = [1, 1]} : vector<8x768xf32> to vector<8x256xf32>
    %124 = vector.extract_strided_slice %114 {offsets = [0, 768], sizes = [8, 256], strides = [1, 1]} : vector<8x1024xf32> to vector<8x256xf32>
    %125 = math.tanh %124 : vector<8x256xf32>
    %126 = arith.mulf %122, %108 : vector<8x256xf32>
    %127 = arith.mulf %121, %125 : vector<8x256xf32>
    %128 = arith.addf %126, %127 : vector<8x256xf32>
    %129 = math.tanh %128 : vector<8x256xf32>
    %130 = arith.mulf %123, %129 : vector<8x256xf32>
    %131 = arith.truncf %130 : vector<8x256xf32> to vector<8x256xbf16>
    %132 = vector.extract_strided_slice %67 {offsets = [24, 0], sizes = [8, 1024], strides = [1, 1]} : vector<40x1024xf32> to vector<8x1024xf32>
    %cst_37 = arith.constant dense<0.000000e+00> : vector<8x1024xf32>
    %133 = tpu.matmul %131, %68, %cst_37 {dimension_numbers = #tpu.dot_dimension_numbers<[1], [0], [0], [1], [0, 0, 1, 1], [], []>} : vector<8x256xbf16>, vector<256x1024xbf16>, vector<8x1024xf32> -> vector<8x1024xf32>
    %134 = arith.addf %132, %133 : vector<8x1024xf32>
    %135 = vector.extract_strided_slice %134 {offsets = [0, 0], sizes = [8, 768], strides = [1, 1]} : vector<8x1024xf32> to vector<8x768xf32>
    %136 = arith.negf %135 : vector<8x768xf32>
    %137 = math.exp %136 : vector<8x768xf32>
    %cst_38 = arith.constant 1.000000e+00 : f32
    %138 = vector.broadcast %cst_38 : f32 to vector<8x768xf32>
    %139 = arith.addf %138, %137 : vector<8x768xf32>
    %140 = arith.divf %138, %139 : vector<8x768xf32>
    %141 = vector.extract_strided_slice %140 {offsets = [0, 0], sizes = [8, 256], strides = [1, 1]} : vector<8x768xf32> to vector<8x256xf32>
    %142 = vector.extract_strided_slice %140 {offsets = [0, 256], sizes = [8, 256], strides = [1, 1]} : vector<8x768xf32> to vector<8x256xf32>
    %143 = vector.extract_strided_slice %140 {offsets = [0, 512], sizes = [8, 256], strides = [1, 1]} : vector<8x768xf32> to vector<8x256xf32>
    %144 = vector.extract_strided_slice %134 {offsets = [0, 768], sizes = [8, 256], strides = [1, 1]} : vector<8x1024xf32> to vector<8x256xf32>
    %145 = math.tanh %144 : vector<8x256xf32>
    %146 = arith.mulf %142, %128 : vector<8x256xf32>
    %147 = arith.mulf %141, %145 : vector<8x256xf32>
    %148 = arith.addf %146, %147 : vector<8x256xf32>
    %149 = math.tanh %148 : vector<8x256xf32>
    %150 = arith.mulf %143, %149 : vector<8x256xf32>
    %151 = arith.truncf %150 : vector<8x256xf32> to vector<8x256xbf16>
    %152 = vector.extract_strided_slice %67 {offsets = [32, 0], sizes = [8, 1024], strides = [1, 1]} : vector<40x1024xf32> to vector<8x1024xf32>
    %cst_39 = arith.constant dense<0.000000e+00> : vector<8x1024xf32>
    %153 = tpu.matmul %151, %68, %cst_39 {dimension_numbers = #tpu.dot_dimension_numbers<[1], [0], [0], [1], [0, 0, 1, 1], [], []>} : vector<8x256xbf16>, vector<256x1024xbf16>, vector<8x1024xf32> -> vector<8x1024xf32>
    %154 = arith.addf %152, %153 : vector<8x1024xf32>
    %155 = vector.extract_strided_slice %154 {offsets = [0, 0], sizes = [8, 768], strides = [1, 1]} : vector<8x1024xf32> to vector<8x768xf32>
    %156 = arith.negf %155 : vector<8x768xf32>
    %157 = math.exp %156 : vector<8x768xf32>
    %cst_40 = arith.constant 1.000000e+00 : f32
    %158 = vector.broadcast %cst_40 : f32 to vector<8x768xf32>
    %159 = arith.addf %158, %157 : vector<8x768xf32>
    %160 = arith.divf %158, %159 : vector<8x768xf32>
    %161 = vector.extract_strided_slice %160 {offsets = [0, 0], sizes = [8, 256], strides = [1, 1]} : vector<8x768xf32> to vector<8x256xf32>
    %162 = vector.extract_strided_slice %160 {offsets = [0, 256], sizes = [8, 256], strides = [1, 1]} : vector<8x768xf32> to vector<8x256xf32>
    %163 = vector.extract_strided_slice %160 {offsets = [0, 512], sizes = [8, 256], strides = [1, 1]} : vector<8x768xf32> to vector<8x256xf32>
    %164 = vector.extract_strided_slice %154 {offsets = [0, 768], sizes = [8, 256], strides = [1, 1]} : vector<8x1024xf32> to vector<8x256xf32>
    %165 = math.tanh %164 : vector<8x256xf32>
    %166 = arith.mulf %162, %148 : vector<8x256xf32>
    %167 = arith.mulf %161, %165 : vector<8x256xf32>
    %168 = arith.addf %166, %167 : vector<8x256xf32>
    %169 = math.tanh %168 : vector<8x256xf32>
    %170 = arith.mulf %163, %169 : vector<8x256xf32>
    %171 = arith.truncf %170 : vector<8x256xf32> to vector<8x256xbf16>
    %c0_41 = arith.constant 0 : index
    %c0_42 = arith.constant 0 : index
    %172 = vector.load %arg14[%c0_41, %c0_42] : memref<256x128xbf16, #tpu.memory_space<vmem>>, vector<256x128xbf16>
    %cst_43 = arith.constant dense<0.000000e+00> : vector<8x128xf32>
    %173 = tpu.matmul %171, %172, %cst_43 {dimension_numbers = #tpu.dot_dimension_numbers<[1], [0], [0], [1], [0, 0, 1, 1], [], []>} : vector<8x256xbf16>, vector<256x128xbf16>, vector<8x128xf32> -> vector<8x128xf32>
    %c0_44 = arith.constant 0 : index
    %c0_45 = arith.constant 0 : index
    %174 = vector.load %arg15[%c0_44, %c0_45] : memref<1x128xf32, #tpu.memory_space<vmem>>, vector<1x128xf32>
    %175 = vector.broadcast %174 : vector<1x128xf32> to vector<8x128xf32>
    %176 = arith.addf %173, %175 : vector<8x128xf32>
    %cst_46 = arith.constant 0.000000e+00 : f32
    %177 = vector.broadcast %cst_46 : f32 to vector<8x128xf32>
    %178 = arith.maximumf %176, %177 : vector<8x128xf32>
    %179 = arith.truncf %178 : vector<8x128xf32> to vector<8x128xbf16>
    %c0_47 = arith.constant 0 : index
    %c0_48 = arith.constant 0 : index
    %180 = vector.load %arg16[%c0_47, %c0_48] : memref<128x128xbf16, #tpu.memory_space<vmem>>, vector<128x128xbf16>
    %cst_49 = arith.constant dense<0.000000e+00> : vector<8x128xf32>
    %181 = tpu.matmul %179, %180, %cst_49 {dimension_numbers = #tpu.dot_dimension_numbers<[1], [0], [0], [1], [0, 0, 1, 1], [], []>} : vector<8x128xbf16>, vector<128x128xbf16>, vector<8x128xf32> -> vector<8x128xf32>
    %c0_50 = arith.constant 0 : index
    %c0_51 = arith.constant 0 : index
    %182 = vector.load %arg17[%c0_50, %c0_51] : memref<1x128xf32, #tpu.memory_space<vmem>>, vector<1x128xf32>
    %183 = vector.broadcast %182 : vector<1x128xf32> to vector<8x128xf32>
    %184 = arith.addf %181, %183 : vector<8x128xf32>
    %c0_52 = arith.constant 0 : index
    %c0_53 = arith.constant 0 : index
    %c0_54 = arith.constant 0 : index
    %185 = vector.load %arg18[%c0_52, %c0_53, %c0_54] : memref<1x8x128xf32, #tpu.memory_space<vmem>>, vector<1x8x128xf32>
    %186 = vector.shape_cast %185 : vector<1x8x128xf32> to vector<8x128xf32>
    %187 = vector.shape_cast %184 : vector<8x128xf32> to vector<1x8x128xf32>
    tpu.vector_store %arg18[%c0_52, %c0_53, %c0_54], %187 {strides = array<i32>} : memref<1x8x128xf32, #tpu.memory_space<vmem>>, vector<1x8x128xf32>,
    return
  }
  func.func @transform_0(%arg0: i32) -> (i32, i32, i32) {
    %c0_i32 = arith.constant 0 : i32
    %c0_i32_0 = arith.constant 0 : i32
    %c0_i32_1 = arith.constant 0 : i32
    return %arg0, %c0_i32, %c0_i32_0 : i32, i32, i32
  }
  func.func @transform_1(%arg0: i32) -> (i32, i32) {
    %c0_i32 = arith.constant 0 : i32
    %c0_i32_0 = arith.constant 0 : i32
    %c0_i32_1 = arith.constant 0 : i32
    return %c0_i32, %c0_i32_0 : i32, i32
  }
  func.func @transform_2(%arg0: i32) -> (i32, i32) {
    %c0_i32 = arith.constant 0 : i32
    %c0_i32_0 = arith.constant 0 : i32
    %c0_i32_1 = arith.constant 0 : i32
    return %c0_i32, %c0_i32_0 : i32, i32
  }
  func.func @transform_3(%arg0: i32) -> (i32, i32) {
    %c0_i32 = arith.constant 0 : i32
    %c0_i32_0 = arith.constant 0 : i32
    %c0_i32_1 = arith.constant 0 : i32
    return %c0_i32, %c0_i32_0 : i32, i32
  }
  func.func @transform_4(%arg0: i32) -> (i32, i32) {
    %c0_i32 = arith.constant 0 : i32
    %c0_i32_0 = arith.constant 0 : i32
    %c0_i32_1 = arith.constant 0 : i32
    return %c0_i32, %c0_i32_0 : i32, i32
  }
  func.func @transform_5(%arg0: i32) -> (i32, i32) {
    %c0_i32 = arith.constant 0 : i32
    %c0_i32_0 = arith.constant 0 : i32
    %c0_i32_1 = arith.constant 0 : i32
    return %c0_i32, %c0_i32_0 : i32, i32
  }
  func.func @transform_6(%arg0: i32) -> (i32, i32) {
    %c0_i32 = arith.constant 0 : i32
    %c0_i32_0 = arith.constant 0 : i32
    %c0_i32_1 = arith.constant 0 : i32
    return %c0_i32, %c0_i32_0 : i32, i32
  }
  func.func @transform_7(%arg0: i32) -> (i32, i32) {
    %c0_i32 = arith.constant 0 : i32
    %c0_i32_0 = arith.constant 0 : i32
    %c0_i32_1 = arith.constant 0 : i32
    return %c0_i32, %c0_i32_0 : i32, i32
  }
  func.func @transform_8(%arg0: i32) -> (i32, i32) {
    %c0_i32 = arith.constant 0 : i32
    %c0_i32_0 = arith.constant 0 : i32
    %c0_i32_1 = arith.constant 0 : i32
    return %c0_i32, %c0_i32_0 : i32, i32
  }
  func.func @transform_9(%arg0: i32) -> (i32, i32) {
    %c0_i32 = arith.constant 0 : i32
    %c0_i32_0 = arith.constant 0 : i32
    %c0_i32_1 = arith.constant 0 : i32
    return %c0_i32, %c0_i32_0 : i32, i32
  }
  func.func @transform_10(%arg0: i32) -> (i32, i32) {
    %c0_i32 = arith.constant 0 : i32
    %c0_i32_0 = arith.constant 0 : i32
    %c0_i32_1 = arith.constant 0 : i32
    return %c0_i32, %c0_i32_0 : i32, i32
  }
  func.func @transform_11(%arg0: i32) -> (i32, i32) {
    %c0_i32 = arith.constant 0 : i32
    %c0_i32_0 = arith.constant 0 : i32
    %c0_i32_1 = arith.constant 0 : i32
    return %c0_i32, %c0_i32_0 : i32, i32
  }
  func.func @transform_12(%arg0: i32) -> (i32, i32) {
    %c0_i32 = arith.constant 0 : i32
    %c0_i32_0 = arith.constant 0 : i32
    %c0_i32_1 = arith.constant 0 : i32
    return %c0_i32, %c0_i32_0 : i32, i32
  }
  func.func @transform_13(%arg0: i32) -> (i32, i32) {
    %c0_i32 = arith.constant 0 : i32
    %c0_i32_0 = arith.constant 0 : i32
    %c0_i32_1 = arith.constant 0 : i32
    return %c0_i32, %c0_i32_0 : i32, i32
  }
  func.func @transform_14(%arg0: i32) -> (i32, i32) {
    %c0_i32 = arith.constant 0 : i32
    %c0_i32_0 = arith.constant 0 : i32
    %c0_i32_1 = arith.constant 0 : i32
    return %c0_i32, %c0_i32_0 : i32, i32
  }
  func.func @transform_15(%arg0: i32) -> (i32, i32) {
    %c0_i32 = arith.constant 0 : i32
    %c0_i32_0 = arith.constant 0 : i32
    %c0_i32_1 = arith.constant 0 : i32
    return %c0_i32, %c0_i32_0 : i32, i32
  }
  func.func @transform_16(%arg0: i32) -> (i32, i32) {
    %c0_i32 = arith.constant 0 : i32
    %c0_i32_0 = arith.constant 0 : i32
    %c0_i32_1 = arith.constant 0 : i32
    return %c0_i32, %c0_i32_0 : i32, i32
  }
  func.func @transform_17(%arg0: i32) -> (i32, i32, i32) {
    %c0_i32 = arith.constant 0 : i32
    %c0_i32_0 = arith.constant 0 : i32
    %c0_i32_1 = arith.constant 0 : i32
    return %arg0, %c0_i32, %c0_i32_0 : i32, i32, i32
  }
}

</mosaic_0001>

<bundles_post_ra>
// kernel: action_value_net_forward.1
= control target key start
LH: loop header
LB: loop body
LE: loop exit
PB: predicated region body
PF: predicated region fallthrough
CT: control target
= control target key end

     0   :  { %s4585_s24 = smov 0   ;;  %s6687_s0 = inlined_call_operand.vmem [shape: f32[2,128,2], index: 0, kind: input, shape index: {}]   ;;  %s6688_s1 = inlined_call_operand.vmem [shape: f32[128,32], index: 1, kind: input, shape index: {}]   ;;  %s6689_s2 = inlined_call_operand.vmem [shape: f32[2,32], index: 2, kind: input, shape index: {}]   ;;  %s6690_s3 = inlined_call_operand.vmem [shape: f32[1,32], index: 3, kind: input, shape index: {}]   ;;  %s6691_s4 = inlined_call_operand.vmem [shape: f32[1,32], index: 4, kind: input, shape index: {}]   ;;  %s6692_s5 = inlined_call_operand.vmem [shape: f32[1,32], index: 5, kind: input, shape index: {}]   ;;  %s6693_s6 = inlined_call_operand.vmem [shape: f32[32,128], index: 6, kind: input, shape index: {}]   ;;  %s6694_s7 = inlined_call_operand.vmem [shape: f32[1,64], index: 7, kind: input, shape index: {}]   ;;  %s6695_s8 = inlined_call_operand.vmem [shape: f32[1,64], index: 8, kind: input, shape index: {}]   ;;  %s6696_s9 = inlined_call_operand.vmem [shape: f32[1,64], index: 9, kind: input, shape index: {}]   ;;  %s6697_s10 = inlined_call_operand.vmem [shape: bf16[64,1024], index: 10, kind: input, shape index: {}]   ;;  %s6698_s11 = inlined_call_operand.vmem [shape: bf16[256,1024], index: 11, kind: input, shape index: {}]   ;;  %s6699_s12 = inlined_call_operand.vmem [shape: f32[1,1024], index: 12, kind: input, shape index: {}]   ;;  %s6700_s13 = inlined_call_operand.vmem [shape: bf16[256,128], index: 13, kind: input, shape index: {}]   ;;  %s6701_s14 = inlined_call_operand.vmem [shape: f32[1,128], index: 14, kind: input, shape index: {}]   ;;  %s6702_s15 = inlined_call_operand.vmem [shape: bf16[128,128], index: 15, kind: input, shape index: {}]   ;;  %s6703_s16 = inlined_call_operand.vmem [shape: f32[1,128], index: 16, kind: input, shape index: {}]   ;;  %s6704_s17 = inlined_call_operand.vmem [shape: f32[2,8,128], index: 17, kind: output, shape index: {}]  }
   0x1   :  { %6976 = sst [smem:[#allocation162_spill]] %s6687_s0 }
   0x2   :  { %6977 = sst [smem:[#allocation163_spill]] %s6688_s1 }
   0x3 LB: > { %s3902_s25 = sadd.s32 4294967295, %s4488_s24   ;;  %p3906_p0 = scmp.ge.s32.totalorder %s4488_s24, 1  ;;  %s4488_s24 = sphi %s4585_s24, %s27_s24  }
   0x4   : > { %p487_p1 = scmp.lt.s32.totalorder %s4488_s24, 3 }
   0x6   : > { %p488_p2 = pnand %p3906_p0, %p487_p1 }
   0x8   : > { %491 = sbr.rel (%p488_p2) target bundleno = 2506 (0x9ca), region = 88 }
   0xd   : > { %p538_p3 = scmp.lt.s32.totalorder %s3902_s25, 1  ;;  %v6708_v0 = vmov 0   ;;  %s6978_s29 = sld [smem:[#allocation162_spill]]  ;;  %v4491_v3 = vmov 1   ;;  %v885_v5 = vld [vmem:[%s6693_s6 + $0x18] sm:$0xff]  ;;  %v884_v7 = vld [vmem:[%s6693_s6 + $0x10] sm:$0xff]  ;;  %v645_v22 = vlaneseq }
   0xe   : > { %4289 = vset.pattern.permute.xlu1 %v6708_v0  ;;  %4287 = vset.pattern.permute.xlu0 %v6708_v0  ;;  %v883_v8 = vld [vmem:[%s6693_s6 + $0x8] sm:$0xff]  ;;  %v882_v9 = vld [vmem:[%s6693_s6] sm:$0xff]  ;;  %s6979_s21 = sld [smem:[#allocation163_spill]]  ;;  %vm886_vm0 = vcmask 261120   ;;  %vm1428_vm1 = vcmask 523264   ;;  %vm4494_vm2 = vmmov 0  }
   0xf   : > { %s7489_s25 = smov (!%p538_p3, %s3902_s25), 1  ;;  %4214 = vmatprep.subr.mxu0 %v885_v5  ;;  %4266 = vmatprep.subr.mxu1 %v885_v5  ;;  %v4635_v23 = vshrl.u32 %v645_v22, 7  ;;  %v564_v26 = vld [vmem:[%s6689_s2] sm:$0x3] }
  0x10   : > { %s4162_s26 = sshll.u32 %s7489_s25, 7  ;;  %4215 = vmatpush3.msra.mxu0 %v885_v5  ;;  %4270 = vmatpush3.msra.mxu1 %v885_v5  ;;  %v4657_v37 = vld [vmem:[%s6690_s3] ss:$0 sm:$0xff] }
  0x11   : > { %4216 = vmatprep.subr.mxu0 %v884_v7  ;;  %4267 = vmatprep.subr.mxu1 %v884_v7  ;;  %v6707_v24 = vsub.s32 0, %v4635_v23  ;;  %v6706_v25 = vsub.s32 1, %v4635_v23  ;;  %v4665_v45 = vld [vmem:[%s6691_s4] ss:$0 sm:$0xff] }
  0x12   : > { %4217 = vmatpush3.msra.mxu0 %v884_v7  ;;  %4271 = vmatpush3.msra.mxu1 %v884_v7  ;;  %v4671_v49 = vld [vmem:[%s6692_s5] ss:$0 sm:$0xff] }
  0x13   : > { %s4601_s0 = scalar_lea.vmem %s6978_s29, %s4162_s26  ;;  %4218 = vmatprep.subr.mxu0 %v883_v8  ;;  %4268 = vmatprep.subr.mxu1 %v883_v8  ;;  %v4644_v29 = vrot.slane %v564_v26, %v6707_v24  ;;  %v4648_v30 = vrot.slane %v564_v26, %v6706_v25 }
  0x14   : > { %v549_v1 = vld [vmem:[%s4601_s0 + $0x8] sm:$0xff]  ;;  %v548_v2 = vld [vmem:[%s4601_s0] sm:$0xff]  ;;  %v550_v4 = vld [vmem:[%s4601_s0 + $0x10] sm:$0xff]  ;;  %4219 = vmatpush3.msra.mxu0 %v883_v8  ;;  %4272 = vmatpush3.msra.mxu1 %v883_v8 }
  0x15   : > { %572 = vperm.xlu1 %4289, %v549_v1   ;;  %567 = vperm.xlu0 %4287, %v548_v2   ;;  %v551_v6 = vld [vmem:[%s4601_s0 + $0x18] sm:$0xff]  ;;  %v552_v10 = vld [vmem:[%s4601_s0 + $0x20] sm:$0xff]  ;;  %v553_v11 = vld [vmem:[%s4601_s0 + $0x28] sm:$0xff] }
  0x16   : > { %4220 = vmatprep.subr.mxu0 %v882_v9  ;;  %4269 = vmatprep.subr.mxu1 %v882_v9  ;;  %v554_v12 = vld [vmem:[%s4601_s0 + $0x30] sm:$0xff]  ;;  %v556_v13 = vld [vmem:[%s4601_s0 + $0x40] sm:$0xff]  ;;  %v555_v14 = vld [vmem:[%s4601_s0 + $0x38] sm:$0xff] }
  0x17   : > { %4221 = vmatpush3.msra.mxu0 %v882_v9  ;;  %4273 = vmatpush3.msra.mxu1 %v882_v9  ;;  %v558_v15 = vld [vmem:[%s4601_s0 + $0x50] sm:$0xff]  ;;  %v557_v16 = vld [vmem:[%s4601_s0 + $0x48] sm:$0xff]  ;;  %v559_v17 = vld [vmem:[%s4601_s0 + $0x58] sm:$0xff] }
  0x18   : > { %v560_v18 = vld [vmem:[%s4601_s0 + $0x60] sm:$0xff]  ;;  %v561_v19 = vld [vmem:[%s4601_s0 + $0x68] sm:$0xff]  ;;  %v562_v20 = vld [vmem:[%s4601_s0 + $0x70] sm:$0xff] }
  0x19   : > { %4290 = vset.pattern.permute.xlu1 %v4491_v3  ;;  %4288 = vset.pattern.permute.xlu0 %v4491_v3  ;;  %v563_v21 = vld [vmem:[%s4601_s0 + $0x78] sm:$0xff]  ;;  %v850_v58 = vld [vmem:[%s6979_s21] sm:$0xff]  ;;  %v851_v59 = vld [vmem:[%s6979_s21 + $0x8] sm:$0xff]  ;;  %s4492_s0 = smov 64  }
  0x1a   : > { %670 = vperm.xlu1 %4290, %v549_v1   ;;  %666 = vperm.xlu0 %4288, %v548_v2   ;;  %v852_v9 = vld [vmem:[%s6979_s21 + $0x10] sm:$0xff]  ;;  %v853_v26 = vld [vmem:[%s6979_s21 + $0x18] sm:$0xff] }
  0x1e   : > { %4291 = vset.pattern.permute.xlu1 %v6708_v0  ;;  %674 = vperm.xlu0 %4288, %v550_v4  }
  0x1f   : > { %577 = vperm.xlu1 %4291, %v550_v4  }
  0x22   : > { %678 = vperm.xlu0 %4288, %v551_v6  }
  0x23   : > { %582 = vperm.xlu1 %4291, %v551_v6  }
  0x26   : > { %682 = vperm.xlu0 %4288, %v552_v10  }
  0x27   : > { %587 = vperm.xlu1 %4291, %v552_v10  }
  0x2a   : > { %686 = vperm.xlu0 %4288, %v553_v11  }
  0x2b   : > { %592 = vperm.xlu1 %4291, %v553_v11  }
  0x2e   : > { %4292 = vset.pattern.permute.xlu0 %v6708_v0 }
  0x2f   : > { %597 = vperm.xlu1 %4291, %v554_v12   ;;  %607 = vperm.xlu0 %4292, %v556_v13  }
  0x33   : > { %4293 = vset.pattern.permute.xlu1 %v4491_v3  ;;  %602 = vperm.xlu0 %4292, %v555_v14  }
  0x34   : > { %690 = vperm.xlu1 %4293, %v554_v12  }
  0x37   : > { %4295 = vset.pattern.permute.xlu0 %v4491_v3 }
  0x38   : > { %698 = vperm.xlu1 %4293, %v556_v13   ;;  %694 = vperm.xlu0 %4295, %v555_v14  }
  0x3c   : > { %4294 = vset.pattern.permute.xlu1 %v6708_v0  ;;  %706 = vperm.xlu0 %4295, %v558_v15  }
  0x3d   : > { %612 = vperm.xlu1 %4294, %v557_v16  }
  0x40   : > { %710 = vperm.xlu0 %4295, %v559_v17  }
  0x41   : > { %4296 = vset.pattern.permute.xlu1 %v4491_v3 }
  0x42   : > { %702 = vperm.xlu1 %4296, %v557_v16  }
  0x44   : > { %714 = vperm.xlu0 %4295, %v560_v18  }
  0x46   : > { %4297 = vset.pattern.permute.xlu1 %v6708_v0 }
  0x47   : > { %617 = vperm.xlu1 %4297, %v558_v15  }
  0x48   : > { %718 = vperm.xlu0 %4295, %v561_v19  }
  0x4b   : > { %622 = vperm.xlu1 %4297, %v559_v17  }
  0x4c   : > { %722 = vperm.xlu0 %4295, %v562_v20  }
  0x4f   : > { %627 = vperm.xlu1 %4297, %v560_v18  }
  0x50   : > { %726 = vperm.xlu0 %4295, %v563_v21  }
  0x53   : > { %632 = vperm.xlu1 %4297, %v561_v19  }
  0x57   : > { %637 = vperm.xlu1 %4297, %v562_v20  }
  0x5b   : > { %642 = vperm.xlu1 %4297, %v563_v21  }
  0x90   : > { %v573_v27 = vpop.permute.xlu1 %572  ;;  %v568_v28 = vpop.permute.xlu0 %567 }
  0x91   : > { %v649_v31 = vmul.f32 %v4644_v29, %v568_v28  ;;  %v650_v34 = vmul.f32 %v4644_v29, %v573_v27 }
  0x95   : > { %v671_v32 = vpop.permute.xlu1 %670  ;;  %v667_v33 = vpop.permute.xlu0 %666 }
  0x96   : > { %v734_v35 = vmul.f32 %v4648_v30, %v671_v32  ;;  %v733_v36 = vmul.f32 %v4648_v30, %v667_v33 }
  0x98   : > { %v750_v38 = vadd.f32 %v734_v35, %v650_v34  ;;  %v749_v39 = vadd.f32 %v733_v36, %v649_v31  ;;  %v854_v34 = vld [vmem:[%s6979_s21 + $0x20] sm:$0xff] }
  0x99   : > { %v675_v40 = vpop.permute.xlu0 %674 }
  0x9a   : > { %v773_v41 = vadd.f32 %v4657_v37, %v750_v38  ;;  %v772_v42 = vadd.f32 %v4657_v37, %v749_v39  ;;  %v735_v43 = vmul.f32 %v4648_v30, %v675_v40  ;;  %v578_v44 = vpop.permute.xlu1 %577 }
  0x9b   : > { %v651_v46 = vmul.f32 %v4644_v29, %v578_v44  ;;  %v855_v44 = vld [vmem:[%s6979_s21 + $0x28] sm:$0xff] }
  0x9c   : > { %v789_v47 = vmax.f32 %v773_v41, 0.0  ;;  %v788_v48 = vmax.f32 %v772_v42, 0.0 }
  0x9d   : > { %v751_v50 = vadd.f32 %v735_v43, %v651_v46  ;;  %v679_v51 = vpop.permute.xlu0 %678 }
  0x9e   : > { %v812_v52 = vmul.f32 %v4665_v45, %v789_v47  ;;  %v736_v53 = vmul.f32 %v4648_v30, %v679_v51  ;;  %v583_v54 = vpop.permute.xlu1 %582  ;;  %v811_v55 = vmul.f32 %v4665_v45, %v788_v48 }
  0x9f   : > { %v774_v56 = vadd.f32 %v4657_v37, %v751_v50  ;;  %v652_v57 = vmul.f32 %v4644_v29, %v583_v54 }
  0xa0   : > { %v835_v60 = vadd.f32 %v4671_v49, %v812_v52  ;;  %v834_v61 = vadd.f32 %v4671_v49, %v811_v55 }
  0xa1   : > { %v790_v62 = vmax.f32 %v774_v56, 0.0  ;;  %v752_v63 = vadd.f32 %v736_v53, %v652_v57  ;;  %v683_v1 = vpop.permute.xlu0 %682 }
  0xa2   : > { %v737_v2 = vmul.f32 %v4648_v30, %v683_v1  ;;  %v588_v3 = vpop.permute.xlu1 %587  ;;  %v866_v4 = vmul.f32 %v850_v58, %v834_v61  ;;  %v867_v5 = vmul.f32 %v851_v59, %v835_v60 }
  0xa3   : > { %v813_v6 = vmul.f32 %v4665_v45, %v790_v62  ;;  %v775_v7 = vadd.f32 %v4657_v37, %v752_v63  ;;  %v653_v8 = vmul.f32 %v4644_v29, %v588_v3 }
  0xa4   : > { %4222 = vmatprep.mubr.msk.f32.mxu0 %vm886_vm0, %v866_v4 }
  0xa5   : > { %v836_v10 = vadd.f32 %v4671_v49, %v813_v6  ;;  %v791_v11 = vmax.f32 %v775_v7, 0.0  ;;  %v753_v12 = vadd.f32 %v737_v2, %v653_v8  ;;  %4223 = vmatmul.mubr.msk.f32.vlgmr.msra.gmra.mxu0 %vm886_vm0, %v867_v5  ;;  %v687_v13 = vpop.permute.xlu0 %686  ;;  %v856_v2 = vld [vmem:[%s6979_s21 + $0x30] sm:$0xff] }
  0xa6   : > { %v738_v14 = vmul.f32 %v4648_v30, %v687_v13  ;;  %v593_v15 = vpop.permute.xlu1 %592 }
  0xa7   : > { %v814_v16 = vmul.f32 %v4665_v45, %v791_v11  ;;  %v776_v17 = vadd.f32 %v4657_v37, %v753_v12  ;;  %v654_v18 = vmul.f32 %v4644_v29, %v593_v15  ;;  %v868_v19 = vmul.f32 %v852_v9, %v836_v10  ;;  %v857_v11 = vld [vmem:[%s6979_s21 + $0x38] sm:$0xff]  ;;  %v858_v12 = vld [vmem:[%s6979_s21 + $0x40] sm:$0xff] }
  0xa9   : > { %v837_v20 = vadd.f32 %v4671_v49, %v814_v16  ;;  %v792_v21 = vmax.f32 %v776_v17, 0.0  ;;  %v754_v22 = vadd.f32 %v738_v14, %v654_v18  ;;  %4225 = vmatprep.mubr.msk.f32.mxu0 %vm886_vm0, %v868_v19 }
  0xaa   : > { %v598_v27 = vpop.permute.xlu1 %597  ;;  %v608_v28 = vpop.permute.xlu0 %607 }
  0xab   : > { %v815_v31 = vmul.f32 %v4665_v45, %v792_v21  ;;  %v777_v32 = vadd.f32 %v4657_v37, %v754_v22  ;;  %v869_v33 = vmul.f32 %v853_v26, %v837_v20  ;;  %v655_v42 = vmul.f32 %v4644_v29, %v598_v27 }
  0xac   : > { %v657_v48 = vmul.f32 %v4644_v29, %v608_v28 }
  0xad   : > { %v838_v35 = vadd.f32 %v4671_v49, %v815_v31  ;;  %v793_v36 = vmax.f32 %v777_v32, 0.0  ;;  %4226 = vmatmul.mubr.msk.f32.gmra.mxu0 %vm886_vm0, %v869_v33 }
  0xae   : > { %v603_v38 = vpop.permute.xlu0 %602 }
  0xaf   : > { %v816_v39 = vmul.f32 %v4665_v45, %v793_v36  ;;  %v691_v40 = vpop.permute.xlu1 %690  ;;  %v870_v41 = vmul.f32 %v854_v34, %v838_v35  ;;  %v656_v54 = vmul.f32 %v4644_v29, %v603_v38 }
  0xb0   : > { %v739_v43 = vmul.f32 %v4648_v30, %v691_v40 }
  0xb1   : > { %v839_v46 = vadd.f32 %v4671_v49, %v816_v39  ;;  %4228 = vmatprep.mubr.msk.f32.mxu0 %vm886_vm0, %v870_v41  ;;  %v859_v39 = vld [vmem:[%s6979_s21 + $0x48] sm:$0xff] }
  0xb2   : > { %v755_v47 = vadd.f32 %v739_v43, %v655_v42 }
  0xb3   : > { %v699_v50 = vpop.permute.xlu1 %698  ;;  %v695_v51 = vpop.permute.xlu0 %694  ;;  %v871_v52 = vmul.f32 %v855_v44, %v839_v46 }
  0xb4   : > { %v778_v53 = vadd.f32 %v4657_v37, %v755_v47  ;;  %v741_v55 = vmul.f32 %v4648_v30, %v699_v50  ;;  %v740_v56 = vmul.f32 %v4648_v30, %v695_v51  ;;  %v860_v51 = vld [vmem:[%s6979_s21 + $0x50] sm:$0xff] }
  0xb5   : > { %4229 = vmatmul.mubr.msk.f32.gmra.mxu0 %vm886_vm0, %v871_v52 }
  0xb6   : > { %v794_v57 = vmax.f32 %v778_v53, 0.0  ;;  %v757_v58 = vadd.f32 %v741_v55, %v657_v48  ;;  %v756_v59 = vadd.f32 %v740_v56, %v656_v54 }
  0xb7   : > { %v707_v60 = vpop.permute.xlu0 %706 }
  0xb8   : > { %v817_v61 = vmul.f32 %v4665_v45, %v794_v57  ;;  %v780_v62 = vadd.f32 %v4657_v37, %v757_v58  ;;  %v779_v63 = vadd.f32 %v4657_v37, %v756_v59  ;;  %v613_v1 = vpop.permute.xlu1 %612  ;;  %v743_v26 = vmul.f32 %v4648_v30, %v707_v60 }
  0xb9   : > { %v658_v14 = vmul.f32 %v4644_v29, %v613_v1 }
  0xba   : > { %v840_v3 = vadd.f32 %v4671_v49, %v817_v61  ;;  %v796_v4 = vmax.f32 %v780_v62, 0.0  ;;  %v795_v5 = vmax.f32 %v779_v63, 0.0  ;;  %v861_v62 = vld [vmem:[%s6979_s21 + $0x58] sm:$0xff] }
  0xbb   : > { %v711_v6 = vpop.permute.xlu0 %710 }
  0xbc   : > { %v818_v7 = vmul.f32 %v4665_v45, %v795_v5  ;;  %v872_v8 = vmul.f32 %v856_v2, %v840_v3  ;;  %v819_v9 = vmul.f32 %v4665_v45, %v796_v4  ;;  %v744_v34 = vmul.f32 %v4648_v30, %v711_v6 }
  0xbd   : > { %v703_v10 = vpop.permute.xlu1 %702 }
  0xbe   : > { %v841_v13 = vadd.f32 %v4671_v49, %v818_v7  ;;  %v742_v15 = vmul.f32 %v4648_v30, %v703_v10  ;;  %4231 = vmatprep.mubr.msk.f32.mxu0 %vm886_vm0, %v872_v8  ;;  %v842_v16 = vadd.f32 %v4671_v49, %v819_v9  ;;  %v862_v10 = vld [vmem:[%s6979_s21 + $0x60] sm:$0xff] }
  0xbf   : > { %v715_v20 = vpop.permute.xlu0 %714 }
  0xc0   : > { %v758_v17 = vadd.f32 %v742_v15, %v658_v14  ;;  %v873_v18 = vmul.f32 %v857_v11, %v841_v13  ;;  %v874_v19 = vmul.f32 %v858_v12, %v842_v16  ;;  %v745_v46 = vmul.f32 %v4648_v30, %v715_v20  ;;  %v863_v20 = vld [vmem:[%s6979_s21 + $0x68] sm:$0xff] }
  0xc2   : > { %v781_v21 = vadd.f32 %v4657_v37, %v758_v17  ;;  %v618_v22 = vpop.permute.xlu1 %617  ;;  %4232 = vmatmul.mubr.msk.f32.gmra.mxu0 %vm886_vm0, %v873_v18  ;;  %4234 = vmatprep.mubr.msk.f32.mxu1 %vm886_vm0, %v874_v19 }
  0xc3   : > { %v659_v27 = vmul.f32 %v4644_v29, %v618_v22  ;;  %1531 = vmatprep.mubr.bf16.mxu0 %v6708_v0  ;;  %v719_v36 = vpop.permute.xlu0 %718 }
  0xc4   : > { %v797_v28 = vmax.f32 %v781_v21, 0.0  ;;  %v746_v56 = vmul.f32 %v4648_v30, %v719_v36 }
  0xc5   : > { %v759_v31 = vadd.f32 %v743_v26, %v659_v27 }
  0xc6   : > { %v820_v32 = vmul.f32 %v4665_v45, %v797_v28  ;;  %v623_v33 = vpop.permute.xlu1 %622 }
  0xc7   : > { %v782_v35 = vadd.f32 %v4657_v37, %v759_v31  ;;  %v660_v38 = vmul.f32 %v4644_v29, %v623_v33  ;;  %v723_v54 = vpop.permute.xlu0 %722 }
  0xc8   : > { %v843_v40 = vadd.f32 %v4671_v49, %v820_v32  ;;  %v747_v3 = vmul.f32 %v4648_v30, %v723_v54 }
  0xc9   : > { %v798_v41 = vmax.f32 %v782_v35, 0.0  ;;  %v760_v42 = vadd.f32 %v744_v34, %v660_v38  ;;  %v865_v35 = vld [vmem:[%s6979_s21 + $0x78] sm:$0xff] }
  0xca   : > { %v628_v43 = vpop.permute.xlu1 %627  ;;  %v875_v44 = vmul.f32 %v859_v39, %v843_v40  ;;  %v1219_v39 = vld [vmem:[%s6697_s10 + $0xc8] sm:$0xff] }
  0xcb   : > { %v821_v47 = vmul.f32 %v4665_v45, %v798_v41  ;;  %v783_v48 = vadd.f32 %v4657_v37, %v760_v42  ;;  %v661_v50 = vmul.f32 %v4644_v29, %v628_v43  ;;  %v727_v6 = vpop.permute.xlu0 %726  ;;  %v1223_v41 = vld [vmem:[%s6697_s10 + $0xe8] sm:$0xff] }
  0xcc   : > { %4235 = vmatmul.mubr.msk.f32.vlgmr.msra.gmra.mxu1 %vm886_vm0, %v875_v44  ;;  %v748_v14 = vmul.f32 %v4648_v30, %v727_v6  ;;  %v3958_v43 = vcombine.low %v1219_v39, %v1223_v41  ;;  %v3959_v44 = vcombine.high %v1219_v39, %v1223_v41 }
  0xcd   : > { %v844_v52 = vadd.f32 %v4671_v49, %v821_v47  ;;  %v799_v53 = vmax.f32 %v783_v48, 0.0  ;;  %v761_v55 = vadd.f32 %v745_v46, %v661_v50  ;;  %v1210_v46 = vld [vmem:[%s6697_s10 + $0x80] sm:$0xff]  ;;  %v1211_v48 = vld [vmem:[%s6697_s10 + $0x88] sm:$0xff] }
  0xce   : > { %v633_v57 = vpop.permute.xlu1 %632  ;;  %1507 = vmatprep.subr.bf16.mxu0 %v3959_v44  ;;  %v1214_v47 = vld [vmem:[%s6697_s10 + $0xa0] sm:$0xff] }
  0xcf   : > { %v822_v58 = vmul.f32 %v4665_v45, %v799_v53  ;;  %v784_v59 = vadd.f32 %v4657_v37, %v761_v55  ;;  %v662_v60 = vmul.f32 %v4644_v29, %v633_v57  ;;  %v876_v61 = vmul.f32 %v860_v51, %v844_v52  ;;  %1508 = vmatpush1.bf16.msra.mxu0 %v3958_v43  ;;  %v1215_v52 = vld [vmem:[%s6697_s10 + $0xa8] sm:$0xff]  ;;  %v1202_v57 = vld [vmem:[%s6697_s10 + $0x40] sm:$0xff] }
  0xd0   : > { %v3949_v51 = vcombine.high %v1210_v46, %v1214_v47  ;;  %v3948_v53 = vcombine.low %v1210_v46, %v1214_v47  ;;  %v3950_v54 = vcombine.low %v1211_v48, %v1215_v52  ;;  %v3951_v55 = vcombine.high %v1211_v48, %v1215_v52 }
  0xd1   : > { %v845_v63 = vadd.f32 %v4671_v49, %v822_v58  ;;  %v800_v1 = vmax.f32 %v784_v59, 0.0  ;;  %v762_v2 = vadd.f32 %v746_v56, %v662_v60  ;;  %4237 = vmatprep.mubr.msk.f32.mxu1 %vm886_vm0, %v876_v61  ;;  %v1206_v58 = vld [vmem:[%s6697_s10 + $0x60] sm:$0xff]  ;;  %v1203_v59 = vld [vmem:[%s6697_s10 + $0x48] sm:$0xff] }
  0xd2   : > { %v638_v4 = vpop.permute.xlu1 %637  ;;  %1509 = vmatprep.subr.bf16.mxu0 %v3951_v55  ;;  %v3941_v61 = vcombine.high %v1202_v57, %v1206_v58  ;;  %v4946_v55 = vld [vmem:[%s6696_s9] ss:$0 sm:$0xff] }
  0xd3   : > { %v823_v5 = vmul.f32 %v4665_v45, %v800_v1  ;;  %v785_v7 = vadd.f32 %v4657_v37, %v762_v2  ;;  %v663_v8 = vmul.f32 %v4644_v29, %v638_v4  ;;  %v877_v9 = vmul.f32 %v861_v62, %v845_v63  ;;  %1510 = vmatpush1.bf16.msra.mxu0 %v3950_v54  ;;  %v1207_v62 = vld [vmem:[%s6697_s10 + $0x68] sm:$0xff]  ;;  %v1198_v4 = vld [vmem:[%s6697_s10 + $0x20] sm:$0xff] }
  0xd4   : > { %v3940_v63 = vcombine.low %v1202_v57, %v1206_v58  ;;  %v3942_v1 = vcombine.low %v1203_v59, %v1207_v62  ;;  %v3943_v2 = vcombine.high %v1203_v59, %v1207_v62  ;;  %v1212_v62 = vld [vmem:[%s6697_s10 + $0x90] sm:$0xff] }
  0xd5   : > { %v846_v11 = vadd.f32 %v4671_v49, %v823_v5  ;;  %v801_v12 = vmax.f32 %v785_v7, 0.0  ;;  %v763_v13 = vadd.f32 %v747_v3, %v663_v8  ;;  %4238 = vmatmul.mubr.msk.f32.gmra.mxu1 %vm886_vm0, %v877_v9  ;;  %v1194_v3 = vld [vmem:[%s6697_s10] sm:$0xff]  ;;  %v1195_v5 = vld [vmem:[%s6697_s10 + $0x8] sm:$0xff] }
  0xd6   : > { %v643_v15 = vpop.permute.xlu1 %642  ;;  %1511 = vmatprep.subr.bf16.mxu0 %v3943_v2  ;;  %v3933_v6 = vcombine.high %v1194_v3, %v1198_v4  ;;  %v1199_v7 = vld [vmem:[%s6697_s10 + $0x28] sm:$0xff]  ;;  %v3932_v9 = vcombine.low %v1194_v3, %v1198_v4  ;;  %v1217_v2 = vld [vmem:[%s6697_s10 + $0xb8] sm:$0xff] }
  0xd7   : > { %v824_v16 = vmul.f32 %v4665_v45, %v801_v12  ;;  %v786_v17 = vadd.f32 %v4657_v37, %v763_v13  ;;  %v664_v18 = vmul.f32 %v4644_v29, %v643_v15  ;;  %v878_v19 = vmul.f32 %v862_v10, %v846_v11  ;;  %v864_v29 = vld [vmem:[%s6979_s21 + $0x70] sm:$0xff]  ;;  %1512 = vmatpush1.bf16.msra.mxu0 %v3942_v1  ;;  %v1213_v1 = vld [vmem:[%s6697_s10 + $0x98] sm:$0xff] }
  0xd8   : > { %v3934_v10 = vcombine.low %v1195_v5, %v1199_v7  ;;  %v3935_v11 = vcombine.high %v1195_v5, %v1199_v7 }
  0xd9   : > { %v847_v21 = vadd.f32 %v4671_v49, %v824_v16  ;;  %v802_v22 = vmax.f32 %v786_v17, 0.0  ;;  %v764_v26 = vadd.f32 %v748_v14, %v664_v18  ;;  %4240 = vmatprep.mubr.msk.f32.mxu1 %vm886_vm0, %v878_v19  ;;  %v4891_v16 = vld [vmem:[%s6697_s10 + $0xd0] sm:$0xff]  ;;  %v4901_v18 = vld [vmem:[%s6697_s10 + $0xd8] sm:$0xff] }
  0xda   : > { %1513 = vmatprep.subr.bf16.mxu0 %v3935_v11  ;;  %v4896_v17 = vld [vmem:[%s6697_s10 + $0xf0] sm:$0xff] }
  0xdb   : > { %v825_v30 = vmul.f32 %v4665_v45, %v802_v22  ;;  %v787_v27 = vadd.f32 %v4657_v37, %v764_v26  ;;  %v879_v28 = vmul.f32 %v863_v20, %v847_v21  ;;  %1514 = vmatpush1.bf16.msra.mxu0 %v3934_v10  ;;  %v3960_v19 = vcombine.low %v4891_v16, %v4896_v17  ;;  %v4912_v21 = vld [vmem:[%s6697_s10 + $0xf8] sm:$0xff]  ;;  %v1204_v11 = vld [vmem:[%s6697_s10 + $0x50] sm:$0xff] }
  0xdc   : > { %v3961_v20 = vcombine.high %v4891_v16, %v4896_v17  ;;  %v3962_v26 = vcombine.low %v4901_v18, %v4912_v21  ;;  %v3955_v10 = vcombine.high %v1213_v1, %v1217_v2  ;;  %v1201_v16 = vld [vmem:[%s6697_s10 + $0x38] sm:$0xff] }
  0xdd   : > { %v848_v31 = vadd.f32 %v4671_v49, %v825_v30  ;;  %v803_v32 = vmax.f32 %v787_v27, 0.0  ;;  %4241 = vmatmul.mubr.msk.f32.gmra.mxu1 %vm886_vm0, %v879_v28  ;;  %v3963_v30 = vcombine.high %v4901_v18, %v4912_v21  ;;  %v1205_v21 = vld [vmem:[%s6697_s10 + $0x58] sm:$0xff] }
  0xdf   : > { %v826_v33 = vmul.f32 %v4665_v45, %v803_v32  ;;  %v880_v34 = vmul.f32 %v864_v29, %v848_v31  ;;  %v1218_v45 = vld [vmem:[%s6697_s10 + $0xc0] sm:$0xff]  ;;  %1629 = vmatprep.subr.bf16.mxu0 %v3963_v30  ;;  %v1209_v30 = vld [vmem:[%s6697_s10 + $0x78] sm:$0xff] }
  0xe1   : > { %v849_v36 = vadd.f32 %v4671_v49, %v826_v33  ;;  %4243 = vmatprep.mubr.msk.f32.mxu1 %vm886_vm0, %v880_v34  ;;  %v1222_v49 = vld [vmem:[%s6697_s10 + $0xe0] sm:$0xff] }
  0xe2   : > { %v3957_v40 = vcombine.high %v1218_v45, %v1222_v49  ;;  %v3956_v42 = vcombine.low %v1218_v45, %v1222_v49  ;;  %v4927_v49 = vld [vmem:[%s6694_s7] ss:$0 sm:$0xff] }
  0xe3   : > { %v881_v37 = vmul.f32 %v865_v35, %v849_v36 }
  0xe4   : > { %1446 = vmatprep.subr.bf16.mxu1 %v3957_v40 }
  0xe5   : > { %4244 = vmatmul.mubr.msk.f32.gmra.mxu1 %vm886_vm0, %v881_v37 }
  0xe6   : > { %1470 = vmatprep.mubr.bf16.mxu1 %v6708_v0  ;;  %1447 = vmatpush1.bf16.msra.mxu1 %v3956_v42 }
  0xe7   : > { %1448 = vmatprep.subr.bf16.mxu1 %v3949_v51 }
  0xea   : > { %1449 = vmatpush1.bf16.msra.mxu1 %v3948_v53 }
  0xeb   : > { %1450 = vmatprep.subr.bf16.mxu1 %v3941_v61 }
  0xee   : > { %1451 = vmatpush1.bf16.msra.mxu1 %v3940_v63  ;;  %v1216_v63 = vld [vmem:[%s6697_s10 + $0xb0] sm:$0xff] }
  0xef   : > { %1452 = vmatprep.subr.bf16.mxu1 %v3933_v6 }
  0xf2   : > { %1453 = vmatpush1.bf16.msra.mxu1 %v3932_v9  ;;  %v3953_v9 = vcombine.high %v1212_v62, %v1216_v63 }
  0xf3   : > { %1568 = vmatprep.subr.bf16.mxu1 %v3961_v20  ;;  %v1208_v20 = vld [vmem:[%s6697_s10 + $0x70] sm:$0xff] }
  0xf4   : > { %v3944_v17 = vcombine.low %v1204_v11, %v1208_v20 }
 0x165   : > { %v4811_v38 = vpop.f32.mrf.mxu0 }
 0x166   : > { %1085 = vrot.lane.b32.xlu1 %v4811_v38, %s4492_s0 }
 0x167   : > { %v4836_v50 = vpop.f32.mrf.mxu0 }
 0x16d   : > { %v4841_v56 = vpop.f32.mrf.mxu0 }
 0x16e   : > { %1089 = vrot.lane.b32.xlu1 %v4841_v56, %s4492_s0 }
 0x16f   : > { %v1011_v60 = vpop.f32.mrf.mxu0 }
 0x170   : > { %1087 = vrot.lane.b32.xlu0 %v1011_v60, %s4492_s0 }
 0x175   : > { %v4870_v8 = vpop.f32.mrf.mxu0 }
 0x176   : > { %1093 = vrot.lane.b32.xlu1 %v4870_v8, %s4492_s0 }
 0x177   : > { %v4874_v12 = vpop.f32.mrf.mxu0 }
 0x178   : > { %1091 = vrot.lane.b32.xlu0 %v4874_v12, %s4492_s0 }
 0x182   : > { %v4878_v13 = vpop.f32.mrf.mxu0 }
 0x183   : > { %1097 = vrot.lane.b32.xlu1 %v4878_v13, %s4492_s0 }
 0x184   : > { %v4882_v14 = vpop.f32.mrf.mxu0 }
 0x185   : > { %1095 = vrot.lane.b32.xlu0 %v4882_v14, %s4492_s0 }
 0x18c   : > { %v4886_v15 = vpop.f32.mrf.mxu1 }
 0x18d   : > { %1101 = vrot.lane.b32.xlu1 %v4886_v15, %s4492_s0 }
 0x18e   : > { %v4914_v22 = vpop.f32.mrf.mxu1 }
 0x18f   : > { %1099 = vrot.lane.b32.xlu0 %v4914_v22, %s4492_s0 }
 0x195   : > { %v4239_v27 = vpop.f32.mrf.mxu1 }
 0x196   : > { %v3952_v27 = vcombine.low %v1212_v62, %v1216_v63 }
 0x197   : > { %v1051_v28 = vpop.f32.mrf.mxu1 }
 0x198   : > { %1103 = vrot.lane.b32.xlu0 %v1051_v28, %s4492_s0  ;;  %s3909_s0 = sshll.u32 %s7489_s25, 3 }
 0x199   : > { %s546_s19 = scalar_lea.vmem %s6704_s17, %s3909_s0 }
 0x19d   : > { %v4242_v29 = vpop.f32.mrf.mxu1 }
 0x19e   : > { %v3954_v29 = vcombine.low %v1213_v1, %v1217_v2 }
 0x19f   : > { %v1060_v31 = vpop.f32.mrf.mxu1 }
 0x1a0   : > { %v3945_v31 = vcombine.high %v1204_v11, %v1208_v20 }
 0x1a5   : > { %v4245_v32 = vpop.f32.mrf.mxu1 }
 0x1a6   : > { %v3947_v32 = vcombine.high %v1205_v21, %v1209_v30 }
 0x1a7   : > { %v1068_v33 = vpop.f32.mrf.mxu1 }
 0x1a8   : > { %v1196_v33 = vld [vmem:[%s6697_s10 + $0x10] sm:$0xff] }
 0x1d8   : > { %v1086_v34 = vpop.permute.xlu1 %1085 }
 0x1d9   : > { %v1115_v36 = vadd.f32 %v1086_v34, %v4836_v50  ;;  %v4937_v50 = vld [vmem:[%s6695_s8] ss:$0 sm:$0xff] }
 0x1db   : > { %v1132_v41 = vadd.f32 %v4927_v49, %v1115_v36 }
 0x1dd   : > { %v1142_v46 = vmax.f32 %v1132_v41, 0.0  ;;  %v1742_v41 = vld [vmem:[%s6698_s11 + $0x1e0] sm:$0xff] }
 0x1df   : > { %v1159_v52 = vmul.f32 %v4937_v50, %v1142_v46 }
 0x1e0   : > { %v1090_v35 = vpop.permute.xlu1 %1089 }
 0x1e1   : > { %v1117_v37 = vadd.f32 %v1090_v35, %v1011_v60  ;;  %v1176_v58 = vadd.f32 %v4946_v55, %v1159_v52  ;;  %v3946_v35 = vcombine.low %v1205_v21, %v1209_v30 }
 0x1e2   : > { %v1088_v45 = vpop.permute.xlu0 %1087 }
 0x1e3   : > { %v1116_v39 = vadd.f32 %v4811_v38, %v1088_v45  ;;  %v1134_v42 = vadd.f32 %v4927_v49, %v1117_v37  ;;  %v1738_v45 = vld [vmem:[%s6698_s11 + $0x1c0] sm:$0xff] }
 0x1e5   : > { %v1133_v40 = vadd.f32 %v4927_v49, %v1116_v39  ;;  %v1144_v47 = vmax.f32 %v1134_v42, 0.0  ;;  %v1739_v42 = vld [vmem:[%s6698_s11 + $0x1c8] sm:$0xff] }
 0x1e7   : > { %v1143_v43 = vmax.f32 %v1133_v40, 0.0  ;;  %v1161_v53 = vmul.f32 %v4937_v50, %v1144_v47 }
 0x1e8   : > { %v1094_v60 = vpop.permute.xlu1 %1093 }
 0x1e9   : > { %v1160_v51 = vmul.f32 %v4937_v50, %v1143_v43  ;;  %v1178_v59 = vadd.f32 %v4946_v55, %v1161_v53  ;;  %v1743_v43 = vld [vmem:[%s6698_s11 + $0x1e8] sm:$0xff]  ;;  %v5020_v53 = vcombine.high %v1738_v45, %v1742_v41 }
 0x1ea   : > { %v1092_v44 = vpop.permute.xlu0 %1091 }
 0x1eb   : > { %v1118_v48 = vadd.f32 %v4841_v56, %v1092_v44  ;;  %v1177_v56 = vadd.f32 %v4946_v55, %v1160_v51  ;;  %6980 = vst [vmem:[#allocation2_spill] sm:$0xff] %v5020_v53 }
 0x1ed   : > { %v1135_v38 = vadd.f32 %v4927_v49, %v1118_v48  ;;  %v1186_v3 = vmax.f32 %v1176_v58, %v1177_v56 }
 0x1ef   : > { %v1145_v54 = vmax.f32 %v1135_v38, 0.0 }
 0x1f1   : > { %v1162_v57 = vmul.f32 %v4937_v50, %v1145_v54  ;;  %v5022_v54 = vcombine.high %v1739_v42, %v1743_v43 }
 0x1f3   : > { %v1179_v61 = vadd.f32 %v4946_v55, %v1162_v57  ;;  %6981 = vst [vmem:[#allocation3_spill] sm:$0xff] %v5022_v54 }
 0x1f5   : > { %v1187_v4 = vmax.f32 %v1178_v59, %v1179_v61  ;;  %v1098_v6 = vpop.permute.xlu1 %1097 }
 0x1f6   : > { %v1121_v28 = vadd.f32 %v1098_v6, %v4882_v14  ;;  %v1197_v14 = vld [vmem:[%s6697_s10 + $0x18] sm:$0xff] }
 0x1f7   : > { %v4965_v5 = vpack.c.bf16 %v1187_v4, %v1186_v3  ;;  %v1096_v7 = vpop.permute.xlu0 %1095  ;;  %v3939_v37 = vcombine.high %v1197_v14, %v1201_v16  ;;  %v3938_v38 = vcombine.low %v1197_v14, %v1201_v16  ;;  %v1727_v14 = vld [vmem:[%s6698_s11 + $0x168] sm:$0xff] }
 0x1f8   : > { %v1120_v18 = vadd.f32 %v4870_v8, %v1096_v7  ;;  %v1119_v8 = vadd.f32 %v1094_v60, %v4874_v12  ;;  %v1200_v12 = vld [vmem:[%s6697_s10 + $0x30] sm:$0xff] }
 0x1f9   : > { %3964 = vmatmul.mubr.msk.bf16.vlgmr.msra.gmra.mxu1 %vm1428_vm1, %v4965_v5  ;;  %3967 = vmatmul.mubr.msk.bf16.vlgmr.msra.gmra.mxu0 %vm1428_vm1, %v4965_v5  ;;  %v3937_v36 = vcombine.high %v1196_v33, %v1200_v12  ;;  %v3936_v46 = vcombine.low %v1196_v33, %v1200_v12  ;;  %v1722_v33 = vld [vmem:[%s6698_s11 + $0x140] sm:$0xff]  ;;  %v1723_v12 = vld [vmem:[%s6698_s11 + $0x148] sm:$0xff] }
 0x1fa   : > { %1569 = vmatpush1.bf16.msra.mxu1 %v3960_v19  ;;  %1630 = vmatpush1.bf16.msra.mxu0 %v3962_v26  ;;  %v1137_v34 = vadd.f32 %v4927_v49, %v1120_v18  ;;  %v1136_v19 = vadd.f32 %v4927_v49, %v1119_v8  ;;  %v1138_v26 = vadd.f32 %v4927_v49, %v1121_v28  ;;  %v1735_v8 = vld [vmem:[%s6698_s11 + $0x1a8] sm:$0xff] }
 0x1fb   : > { %1570 = vmatprep.subr.bf16.mxu1 %v3953_v9  ;;  %1631 = vmatprep.subr.bf16.mxu0 %v3955_v10  ;;  %v5066_v28 = vcombine.low %v1738_v45, %v1742_v41 }
 0x1fc   : > { %1480 = vmatprep.mubr.bf16.mxu1 %v6708_v0  ;;  %1541 = vmatprep.mubr.bf16.mxu0 %v6708_v0  ;;  %v1147_v39 = vmax.f32 %v1137_v34, 0.0  ;;  %v1146_v47 = vmax.f32 %v1136_v19, 0.0  ;;  %v1148_v48 = vmax.f32 %v1138_v26, 0.0  ;;  %v1726_v34 = vld [vmem:[%s6698_s11 + $0x160] sm:$0xff]  ;;  %v5100_v26 = vcombine.high %v1723_v12, %v1727_v14 }
 0x1fd   : > { %6982 = vst [vmem:[#allocation4_spill] sm:$0xff] %v5066_v28  ;;  %v5098_v19 = vcombine.high %v1722_v33, %v1726_v34  ;;  %v5118_v45 = vcombine.low %v1722_v33, %v1726_v34 }
 0x1fe   : > { %1571 = vmatpush1.bf16.msra.mxu1 %v3952_v27  ;;  %1632 = vmatpush1.bf16.msra.mxu0 %v3954_v29  ;;  %v1164_v56 = vmul.f32 %v4937_v50, %v1147_v39  ;;  %v1163_v58 = vmul.f32 %v4937_v50, %v1146_v47  ;;  %v1165_v59 = vmul.f32 %v4937_v50, %v1148_v48  ;;  %v1731_v27 = vld [vmem:[%s6698_s11 + $0x188] sm:$0xff] }
 0x1ff   : > { %1572 = vmatprep.subr.bf16.mxu1 %v3945_v31  ;;  %1633 = vmatprep.subr.bf16.mxu0 %v3947_v32  ;;  %v1102_v40 = vpop.permute.xlu1 %1101  ;;  %v5068_v29 = vcombine.low %v1739_v42, %v1743_v43  ;;  %v5072_v32 = vcombine.high %v1731_v27, %v1735_v8  ;;  %6988 = vst [vmem:[#allocation10_spill] sm:$0xff] %v5098_v19  ;;  %6989 = vst [vmem:[#allocation11_spill] sm:$0xff] %v5100_v26  ;;  %v1706_v42 = vld [vmem:[%s6698_s11 + $0xc0] sm:$0xff] }
 0x200   : > { %v1123_v52 = vadd.f32 %v1102_v40, %v4914_v22  ;;  %v1181_v22 = vadd.f32 %v4946_v55, %v1164_v56  ;;  %v1180_v62 = vadd.f32 %v4946_v55, %v1163_v58  ;;  %v1182_v63 = vadd.f32 %v4946_v55, %v1165_v59  ;;  %6990 = vst [vmem:[#allocation12_spill] sm:$0xff] %v5118_v45  ;;  %v1710_v43 = vld [vmem:[%s6698_s11 + $0xe0] sm:$0xff]  ;;  %v1703_v58 = vld [vmem:[%s6698_s11 + $0xa8] sm:$0xff] }
 0x201   : > { %v1100_v44 = vpop.permute.xlu0 %1099  ;;  %6983 = vst [vmem:[#allocation5_spill] sm:$0xff] %v5068_v29  ;;  %6985 = vst [vmem:[#allocation7_spill] sm:$0xff] %v5072_v32  ;;  %v5120_v39 = vcombine.low %v1723_v12, %v1727_v14  ;;  %v1702_v56 = vld [vmem:[%s6698_s11 + $0xa0] sm:$0xff]  ;;  %v5170_v59 = vcombine.low %v1706_v42, %v1710_v43 }
 0x202   : > { %v1122_v51 = vadd.f32 %v4878_v13, %v1100_v44  ;;  %1573 = vmatpush1.bf16.msra.mxu1 %v3944_v17  ;;  %1634 = vmatpush1.bf16.msra.mxu0 %v3946_v35  ;;  %v1140_v60 = vadd.f32 %v4927_v49, %v1123_v52  ;;  %v1188_v6 = vmax.f32 %v1180_v62, %v1181_v22  ;;  %v1718_v35 = vld [vmem:[%s6698_s11 + $0x120] sm:$0xff]  ;;  %v1707_v44 = vld [vmem:[%s6698_s11 + $0xc8] sm:$0xff] }
 0x203   : > { %1574 = vmatprep.subr.bf16.mxu1 %v3937_v36  ;;  %1635 = vmatprep.subr.bf16.mxu0 %v3939_v37  ;;  %v5094_v17 = vcombine.low %v1731_v27, %v1735_v8  ;;  %v1715_v36 = vld [vmem:[%s6698_s11 + $0x108] sm:$0xff]  ;;  %6991 = vst [vmem:[#allocation13_spill] sm:$0xff] %v5120_v39  ;;  %v1698_v52 = vld [vmem:[%s6698_s11 + $0x80] sm:$0xff]  ;;  %6998 = vst [vmem:[#allocation20_spill] sm:$0xff] %v5170_v59 }
 0x204   : > { %v1139_v57 = vadd.f32 %v4927_v49, %v1122_v51  ;;  %v1150_v3 = vmax.f32 %v1140_v60, 0.0  ;;  %v1719_v37 = vld [vmem:[%s6698_s11 + $0x128] sm:$0xff]  ;;  %v5150_v51 = vcombine.high %v1706_v42, %v1710_v43  ;;  %v5176_v60 = vcombine.high %v1698_v52, %v1702_v56  ;;  %v1694_v62 = vld [vmem:[%s6698_s11 + $0x60] sm:$0xff] }
 0x205   : > { %6987 = vst [vmem:[#allocation9_spill] sm:$0xff] %v5094_v17  ;;  %v5126_v41 = vcombine.high %v1715_v36, %v1719_v37  ;;  %v5146_v48 = vcombine.low %v1715_v36, %v1719_v37  ;;  %v1794_v12 = vld [vmem:[%s6698_s11 + $0x380] sm:$0xff] }
 0x206   : > { %v1149_v13 = vmax.f32 %v1139_v57, 0.0  ;;  %1575 = vmatpush1.bf16.msra.mxu1 %v3936_v46  ;;  %1636 = vmatpush1.bf16.msra.mxu0 %v3938_v38  ;;  %v1167_v11 = vmul.f32 %v4937_v50, %v1150_v3  ;;  %v1711_v46 = vld [vmem:[%s6698_s11 + $0xe8] sm:$0xff]  ;;  %6996 = vst [vmem:[#allocation18_spill] sm:$0xff] %v5150_v51  ;;  %7000 = vst [vmem:[#allocation22_spill] sm:$0xff] %v5176_v60  ;;  %v1798_v14 = vld [vmem:[%s6698_s11 + $0x3a0] sm:$0xff] }
 0x207   : > { %2450 = vmatprep.subr.bf16.mxu1 %v5020_v53  ;;  %2491 = vmatprep.subr.bf16.mxu0 %v5022_v54  ;;  %6993 = vst [vmem:[#allocation15_spill] sm:$0xff] %v5126_v41  ;;  %6995 = vst [vmem:[#allocation17_spill] sm:$0xff] %v5146_v48  ;;  %v5152_v38 = vcombine.high %v1707_v44, %v1711_v46  ;;  %v1699_v57 = vld [vmem:[%s6698_s11 + $0x88] sm:$0xff]  ;;  %v5278_v42 = vcombine.high %v1794_v12, %v1798_v14 }
 0x208   : > { %v1166_v61 = vmul.f32 %v4937_v50, %v1149_v13  ;;  %v5172_v13 = vcombine.low %v1707_v44, %v1711_v46  ;;  %v5178_v22 = vcombine.high %v1699_v57, %v1703_v58  ;;  %v5200_v3 = vcombine.low %v1699_v57, %v1703_v58  ;;  %v1786_v44 = vld [vmem:[%s6698_s11 + $0x340] sm:$0xff] }
 0x209   : > { %6997 = vst [vmem:[#allocation19_spill] sm:$0xff] %v5152_v38  ;;  %7016 = vst [vmem:[#allocation38_spill] sm:$0xff] %v5278_v42  ;;  %v1790_v46 = vld [vmem:[%s6698_s11 + $0x360] sm:$0xff]  ;;  %v5296_v57 = vcombine.low %v1794_v12, %v1798_v14  ;;  %v1771_v12 = vld [vmem:[%s6698_s11 + $0x2c8] sm:$0xff] }
 0x20a   : > { %v1183_v1 = vadd.f32 %v4946_v55, %v1166_v61  ;;  %v1104_v2 = vpop.permute.xlu0 %1103  ;;  %6999 = vst [vmem:[#allocation21_spill] sm:$0xff] %v5172_v13  ;;  %7001 = vst [vmem:[#allocation23_spill] sm:$0xff] %v5178_v22  ;;  %v1690_v61 = vld [vmem:[%s6698_s11 + $0x40] sm:$0xff]  ;;  %v1775_v14 = vld [vmem:[%s6698_s11 + $0x2e8] sm:$0xff] }
 0x20b   : > { %v1124_v4 = vadd.f32 %v4886_v15, %v1104_v2  ;;  %v1184_v15 = vadd.f32 %v4946_v55, %v1167_v11  ;;  %v5198_v2 = vcombine.low %v1698_v52, %v1702_v56  ;;  %7003 = vst [vmem:[#allocation25_spill] sm:$0xff] %v5200_v3  ;;  %v1687_v11 = vld [vmem:[%s6698_s11 + $0x28] sm:$0xff]  ;;  %7018 = vst [vmem:[#allocation40_spill] sm:$0xff] %v5296_v57 }
 0x20c   : > { %v1189_v7 = vmax.f32 %v1182_v63, %v1183_v1  ;;  %v1691_v63 = vld [vmem:[%s6698_s11 + $0x48] sm:$0xff] }
 0x20d   : > { %v1141_v9 = vadd.f32 %v4927_v49, %v1124_v4  ;;  %v1695_v1 = vld [vmem:[%s6698_s11 + $0x68] sm:$0xff]  ;;  %7002 = vst [vmem:[#allocation24_spill] sm:$0xff] %v5198_v2  ;;  %v5204_v4 = vcombine.high %v1690_v61, %v1694_v62 }
 0x20e   : > { %v1192_v10 = vpack.c.bf16 %v1189_v7, %v1188_v6  ;;  %v5206_v6 = vcombine.high %v1691_v63, %v1695_v1  ;;  %v1682_v7 = vld [vmem:[%s6698_s11] sm:$0xff]  ;;  %v1787_v52 = vld [vmem:[%s6698_s11 + $0x348] sm:$0xff] }
 0x20f   : > { %v1151_v18 = vmax.f32 %v1141_v9, 0.0  ;;  %7004 = vst [vmem:[#allocation26_spill] sm:$0xff] %v5204_v4  ;;  %v1686_v9 = vld [vmem:[%s6698_s11 + $0x20] sm:$0xff]  ;;  %v1791_v56 = vld [vmem:[%s6698_s11 + $0x368] sm:$0xff] }
 0x210   : > { %3965 = vmatmul.mubr.msk.bf16.gmra.mxu1 %vm1428_vm1, %v1192_v10  ;;  %3968 = vmatmul.mubr.msk.bf16.gmra.mxu0 %vm1428_vm1, %v1192_v10  ;;  %7005 = vst [vmem:[#allocation27_spill] sm:$0xff] %v5206_v6  ;;  %v5248_v27 = vcombine.low %v1682_v7, %v1686_v9 }
 0x211   : > { %v1168_v20 = vmul.f32 %v4937_v50, %v1151_v18  ;;  %1490 = vmatprep.mubr.bf16.mxu1 %v6708_v0  ;;  %1551 = vmatprep.mubr.bf16.mxu0 %v6708_v0  ;;  %v1730_v50 = vld [vmem:[%s6698_s11 + $0x180] sm:$0xff]  ;;  %v5224_v18 = vcombine.low %v1690_v61, %v1694_v62  ;;  %v5302_v61 = vcombine.high %v1786_v44, %v1790_v46 }
 0x212   : > { %7010 = vst [vmem:[#allocation32_spill] sm:$0xff] %v5248_v27  ;;  %v5304_v62 = vcombine.high %v1787_v52, %v1791_v56 }
 0x213   : > { %v1185_v21 = vadd.f32 %v4946_v55, %v1168_v20  ;;  %v1734_v55 = vld [vmem:[%s6698_s11 + $0x1a0] sm:$0xff]  ;;  %7006 = vst [vmem:[#allocation28_spill] sm:$0xff] %v5224_v18  ;;  %v5226_v20 = vcombine.low %v1691_v63, %v1695_v1  ;;  %7020 = vst [vmem:[#allocation42_spill] sm:$0xff] %v5302_v61 }
 0x214   : > { %v5070_v31 = vcombine.high %v1730_v50, %v1734_v55  ;;  %v5092_v16 = vcombine.low %v1730_v50, %v1734_v55  ;;  %v1803_v50 = vld [vmem:[%s6698_s11 + $0x3c8] sm:$0xff]  ;;  %7021 = vst [vmem:[#allocation43_spill] sm:$0xff] %v5304_v62  ;;  %v1778_v63 = vld [vmem:[%s6698_s11 + $0x300] sm:$0xff] }
 0x215   : > { %v1190_v30 = vmax.f32 %v1184_v15, %v1185_v21  ;;  %7007 = vst [vmem:[#allocation29_spill] sm:$0xff] %v5226_v20  ;;  %v5230_v15 = vcombine.high %v1682_v7, %v1686_v9  ;;  %v1807_v55 = vld [vmem:[%s6698_s11 + $0x3e8] sm:$0xff]  ;;  %v1782_v1 = vld [vmem:[%s6698_s11 + $0x320] sm:$0xff] }
 0x216   : > { %6984 = vst [vmem:[#allocation6_spill] sm:$0xff] %v5070_v31  ;;  %6986 = vst [vmem:[#allocation8_spill] sm:$0xff] %v5092_v16  ;;  %v5256_v34 = vcombine.high %v1803_v50, %v1807_v55  ;;  %v5274_v37 = vcombine.low %v1803_v50, %v1807_v55  ;;  %v1779_v7 = vld [vmem:[%s6698_s11 + $0x308] sm:$0xff]  ;;  %v1770_v50 = vld [vmem:[%s6698_s11 + $0x2c0] sm:$0xff] }
 0x217   : > { %v5046_v49 = vpack.c.bf16 %v1190_v30, %v1190_v30  ;;  %7008 = vst [vmem:[#allocation30_spill] sm:$0xff] %v5230_v15  ;;  %v1802_v30 = vld [vmem:[%s6698_s11 + $0x3c0] sm:$0xff]  ;;  %v1783_v9 = vld [vmem:[%s6698_s11 + $0x328] sm:$0xff] }
 0x218   : > { %7013 = vst [vmem:[#allocation35_spill] sm:$0xff] %v5256_v34  ;;  %7015 = vst [vmem:[#allocation37_spill] sm:$0xff] %v5274_v37  ;;  %v1774_v55 = vld [vmem:[%s6698_s11 + $0x2e0] sm:$0xff] }
 0x219   : > { %3966 = vmatmul.mubr.msk.bf16.gmra.mxu1 %vm1428_vm1, %v5046_v49  ;;  %3969 = vmatmul.mubr.msk.bf16.gmra.mxu0 %vm1428_vm1, %v5046_v49 }
 0x21a   : > { %1592 = vmatprep.mubr.bf16.mxu1 %v6708_v0  ;;  %1653 = vmatprep.mubr.bf16.mxu0 %v6708_v0 }
 0x221   : > { %3970 = vmatmul.mubr.msk.bf16.vlgmr.msra.gmra.mxu1 %vm1428_vm1, %v4965_v5  ;;  %3973 = vmatmul.mubr.msk.bf16.vlgmr.msra.gmra.mxu0 %vm1428_vm1, %v4965_v5  ;;  %v1714_v5 = vld [vmem:[%s6698_s11 + $0x100] sm:$0xff] }
 0x222   : > { %2451 = vmatpush1.bf16.msra.mxu1 %v5066_v28  ;;  %2492 = vmatpush1.bf16.msra.mxu0 %v5068_v29  ;;  %v5124_v40 = vcombine.high %v1714_v5, %v1718_v35  ;;  %v5144_v47 = vcombine.low %v1714_v5, %v1718_v35  ;;  %v1795_v5 = vld [vmem:[%s6698_s11 + $0x388] sm:$0xff] }
 0x223   : > { %2452 = vmatprep.subr.bf16.mxu1 %v5070_v31  ;;  %2493 = vmatprep.subr.bf16.mxu0 %v5072_v32  ;;  %v1799_v35 = vld [vmem:[%s6698_s11 + $0x3a8] sm:$0xff] }
 0x224   : > { %1602 = vmatprep.mubr.bf16.mxu1 %v6708_v0  ;;  %1663 = vmatprep.mubr.bf16.mxu0 %v6708_v0  ;;  %6992 = vst [vmem:[#allocation14_spill] sm:$0xff] %v5124_v40  ;;  %6994 = vst [vmem:[#allocation16_spill] sm:$0xff] %v5144_v47  ;;  %v5280_v43 = vcombine.high %v1795_v5, %v1799_v35  ;;  %v5298_v58 = vcombine.low %v1795_v5, %v1799_v35 }
 0x225   : > { %v5344_v5 = vcombine.low %v1778_v63, %v1782_v1  ;;  %v5346_v35 = vcombine.low %v1779_v7, %v1783_v9 }
 0x226   : > { %2453 = vmatpush1.bf16.msra.mxu1 %v5092_v16  ;;  %2494 = vmatpush1.bf16.msra.mxu0 %v5094_v17  ;;  %7017 = vst [vmem:[#allocation39_spill] sm:$0xff] %v5280_v43  ;;  %7019 = vst [vmem:[#allocation41_spill] sm:$0xff] %v5298_v58 }
 0x227   : > { %2454 = vmatprep.subr.bf16.mxu1 %v5098_v19  ;;  %2495 = vmatprep.subr.bf16.mxu0 %v5100_v26  ;;  %7026 = vst [vmem:[#allocation48_spill] sm:$0xff] %v5344_v5  ;;  %7027 = vst [vmem:[#allocation49_spill] sm:$0xff] %v5346_v35 }
 0x229   : > { %3971 = vmatmul.mubr.msk.bf16.gmra.mxu1 %vm1428_vm1, %v1192_v10  ;;  %3974 = vmatmul.mubr.msk.bf16.gmra.mxu0 %vm1428_vm1, %v1192_v10  ;;  %v1683_v10 = vld [vmem:[%s6698_s11 + $0x8] sm:$0xff] }
 0x22a   : > { %2455 = vmatpush1.bf16.msra.mxu1 %v5118_v45  ;;  %2496 = vmatpush1.bf16.msra.mxu0 %v5120_v39  ;;  %v5232_v21 = vcombine.high %v1683_v10, %v1687_v11  ;;  %v5250_v8 = vcombine.low %v1683_v10, %v1687_v11  ;;  %v5320_v10 = vcombine.low %v1786_v44, %v1790_v46 }
 0x22b   : > { %2456 = vmatprep.subr.bf16.mxu1 %v5124_v40  ;;  %2497 = vmatprep.subr.bf16.mxu0 %v5126_v41  ;;  %v5322_v11 = vcombine.low %v1787_v52, %v1791_v56  ;;  %v5350_v44 = vcombine.high %v1770_v50, %v1774_v55  ;;  %v5352_v46 = vcombine.high %v1771_v12, %v1775_v14  ;;  %v1762_v52 = vld [vmem:[%s6698_s11 + $0x280] sm:$0xff] }
 0x22c   : > { %1612 = vmatprep.mubr.bf16.mxu1 %v6708_v0  ;;  %1673 = vmatprep.mubr.bf16.mxu0 %v6708_v0  ;;  %7009 = vst [vmem:[#allocation31_spill] sm:$0xff] %v5232_v21  ;;  %7011 = vst [vmem:[#allocation33_spill] sm:$0xff] %v5250_v8  ;;  %v1766_v56 = vld [vmem:[%s6698_s11 + $0x2a0] sm:$0xff] }
 0x22d   : > { %7022 = vst [vmem:[#allocation44_spill] sm:$0xff] %v5320_v10  ;;  %7023 = vst [vmem:[#allocation45_spill] sm:$0xff] %v5322_v11  ;;  %v5374_v25 = vcombine.high %v1762_v52, %v1766_v56 }
 0x22e   : > { %2457 = vmatpush1.bf16.msra.mxu1 %v5144_v47  ;;  %2498 = vmatpush1.bf16.msra.mxu0 %v5146_v48  ;;  %7028 = vst [vmem:[#allocation50_spill] sm:$0xff] %v5350_v44  ;;  %7029 = vst [vmem:[#allocation51_spill] sm:$0xff] %v5352_v46 }
 0x22f   : > { %2458 = vmatprep.subr.bf16.mxu1 %v5150_v51  ;;  %2499 = vmatprep.subr.bf16.mxu0 %v5152_v38  ;;  %7032 = vst [vmem:[#allocation54_spill] sm:$0xff] %v5374_v25 }
 0x231   : > { %3972 = vmatmul.mubr.msk.bf16.gmra.mxu1 %vm1428_vm1, %v5046_v49  ;;  %3975 = vmatmul.mubr.msk.bf16.gmra.mxu0 %vm1428_vm1, %v5046_v49  ;;  %v1806_v49 = vld [vmem:[%s6698_s11 + $0x3e0] sm:$0xff] }
 0x232   : > { %2459 = vmatpush1.bf16.msra.mxu1 %v5170_v59  ;;  %2500 = vmatpush1.bf16.msra.mxu0 %v5172_v13  ;;  %v5254_v33 = vcombine.high %v1802_v30, %v1806_v49  ;;  %v5272_v36 = vcombine.low %v1802_v30, %v1806_v49  ;;  %v5326_v30 = vcombine.high %v1778_v63, %v1782_v1  ;;  %v1763_v63 = vld [vmem:[%s6698_s11 + $0x288] sm:$0xff] }
 0x233   : > { %2460 = vmatprep.subr.bf16.mxu1 %v5176_v60  ;;  %2501 = vmatprep.subr.bf16.mxu0 %v5178_v22  ;;  %v5328_v49 = vcombine.high %v1779_v7, %v1783_v9  ;;  %v1767_v1 = vld [vmem:[%s6698_s11 + $0x2a8] sm:$0xff]  ;;  %v5368_v7 = vcombine.low %v1770_v50, %v1774_v55  ;;  %v5370_v9 = vcombine.low %v1771_v12, %v1775_v14 }
 0x234   : > { %2482 = vmatprep.mubr.bf16.mxu1 %v6708_v0  ;;  %2523 = vmatprep.mubr.bf16.mxu0 %v6708_v0  ;;  %7012 = vst [vmem:[#allocation34_spill] sm:$0xff] %v5254_v33  ;;  %7014 = vst [vmem:[#allocation36_spill] sm:$0xff] %v5272_v36  ;;  %v5376_v24 = vcombine.high %v1763_v63, %v1767_v1  ;;  %v1754_v0 = vld [vmem:[%s6698_s11 + $0x240] sm:$0xff]  ;;  %v1755_v50 = vld [vmem:[%s6698_s11 + $0x248] sm:$0xff]  ;;  %v5392_v12 = vcombine.low %v1762_v52, %v1766_v56 }
 0x235   : > { %7024 = vst [vmem:[#allocation46_spill] sm:$0xff] %v5326_v30  ;;  %7025 = vst [vmem:[#allocation47_spill] sm:$0xff] %v5328_v49  ;;  %v1759_v55 = vld [vmem:[%s6698_s11 + $0x268] sm:$0xff]  ;;  %v5394_v14 = vcombine.low %v1763_v63, %v1767_v1 }
 0x236   : > { %2461 = vmatpush1.bf16.msra.mxu1 %v5198_v2  ;;  %2502 = vmatpush1.bf16.msra.mxu0 %v5200_v3  ;;  %7030 = vst [vmem:[#allocation52_spill] sm:$0xff] %v5368_v7  ;;  %7031 = vst [vmem:[#allocation53_spill] sm:$0xff] %v5370_v9  ;;  %v1747_v52 = vld [vmem:[%s6698_s11 + $0x208] sm:$0xff]  ;;  %v5418_v1 = vcombine.low %v1755_v50, %v1759_v55 }
 0x237   : > { %2462 = vmatprep.subr.bf16.mxu1 %v5204_v4  ;;  %2503 = vmatprep.subr.bf16.mxu0 %v5206_v6  ;;  %7033 = vst [vmem:[#allocation55_spill] sm:$0xff] %v5376_v24  ;;  %7034 = vst [vmem:[#allocation56_spill] sm:$0xff] %v5392_v12  ;;  %v1751_v56 = vld [vmem:[%s6698_s11 + $0x228] sm:$0xff] }
 0x238   : > { %7035 = vst [vmem:[#allocation57_spill] sm:$0xff] %v5394_v14  ;;  %7039 = vst [vmem:[#allocation61_spill] sm:$0xff] %v5418_v1 }
 0x23a   : > { %2463 = vmatpush1.bf16.msra.mxu1 %v5224_v18  ;;  %2504 = vmatpush1.bf16.msra.mxu0 %v5226_v20 }
 0x23b   : > { %2464 = vmatprep.subr.bf16.mxu1 %v5230_v15  ;;  %2505 = vmatprep.subr.bf16.mxu0 %v5232_v21 }
 0x23e   : > { %2465 = vmatpush1.bf16.msra.mxu1 %v5248_v27  ;;  %2506 = vmatpush1.bf16.msra.mxu0 %v5250_v8 }
 0x23f   : > { %2466 = vmatprep.subr.bf16.mxu1 %v5254_v33  ;;  %2507 = vmatprep.subr.bf16.mxu0 %v5256_v34 }
 0x242   : > { %2467 = vmatpush2.bf16.msra.mxu1 %v5272_v36  ;;  %2508 = vmatpush2.bf16.msra.mxu0 %v5274_v37 }
 0x243   : > { %2468 = vmatprep.subr.bf16.mxu1 %v5278_v42  ;;  %2509 = vmatprep.subr.bf16.mxu0 %v5280_v43 }
 0x246   : > { %2469 = vmatpush2.bf16.msra.mxu1 %v5296_v57  ;;  %2510 = vmatpush2.bf16.msra.mxu0 %v5298_v58 }
 0x247   : > { %2470 = vmatprep.subr.bf16.mxu1 %v5302_v61  ;;  %2511 = vmatprep.subr.bf16.mxu0 %v5304_v62 }
 0x24a   : > { %2471 = vmatpush2.bf16.msra.mxu1 %v5320_v10  ;;  %2512 = vmatpush2.bf16.msra.mxu0 %v5322_v11 }
 0x24b   : > { %2472 = vmatprep.subr.bf16.mxu1 %v5326_v30  ;;  %2513 = vmatprep.subr.bf16.mxu0 %v5328_v49  ;;  %v1716_v49 = vld [vmem:[%s6698_s11 + $0x110] sm:$0xff] }
 0x24e   : > { %2473 = vmatpush2.bf16.msra.mxu1 %v5344_v5  ;;  %2514 = vmatpush2.bf16.msra.mxu0 %v5346_v35  ;;  %v1758_v35 = vld [vmem:[%s6698_s11 + $0x260] sm:$0xff] }
 0x24f   : > { %2474 = vmatprep.subr.bf16.mxu1 %v5350_v44  ;;  %2515 = vmatprep.subr.bf16.mxu0 %v5352_v46  ;;  %v5398_v46 = vcombine.high %v1754_v0, %v1758_v35  ;;  %v5400_v44 = vcombine.high %v1755_v50, %v1759_v55  ;;  %v1746_v5 = vld [vmem:[%s6698_s11 + $0x200] sm:$0xff]  ;;  %v5416_v63 = vcombine.low %v1754_v0, %v1758_v35  ;;  %v1741_v0 = vld [vmem:[%s6698_s11 + $0x1d8] sm:$0xff] }
 0x250   : > { %v1745_v35 = vld [vmem:[%s6698_s11 + $0x1f8] sm:$0xff]  ;;  %v5442_v55 = vcombine.low %v1747_v52, %v1751_v56 }
 0x251   : > { %7036 = vst [vmem:[#allocation58_spill] sm:$0xff] %v5398_v46  ;;  %7037 = vst [vmem:[#allocation59_spill] sm:$0xff] %v5400_v44 }
 0x252   : > { %2475 = vmatpush2.bf16.msra.mxu1 %v5368_v7  ;;  %2516 = vmatpush2.bf16.msra.mxu0 %v5370_v9  ;;  %v1750_v9 = vld [vmem:[%s6698_s11 + $0x220] sm:$0xff]  ;;  %7038 = vst [vmem:[#allocation60_spill] sm:$0xff] %v5416_v63  ;;  %v1740_v7 = vld [vmem:[%s6698_s11 + $0x1d0] sm:$0xff]  ;;  %7043 = vst [vmem:[#allocation65_spill] sm:$0xff] %v5442_v55 }
 0x253   : > { %2476 = vmatprep.subr.bf16.mxu1 %v5374_v25  ;;  %2517 = vmatprep.subr.bf16.mxu0 %v5376_v24  ;;  %v5422_v24 = vcombine.high %v1746_v5, %v1750_v9  ;;  %v5424_v25 = vcombine.high %v1747_v52, %v1751_v56  ;;  %v5440_v50 = vcombine.low %v1746_v5, %v1750_v9  ;;  %v1733_v5 = vld [vmem:[%s6698_s11 + $0x198] sm:$0xff] }
 0x254   : > { %v1737_v9 = vld [vmem:[%s6698_s11 + $0x1b8] sm:$0xff]  ;;  %v5466_v56 = vcombine.low %v1741_v0, %v1745_v35 }
 0x255   : > { %7040 = vst [vmem:[#allocation62_spill] sm:$0xff] %v5422_v24  ;;  %7041 = vst [vmem:[#allocation63_spill] sm:$0xff] %v5424_v25 }
 0x256   : > { %2477 = vmatpush2.bf16.msra.mxu1 %v5392_v12  ;;  %2518 = vmatpush2.bf16.msra.mxu0 %v5394_v14  ;;  %v1744_v14 = vld [vmem:[%s6698_s11 + $0x1f0] sm:$0xff]  ;;  %7042 = vst [vmem:[#allocation64_spill] sm:$0xff] %v5440_v50  ;;  %7047 = vst [vmem:[#allocation69_spill] sm:$0xff] %v5466_v56 }
 0x257   : > { %2478 = vmatprep.subr.bf16.mxu1 %v5398_v46  ;;  %2519 = vmatprep.subr.bf16.mxu0 %v5400_v44  ;;  %v5446_v44 = vcombine.high %v1740_v7, %v1744_v14  ;;  %v5448_v46 = vcombine.high %v1741_v0, %v1745_v35  ;;  %v1732_v12 = vld [vmem:[%s6698_s11 + $0x190] sm:$0xff]  ;;  %v5464_v52 = vcombine.low %v1740_v7, %v1744_v14  ;;  %v1725_v7 = vld [vmem:[%s6698_s11 + $0x158] sm:$0xff]  ;;  %v7050_v0 = vmov 0  }
 0x258   : > { %v1729_v14 = vld [vmem:[%s6698_s11 + $0x178] sm:$0xff] }
 0x259   : > { %7044 = vst [vmem:[#allocation66_spill] sm:$0xff] %v5446_v44  ;;  %7045 = vst [vmem:[#allocation67_spill] sm:$0xff] %v5448_v46 }
 0x25a   : > { %2479 = vmatpush2.bf16.msra.mxu1 %v5416_v63  ;;  %2520 = vmatpush2.bf16.msra.mxu0 %v5418_v1  ;;  %v1736_v1 = vld [vmem:[%s6698_s11 + $0x1b0] sm:$0xff]  ;;  %7046 = vst [vmem:[#allocation68_spill] sm:$0xff] %v5464_v52 }
 0x25b   : > { %2480 = vmatprep.subr.bf16.mxu1 %v5422_v24  ;;  %2521 = vmatprep.subr.bf16.mxu0 %v5424_v25  ;;  %v5470_v25 = vcombine.high %v1732_v12, %v1736_v1  ;;  %v5472_v24 = vcombine.high %v1733_v5, %v1737_v9  ;;  %v1724_v63 = vld [vmem:[%s6698_s11 + $0x150] sm:$0xff]  ;;  %v5490_v35 = vcombine.low %v1732_v12, %v1736_v1  ;;  %v1717_v12 = vld [vmem:[%s6698_s11 + $0x118] sm:$0xff] }
 0x25c   : > { %v1721_v1 = vld [vmem:[%s6698_s11 + $0x138] sm:$0xff] }
 0x25d   : > { %7048 = vst [vmem:[#allocation70_spill] sm:$0xff] %v5470_v25  ;;  %7049 = vst [vmem:[#allocation71_spill] sm:$0xff] %v5472_v24 }
 0x25e   : > { %2481 = vmatpush2.bf16.msra.mxu1 %v5440_v50  ;;  %2522 = vmatpush2.bf16.msra.mxu0 %v5442_v55  ;;  %v1728_v55 = vld [vmem:[%s6698_s11 + $0x170] sm:$0xff]  ;;  %7051 = vst [vmem:[#allocation72_spill] sm:$0xff] %v5490_v35  ;;  %v5498_v50 = vcombine.high %v1725_v7, %v1729_v14 }
 0x25f   : > { %2532 = vmatprep.subr.bf16.mxu1 %v5446_v44  ;;  %2573 = vmatprep.subr.bf16.mxu0 %v5448_v46  ;;  %v5492_v46 = vcombine.low %v1733_v5, %v1737_v9  ;;  %v5496_v44 = vcombine.high %v1724_v63, %v1728_v55  ;;  %v5516_v5 = vcombine.low %v1724_v63, %v1728_v55  ;;  %v1709_v63 = vld [vmem:[%s6698_s11 + $0xd8] sm:$0xff] }
 0x260   : > { %7054 = vst [vmem:[#allocation75_spill] sm:$0xff] %v5498_v50  ;;  %v5518_v9 = vcombine.low %v1725_v7, %v1729_v14  ;;  %v1713_v55 = vld [vmem:[%s6698_s11 + $0xf8] sm:$0xff]  ;;  %v5542_v14 = vcombine.low %v1717_v12, %v1721_v1 }
 0x261   : > { %2483 = vmatmul.mubr.bf16.vlgmr.msra.gmra.mxu1 %v7050_v0  ;;  %2524 = vmatmul.mubr.bf16.vlgmr.msra.gmra.mxu0 %v7050_v0  ;;  %7052 = vst [vmem:[#allocation73_spill] sm:$0xff] %v5492_v46  ;;  %7053 = vst [vmem:[#allocation74_spill] sm:$0xff] %v5496_v44 }
 0x262   : > { %2533 = vmatpush1.bf16.msra.mxu1 %v5464_v52  ;;  %2574 = vmatpush1.bf16.msra.mxu0 %v5466_v56  ;;  %v1720_v56 = vld [vmem:[%s6698_s11 + $0x130] sm:$0xff]  ;;  %7055 = vst [vmem:[#allocation76_spill] sm:$0xff] %v5516_v5  ;;  %7056 = vst [vmem:[#allocation77_spill] sm:$0xff] %v5518_v9 }
 0x263   : > { %2534 = vmatprep.subr.bf16.mxu1 %v5470_v25  ;;  %2575 = vmatprep.subr.bf16.mxu0 %v5472_v24  ;;  %v5522_v24 = vcombine.high %v1716_v49, %v1720_v56  ;;  %v5524_v25 = vcombine.high %v1717_v12, %v1721_v1  ;;  %v1708_v52 = vld [vmem:[%s6698_s11 + $0xd0] sm:$0xff]  ;;  %v5540_v7 = vcombine.low %v1716_v49, %v1720_v56  ;;  %v1701_v49 = vld [vmem:[%s6698_s11 + $0x98] sm:$0xff] }
 0x264   : > { %2564 = vmatprep.mubr.bf16.mxu1 %v7050_v0  ;;  %2605 = vmatprep.mubr.bf16.mxu0 %v7050_v0  ;;  %7060 = vst [vmem:[#allocation81_spill] sm:$0xff] %v5542_v14  ;;  %v1705_v56 = vld [vmem:[%s6698_s11 + $0xb8] sm:$0xff]  ;;  %v5566_v1 = vcombine.low %v1709_v63, %v1713_v55 }
 0x265   : > { %7057 = vst [vmem:[#allocation78_spill] sm:$0xff] %v5522_v24  ;;  %7058 = vst [vmem:[#allocation79_spill] sm:$0xff] %v5524_v25 }
 0x266   : > { %2535 = vmatpush1.bf16.msra.mxu1 %v5490_v35  ;;  %2576 = vmatpush1.bf16.msra.mxu0 %v5492_v46  ;;  %v1712_v46 = vld [vmem:[%s6698_s11 + $0xf0] sm:$0xff]  ;;  %7059 = vst [vmem:[#allocation80_spill] sm:$0xff] %v5540_v7  ;;  %7064 = vst [vmem:[#allocation85_spill] sm:$0xff] %v5566_v1 }
 0x267   : > { %2536 = vmatprep.subr.bf16.mxu1 %v5496_v44  ;;  %2577 = vmatprep.subr.bf16.mxu0 %v5498_v50  ;;  %v5546_v50 = vcombine.high %v1708_v52, %v1712_v46  ;;  %v5548_v44 = vcombine.high %v1709_v63, %v1713_v55  ;;  %v1700_v35 = vld [vmem:[%s6698_s11 + $0x90] sm:$0xff]  ;;  %v5564_v12 = vcombine.low %v1708_v52, %v1712_v46  ;;  %v1693_v46 = vld [vmem:[%s6698_s11 + $0x58] sm:$0xff] }
 0x268   : > { %v1697_v52 = vld [vmem:[%s6698_s11 + $0x78] sm:$0xff]  ;;  %v5590_v55 = vcombine.low %v1701_v49, %v1705_v56 }
 0x269   : > { %7061 = vst [vmem:[#allocation82_spill] sm:$0xff] %v5546_v50  ;;  %7062 = vst [vmem:[#allocation83_spill] sm:$0xff] %v5548_v44 }
 0x26a   : > { %2537 = vmatpush1.bf16.msra.mxu1 %v5516_v5  ;;  %2578 = vmatpush1.bf16.msra.mxu0 %v5518_v9  ;;  %v1704_v9 = vld [vmem:[%s6698_s11 + $0xb0] sm:$0xff]  ;;  %7063 = vst [vmem:[#allocation84_spill] sm:$0xff] %v5564_v12  ;;  %7068 = vst [vmem:[#allocation89_spill] sm:$0xff] %v5590_v55 }
 0x26b   : > { %2538 = vmatprep.subr.bf16.mxu1 %v5522_v24  ;;  %2579 = vmatprep.subr.bf16.mxu0 %v5524_v25  ;;  %v5570_v25 = vcombine.high %v1700_v35, %v1704_v9  ;;  %v5572_v24 = vcombine.high %v1701_v49, %v1705_v56  ;;  %v1692_v5 = vld [vmem:[%s6698_s11 + $0x50] sm:$0xff]  ;;  %v5588_v63 = vcombine.low %v1700_v35, %v1704_v9  ;;  %v1685_v35 = vld [vmem:[%s6698_s11 + $0x18] sm:$0xff] }
 0x26c   : > { %v1689_v9 = vld [vmem:[%s6698_s11 + $0x38] sm:$0xff]  ;;  %v5614_v56 = vcombine.low %v1693_v46, %v1697_v52 }
 0x26d   : > { %7065 = vst [vmem:[#allocation86_spill] sm:$0xff] %v5570_v25  ;;  %7066 = vst [vmem:[#allocation87_spill] sm:$0xff] %v5572_v24 }
 0x26e   : > { %2539 = vmatpush1.bf16.msra.mxu1 %v5540_v7  ;;  %2580 = vmatpush1.bf16.msra.mxu0 %v5542_v14  ;;  %v1696_v14 = vld [vmem:[%s6698_s11 + $0x70] sm:$0xff]  ;;  %7067 = vst [vmem:[#allocation88_spill] sm:$0xff] %v5588_v63  ;;  %7072 = vst [vmem:[#allocation93_spill] sm:$0xff] %v5614_v56 }
 0x26f   : > { %2540 = vmatprep.subr.bf16.mxu1 %v5546_v50  ;;  %2581 = vmatprep.subr.bf16.mxu0 %v5548_v44  ;;  %v5594_v44 = vcombine.high %v1692_v5, %v1696_v14  ;;  %v5596_v50 = vcombine.high %v1693_v46, %v1697_v52  ;;  %v1684_v7 = vld [vmem:[%s6698_s11 + $0x10] sm:$0xff]  ;;  %v5612_v49 = vcombine.low %v1692_v5, %v1696_v14  ;;  %v1805_v5 = vld [vmem:[%s6698_s11 + $0x3d8] sm:$0xff] }
 0x270   : > { %v1809_v14 = vld [vmem:[%s6698_s11 + $0x3f8] sm:$0xff]  ;;  %v5638_v52 = vcombine.low %v1685_v35, %v1689_v9 }
 0x271   : > { %7069 = vst [vmem:[#allocation90_spill] sm:$0xff] %v5594_v44  ;;  %7070 = vst [vmem:[#allocation91_spill] sm:$0xff] %v5596_v50 }
 0x272   : > { %2541 = vmatpush1.bf16.msra.mxu1 %v5564_v12  ;;  %2582 = vmatpush1.bf16.msra.mxu0 %v5566_v1  ;;  %v1688_v1 = vld [vmem:[%s6698_s11 + $0x30] sm:$0xff]  ;;  %7071 = vst [vmem:[#allocation92_spill] sm:$0xff] %v5612_v49  ;;  %7076 = vst [vmem:[#allocation97_spill] sm:$0xff] %v5638_v52 }
 0x273   : > { %2542 = vmatprep.subr.bf16.mxu1 %v5570_v25  ;;  %2583 = vmatprep.subr.bf16.mxu0 %v5572_v24  ;;  %v5618_v24 = vcombine.high %v1684_v7, %v1688_v1  ;;  %v5620_v25 = vcombine.high %v1685_v35, %v1689_v9  ;;  %v1804_v12 = vld [vmem:[%s6698_s11 + $0x3d0] sm:$0xff]  ;;  %v5636_v46 = vcombine.low %v1684_v7, %v1688_v1  ;;  %v1797_v7 = vld [vmem:[%s6698_s11 + $0x398] sm:$0xff] }
 0x274   : > { %v1801_v1 = vld [vmem:[%s6698_s11 + $0x3b8] sm:$0xff]  ;;  %v5662_v9 = vcombine.low %v1805_v5, %v1809_v14 }
 0x275   : > { %7073 = vst [vmem:[#allocation94_spill] sm:$0xff] %v5618_v24  ;;  %7074 = vst [vmem:[#allocation95_spill] sm:$0xff] %v5620_v25 }
 0x276   : > { %2543 = vmatpush1.bf16.msra.mxu1 %v5588_v63  ;;  %2584 = vmatpush1.bf16.msra.mxu0 %v5590_v55  ;;  %v1808_v55 = vld [vmem:[%s6698_s11 + $0x3f0] sm:$0xff]  ;;  %7075 = vst [vmem:[#allocation96_spill] sm:$0xff] %v5636_v46  ;;  %7080 = vst [vmem:[#allocation101_spill] sm:$0xff] %v5662_v9 }
 0x277   : > { %2544 = vmatprep.subr.bf16.mxu1 %v5594_v44  ;;  %2585 = vmatprep.subr.bf16.mxu0 %v5596_v50  ;;  %v5642_v50 = vcombine.high %v1804_v12, %v1808_v55  ;;  %v5644_v44 = vcombine.high %v1805_v5, %v1809_v14  ;;  %v1796_v63 = vld [vmem:[%s6698_s11 + $0x390] sm:$0xff]  ;;  %v5660_v35 = vcombine.low %v1804_v12, %v1808_v55  ;;  %v1789_v12 = vld [vmem:[%s6698_s11 + $0x358] sm:$0xff] }
 0x278   : > { %v1793_v55 = vld [vmem:[%s6698_s11 + $0x378] sm:$0xff]  ;;  %v5686_v14 = vcombine.low %v1797_v7, %v1801_v1 }
 0x279   : > { %7077 = vst [vmem:[#allocation98_spill] sm:$0xff] %v5642_v50  ;;  %7078 = vst [vmem:[#allocation99_spill] sm:$0xff] %v5644_v44 }
 0x27a   : > { %2545 = vmatpush1.bf16.msra.mxu1 %v5612_v49  ;;  %2586 = vmatpush1.bf16.msra.mxu0 %v5614_v56  ;;  %v1800_v56 = vld [vmem:[%s6698_s11 + $0x3b0] sm:$0xff]  ;;  %7079 = vst [vmem:[#allocation100_spill] sm:$0xff] %v5660_v35  ;;  %7084 = vst [vmem:[#allocation105_spill] sm:$0xff] %v5686_v14 }
 0x27b   : > { %2546 = vmatprep.subr.bf16.mxu1 %v5618_v24  ;;  %2587 = vmatprep.subr.bf16.mxu0 %v5620_v25  ;;  %v5666_v25 = vcombine.high %v1796_v63, %v1800_v56  ;;  %v5668_v24 = vcombine.high %v1797_v7, %v1801_v1  ;;  %v1788_v49 = vld [vmem:[%s6698_s11 + $0x350] sm:$0xff]  ;;  %v5684_v5 = vcombine.low %v1796_v63, %v1800_v56  ;;  %v1781_v63 = vld [vmem:[%s6698_s11 + $0x318] sm:$0xff] }
 0x27c   : > { %v1785_v56 = vld [vmem:[%s6698_s11 + $0x338] sm:$0xff]  ;;  %v5710_v1 = vcombine.low %v1789_v12, %v1793_v55 }
 0x27d   : > { %7081 = vst [vmem:[#allocation102_spill] sm:$0xff] %v5666_v25  ;;  %7082 = vst [vmem:[#allocation103_spill] sm:$0xff] %v5668_v24 }
 0x27e   : > { %2547 = vmatpush1.bf16.msra.mxu1 %v5636_v46  ;;  %2588 = vmatpush1.bf16.msra.mxu0 %v5638_v52  ;;  %v1792_v52 = vld [vmem:[%s6698_s11 + $0x370] sm:$0xff]  ;;  %7083 = vst [vmem:[#allocation104_spill] sm:$0xff] %v5684_v5  ;;  %7088 = vst [vmem:[#allocation109_spill] sm:$0xff] %v5710_v1 }
 0x27f   : > { %2548 = vmatprep.subr.bf16.mxu1 %v5642_v50  ;;  %2589 = vmatprep.subr.bf16.mxu0 %v5644_v44  ;;  %v5690_v44 = vcombine.high %v1788_v49, %v1792_v52  ;;  %v5692_v50 = vcombine.high %v1789_v12, %v1793_v55  ;;  %v1780_v46 = vld [vmem:[%s6698_s11 + $0x310] sm:$0xff]  ;;  %v5708_v7 = vcombine.low %v1788_v49, %v1792_v52  ;;  %v1773_v49 = vld [vmem:[%s6698_s11 + $0x2d8] sm:$0xff] }
 0x280   : > { %v1777_v52 = vld [vmem:[%s6698_s11 + $0x2f8] sm:$0xff]  ;;  %v5734_v55 = vcombine.low %v1781_v63, %v1785_v56 }
 0x281   : > { %7085 = vst [vmem:[#allocation106_spill] sm:$0xff] %v5690_v44  ;;  %7086 = vst [vmem:[#allocation107_spill] sm:$0xff] %v5692_v50 }
 0x282   : > { %2549 = vmatpush2.bf16.msra.mxu1 %v5660_v35  ;;  %2590 = vmatpush2.bf16.msra.mxu0 %v5662_v9  ;;  %v1784_v9 = vld [vmem:[%s6698_s11 + $0x330] sm:$0xff]  ;;  %7087 = vst [vmem:[#allocation108_spill] sm:$0xff] %v5708_v7  ;;  %7092 = vst [vmem:[#allocation113_spill] sm:$0xff] %v5734_v55 }
 0x283   : > { %2550 = vmatprep.subr.bf16.mxu1 %v5666_v25  ;;  %2591 = vmatprep.subr.bf16.mxu0 %v5668_v24  ;;  %v5714_v24 = vcombine.high %v1780_v46, %v1784_v9  ;;  %v5716_v25 = vcombine.high %v1781_v63, %v1785_v56  ;;  %v1772_v35 = vld [vmem:[%s6698_s11 + $0x2d0] sm:$0xff]  ;;  %v5732_v12 = vcombine.low %v1780_v46, %v1784_v9  ;;  %v1765_v46 = vld [vmem:[%s6698_s11 + $0x298] sm:$0xff] }
 0x284   : > { %v1769_v9 = vld [vmem:[%s6698_s11 + $0x2b8] sm:$0xff]  ;;  %v5758_v56 = vcombine.low %v1773_v49, %v1777_v52 }
 0x285   : > { %7089 = vst [vmem:[#allocation110_spill] sm:$0xff] %v5714_v24  ;;  %7090 = vst [vmem:[#allocation111_spill] sm:$0xff] %v5716_v25 }
 0x286   : > { %2551 = vmatpush2.bf16.msra.mxu1 %v5684_v5  ;;  %2592 = vmatpush2.bf16.msra.mxu0 %v5686_v14  ;;  %v1776_v14 = vld [vmem:[%s6698_s11 + $0x2f0] sm:$0xff]  ;;  %7091 = vst [vmem:[#allocation112_spill] sm:$0xff] %v5732_v12  ;;  %7096 = vst [vmem:[#allocation117_spill] sm:$0xff] %v5758_v56 }
 0x287   : > { %2552 = vmatprep.subr.bf16.mxu1 %v5690_v44  ;;  %2593 = vmatprep.subr.bf16.mxu0 %v5692_v50  ;;  %v5738_v50 = vcombine.high %v1772_v35, %v1776_v14  ;;  %v5740_v44 = vcombine.high %v1773_v49, %v1777_v52  ;;  %v1764_v5 = vld [vmem:[%s6698_s11 + $0x290] sm:$0xff]  ;;  %v5756_v63 = vcombine.low %v1772_v35, %v1776_v14  ;;  %v1757_v35 = vld [vmem:[%s6698_s11 + $0x258] sm:$0xff] }
 0x288   : > { %v1761_v14 = vld [vmem:[%s6698_s11 + $0x278] sm:$0xff]  ;;  %v5782_v52 = vcombine.low %v1765_v46, %v1769_v9 }
 0x289   : > { %7093 = vst [vmem:[#allocation114_spill] sm:$0xff] %v5738_v50  ;;  %7094 = vst [vmem:[#allocation115_spill] sm:$0xff] %v5740_v44 }
 0x28a   : > { %2553 = vmatpush2.bf16.msra.mxu1 %v5708_v7  ;;  %2594 = vmatpush2.bf16.msra.mxu0 %v5710_v1  ;;  %v1768_v1 = vld [vmem:[%s6698_s11 + $0x2b0] sm:$0xff]  ;;  %7095 = vst [vmem:[#allocation116_spill] sm:$0xff] %v5756_v63  ;;  %7100 = vst [vmem:[#allocation121_spill] sm:$0xff] %v5782_v52 }
 0x28b   : > { %2554 = vmatprep.subr.bf16.mxu1 %v5714_v24  ;;  %2595 = vmatprep.subr.bf16.mxu0 %v5716_v25  ;;  %v5762_v25 = vcombine.high %v1764_v5, %v1768_v1  ;;  %v5764_v24 = vcombine.high %v1765_v46, %v1769_v9  ;;  %v1756_v7 = vld [vmem:[%s6698_s11 + $0x250] sm:$0xff]  ;;  %v5780_v49 = vcombine.low %v1764_v5, %v1768_v1  ;;  %v1749_v5 = vld [vmem:[%s6698_s11 + $0x218] sm:$0xff] }
 0x28c   : > { %v1753_v1 = vld [vmem:[%s6698_s11 + $0x238] sm:$0xff]  ;;  %v5806_v9 = vcombine.low %v1757_v35, %v1761_v14 }
 0x28d   : > { %7097 = vst [vmem:[#allocation118_spill] sm:$0xff] %v5762_v25  ;;  %7098 = vst [vmem:[#allocation119_spill] sm:$0xff] %v5764_v24 }
 0x28e   : > { %2555 = vmatpush2.bf16.msra.mxu1 %v5732_v12  ;;  %2596 = vmatpush2.bf16.msra.mxu0 %v5734_v55  ;;  %v1760_v55 = vld [vmem:[%s6698_s11 + $0x270] sm:$0xff]  ;;  %7099 = vst [vmem:[#allocation120_spill] sm:$0xff] %v5780_v49  ;;  %7104 = vst [vmem:[#allocation125_spill] sm:$0xff] %v5806_v9 }
 0x28f   : > { %2556 = vmatprep.subr.bf16.mxu1 %v5738_v50  ;;  %2597 = vmatprep.subr.bf16.mxu0 %v5740_v44  ;;  %v5786_v44 = vcombine.high %v1756_v7, %v1760_v55  ;;  %v5788_v50 = vcombine.high %v1757_v35, %v1761_v14  ;;  %v1748_v12 = vld [vmem:[%s6698_s11 + $0x210] sm:$0xff]  ;;  %v5804_v46 = vcombine.low %v1756_v7, %v1760_v55  ;;  %v5856_v7 = vld [vmem:[%s6699_s12] sm:$0xff] }
 0x291   : > { %7101 = vst [vmem:[#allocation122_spill] sm:$0xff] %v5786_v44  ;;  %7102 = vst [vmem:[#allocation123_spill] sm:$0xff] %v5788_v50 }
 0x292   : > { %2557 = vmatpush2.bf16.msra.mxu1 %v5756_v63  ;;  %2598 = vmatpush2.bf16.msra.mxu0 %v5758_v56  ;;  %v1752_v56 = vld [vmem:[%s6698_s11 + $0x230] sm:$0xff]  ;;  %7103 = vst [vmem:[#allocation124_spill] sm:$0xff] %v5804_v46 }
 0x293   : > { %2558 = vmatprep.subr.bf16.mxu1 %v5762_v25  ;;  %2599 = vmatprep.subr.bf16.mxu0 %v5764_v24  ;;  %v5810_v24 = vcombine.high %v1748_v12, %v1752_v56  ;;  %v5812_v25 = vcombine.high %v1749_v5, %v1753_v1  ;;  %v5816_v63 = vcombine.low %v1748_v12, %v1752_v56  ;;  %v1242_v56 = vsub.s32 3, %v4635_v23 }
 0x295   : > { %7105 = vst [vmem:[#allocation126_spill] sm:$0xff] %v5810_v24  ;;  %7106 = vst [vmem:[#allocation127_spill] sm:$0xff] %v5812_v25 }
 0x296   : > { %2559 = vmatpush2.bf16.msra.mxu1 %v5780_v49  ;;  %2600 = vmatpush2.bf16.msra.mxu0 %v5782_v52  ;;  %7107 = vst [vmem:[#allocation128_spill] sm:$0xff] %v5816_v63  ;;  %v5818_v49 = vcombine.low %v1749_v5, %v1753_v1  ;;  %v7109_v5 = vsub.s32 0, %v4635_v23 }
 0x297   : > { %2560 = vmatprep.subr.bf16.mxu1 %v5786_v44  ;;  %2601 = vmatprep.subr.bf16.mxu0 %v5788_v50 }
 0x298   : > { %7108 = vst [vmem:[#allocation129_spill] sm:$0xff] %v5818_v49  ;;  %v5874_v1 = vrot.slane %v5856_v7, %v7109_v5 }
 0x29a   : > { %2561 = vmatpush2.bf16.msra.mxu1 %v5804_v46  ;;  %2602 = vmatpush2.bf16.msra.mxu0 %v5806_v9 }
 0x29b   : > { %2562 = vmatprep.subr.bf16.mxu1 %v5810_v24  ;;  %2603 = vmatprep.subr.bf16.mxu0 %v5812_v25 }
 0x29e   : > { %2563 = vmatpush2.bf16.msra.mxu1 %v5816_v63  ;;  %2604 = vmatpush2.bf16.msra.mxu0 %v5818_v49 }
 0x29f   : > { %2672 = vmatprep.subr.bf16.mxu1 %v5020_v53  ;;  %2713 = vmatprep.subr.bf16.mxu0 %v5022_v54 }
 0x2a1   : > { %2565 = vmatmul.mubr.bf16.vlgmr.msra.gmra.mxu1 %v7050_v0  ;;  %2606 = vmatmul.mubr.bf16.vlgmr.msra.gmra.mxu0 %v7050_v0  ;;  %v1238_v0 = vsub.s32 2, %v4635_v23 }
 0x2a2   : > { %2673 = vmatpush1.bf16.msra.mxu1 %v5066_v28  ;;  %2714 = vmatpush1.bf16.msra.mxu0 %v5068_v29 }
 0x2a3   : > { %2674 = vmatprep.subr.bf16.mxu1 %v5070_v31  ;;  %2715 = vmatprep.subr.bf16.mxu0 %v5072_v32 }
 0x2a6   : > { %2675 = vmatpush1.bf16.msra.mxu1 %v5092_v16  ;;  %2716 = vmatpush1.bf16.msra.mxu0 %v5094_v17 }
 0x2a7   : > { %2676 = vmatprep.subr.bf16.mxu1 %v5098_v19  ;;  %2717 = vmatprep.subr.bf16.mxu0 %v5100_v26 }
 0x2aa   : > { %2677 = vmatpush1.bf16.msra.mxu1 %v5118_v45  ;;  %2718 = vmatpush1.bf16.msra.mxu0 %v5120_v39 }
 0x2ab   : > { %2678 = vmatprep.subr.bf16.mxu1 %v5124_v40  ;;  %2719 = vmatprep.subr.bf16.mxu0 %v5126_v41 }
 0x2ae   : > { %2679 = vmatpush1.bf16.msra.mxu1 %v5144_v47  ;;  %2720 = vmatpush1.bf16.msra.mxu0 %v5146_v48 }
 0x2af   : > { %2680 = vmatprep.subr.bf16.mxu1 %v5150_v51  ;;  %2721 = vmatprep.subr.bf16.mxu0 %v5152_v38 }
 0x2b2   : > { %2681 = vmatpush1.bf16.msra.mxu1 %v5170_v59  ;;  %2722 = vmatpush1.bf16.msra.mxu0 %v5172_v13 }
 0x2b3   : > { %2682 = vmatprep.subr.bf16.mxu1 %v5176_v60  ;;  %2723 = vmatprep.subr.bf16.mxu0 %v5178_v22 }
 0x2b6   : > { %2683 = vmatpush1.bf16.msra.mxu1 %v5198_v2  ;;  %2724 = vmatpush1.bf16.msra.mxu0 %v5200_v3  ;;  %v5885_v2 = vrot.slane %v5856_v7, %v1242_v56 }
 0x2b7   : > { %2684 = vmatprep.subr.bf16.mxu1 %v5204_v4  ;;  %2725 = vmatprep.subr.bf16.mxu0 %v5206_v6  ;;  %v5877_v6 = vrot.slane %v5856_v7, %v1238_v0 }
 0x2b9   : > { %v5858_v12 = vpop.f32.mrf.mxu1  ;;  %v5860_v55 = vpop.f32.mrf.mxu0 }
 0x2ba   : > { %2685 = vmatpush1.bf16.msra.mxu1 %v5224_v18  ;;  %2726 = vmatpush1.bf16.msra.mxu0 %v5226_v20  ;;  %v7110_v18 = vsub.s32 1, %v4635_v23 }
 0x2bb   : > { %v5865_v35 = vpop.f32.mrf.mxu1  ;;  %v5867_v14 = vpop.f32.mrf.mxu0  ;;  %2686 = vmatprep.subr.bf16.mxu1 %v5230_v15  ;;  %2727 = vmatprep.subr.bf16.mxu0 %v5232_v21 }
 0x2bc   : > { %v5882_v20 = vrot.slane %v5856_v7, %v7110_v18 }
 0x2bd   : > { %v1476_v4 = vpop.f32.mrf.mxu1  ;;  %v1537_v3 = vpop.f32.mrf.mxu0 }
 0x2be   : > { %v5888_v21 = vadd.f32 %v1476_v4, %v5874_v1  ;;  %v5891_v15 = vadd.f32 %v1537_v3, %v5877_v6  ;;  %2687 = vmatpush1.bf16.msra.mxu1 %v5248_v27  ;;  %2728 = vmatpush1.bf16.msra.mxu0 %v5250_v8  ;;  %v7115_v3 = vld [vmem:[#allocation47_spill] sm:$0xff]  ;;  %v7116_v4 = vld [vmem:[#allocation48_spill] sm:$0xff]  ;;  %v1473_v27 = vadd.f32 %v5858_v12, %v5874_v1 }
 0x2bf   : > { %v1478_v0 = vpop.f32.mrf.mxu1  ;;  %v1539_v5 = vpop.f32.mrf.mxu0  ;;  %2688 = vmatprep.subr.bf16.mxu1 %v5254_v33  ;;  %2729 = vmatprep.subr.bf16.mxu0 %v5256_v34 }
 0x2c0   : > { %7111 = vst [vmem:[#allocation130_spill] sm:$0xff] %v5888_v21  ;;  %7112 = vst [vmem:[#allocation131_spill] sm:$0xff] %v5891_v15  ;;  %v5898_v18 = vadd.f32 %v1478_v0, %v5882_v20  ;;  %v5901_v56 = vadd.f32 %v1539_v5, %v5885_v2  ;;  %v7117_v0 = vld [vmem:[#allocation49_spill] sm:$0xff]  ;;  %v7118_v5 = vld [vmem:[#allocation50_spill] sm:$0xff] }
 0x2c2   : > { %7113 = vst [vmem:[#allocation132_spill] sm:$0xff] %v5898_v18  ;;  %7114 = vst [vmem:[#allocation133_spill] sm:$0xff] %v5901_v56  ;;  %2689 = vmatpush2.bf16.msra.mxu1 %v5272_v36  ;;  %2730 = vmatpush2.bf16.msra.mxu0 %v5274_v37  ;;  %v7119_v56 = vld [vmem:[#allocation51_spill] sm:$0xff] }
 0x2c3   : > { %2690 = vmatprep.subr.bf16.mxu1 %v5278_v42  ;;  %2731 = vmatprep.subr.bf16.mxu0 %v5280_v43 }
 0x2c6   : > { %2691 = vmatpush2.bf16.msra.mxu1 %v5296_v57  ;;  %2732 = vmatpush2.bf16.msra.mxu0 %v5298_v58  ;;  %v7147_v58 = vld [vmem:[#allocation67_spill] sm:$0xff] }
 0x2c7   : > { %2692 = vmatprep.subr.bf16.mxu1 %v5302_v61  ;;  %2733 = vmatprep.subr.bf16.mxu0 %v5304_v62  ;;  %v7122_v62 = vld [vmem:[#allocation52_spill] sm:$0xff] }
 0x2c8   : > { %v7130_v61 = vld [vmem:[#allocation56_spill] sm:$0xff] }
 0x2ca   : > { %2693 = vmatpush2.bf16.msra.mxu1 %v5320_v10  ;;  %2734 = vmatpush2.bf16.msra.mxu0 %v5322_v11 }
 0x2cb   : > { %2694 = vmatprep.subr.bf16.mxu1 %v5326_v30  ;;  %2735 = vmatprep.subr.bf16.mxu0 %v7115_v3  ;;  %v7123_v3 = vld [vmem:[#allocation53_spill] sm:$0xff] }
 0x2ce   : > { %2695 = vmatpush2.bf16.msra.mxu1 %v7116_v4  ;;  %2736 = vmatpush2.bf16.msra.mxu0 %v7117_v0  ;;  %v7127_v4 = vld [vmem:[#allocation55_spill] sm:$0xff] }
 0x2cf   : > { %2696 = vmatprep.subr.bf16.mxu1 %v7118_v5  ;;  %2737 = vmatprep.subr.bf16.mxu0 %v7119_v56  ;;  %v7126_v56 = vld [vmem:[#allocation54_spill] sm:$0xff] }
 0x2d0   : > { %v1482_v18 = vpop.f32.mrf.mxu1  ;;  %v1543_v15 = vpop.f32.mrf.mxu0 }
 0x2d1   : > { %v5920_v21 = vadd.f32 %v1482_v18, %v5874_v1  ;;  %v5923_v10 = vadd.f32 %v1543_v15, %v5877_v6 }
 0x2d2   : > { %v1484_v11 = vpop.f32.mrf.mxu1  ;;  %v1545_v30 = vpop.f32.mrf.mxu0  ;;  %2697 = vmatpush2.bf16.msra.mxu1 %v7122_v62  ;;  %2738 = vmatpush2.bf16.msra.mxu0 %v7123_v3 }
 0x2d3   : > { %7120 = vst [vmem:[#allocation134_spill] sm:$0xff] %v5920_v21  ;;  %7121 = vst [vmem:[#allocation135_spill] sm:$0xff] %v5923_v10  ;;  %v5928_v0 = vadd.f32 %v1484_v11, %v5882_v20  ;;  %v5931_v5 = vadd.f32 %v1545_v30, %v5885_v2  ;;  %2698 = vmatprep.subr.bf16.mxu1 %v7126_v56  ;;  %2739 = vmatprep.subr.bf16.mxu0 %v7127_v4  ;;  %v7131_v11 = vld [vmem:[#allocation57_spill] sm:$0xff]  ;;  %v7135_v4 = vld [vmem:[#allocation59_spill] sm:$0xff] }
 0x2d4   : > { %v1486_v18 = vpop.f32.mrf.mxu1  ;;  %v1547_v21 = vpop.f32.mrf.mxu0  ;;  %v7146_v56 = vld [vmem:[#allocation66_spill] sm:$0xff] }
 0x2d5   : > { %7124 = vst [vmem:[#allocation136_spill] sm:$0xff] %v5928_v0  ;;  %7125 = vst [vmem:[#allocation137_spill] sm:$0xff] %v5931_v5  ;;  %v5936_v15 = vadd.f32 %v1486_v18, %v5874_v1  ;;  %v5939_v10 = vadd.f32 %v1547_v21, %v5877_v6  ;;  %v7134_v0 = vld [vmem:[#allocation58_spill] sm:$0xff] }
 0x2d6   : > { %v1488_v62 = vpop.f32.mrf.mxu1  ;;  %v1549_v3 = vpop.f32.mrf.mxu0  ;;  %2699 = vmatpush2.bf16.msra.mxu1 %v7130_v61  ;;  %2740 = vmatpush2.bf16.msra.mxu0 %v7131_v11  ;;  %v7138_v61 = vld [vmem:[#allocation60_spill] sm:$0xff]  ;;  %v7139_v11 = vld [vmem:[#allocation61_spill] sm:$0xff] }
 0x2d7   : > { %7128 = vst [vmem:[#allocation138_spill] sm:$0xff] %v5936_v15  ;;  %7129 = vst [vmem:[#allocation139_spill] sm:$0xff] %v5939_v10  ;;  %v5944_v30 = vadd.f32 %v1488_v62, %v5882_v20  ;;  %v5947_v5 = vadd.f32 %v1549_v3, %v5885_v2  ;;  %2700 = vmatprep.subr.bf16.mxu1 %v7134_v0  ;;  %2741 = vmatprep.subr.bf16.mxu0 %v7135_v4  ;;  %v7140_v3 = vld [vmem:[#allocation62_spill] sm:$0xff] }
 0x2d9   : > { %7132 = vst [vmem:[#allocation140_spill] sm:$0xff] %v5944_v30  ;;  %7133 = vst [vmem:[#allocation141_spill] sm:$0xff] %v5947_v5  ;;  %v1492_v18 = vpop.f32.mrf.mxu1  ;;  %v1553_v15 = vpop.f32.mrf.mxu0  ;;  %v7141_v5 = vld [vmem:[#allocation63_spill] sm:$0xff] }
 0x2da   : > { %v5952_v21 = vadd.f32 %v1492_v18, %v5874_v1  ;;  %v5955_v10 = vadd.f32 %v1553_v15, %v5877_v6  ;;  %2701 = vmatpush2.bf16.msra.mxu1 %v7138_v61  ;;  %2742 = vmatpush2.bf16.msra.mxu0 %v7139_v11  ;;  %v7144_v15 = vld [vmem:[#allocation64_spill] sm:$0xff] }
 0x2db   : > { %v1494_v62 = vpop.f32.mrf.mxu1  ;;  %v1555_v30 = vpop.f32.mrf.mxu0  ;;  %2702 = vmatprep.subr.bf16.mxu1 %v7140_v3  ;;  %2743 = vmatprep.subr.bf16.mxu0 %v7141_v5  ;;  %v1246_v5 = vsub.s32 4, %v4635_v23 }
 0x2dc   : > { %7136 = vst [vmem:[#allocation142_spill] sm:$0xff] %v5952_v21  ;;  %7137 = vst [vmem:[#allocation143_spill] sm:$0xff] %v5955_v10  ;;  %v5962_v4 = vadd.f32 %v1494_v62, %v5882_v20  ;;  %v5965_v0 = vadd.f32 %v1555_v30, %v5885_v2  ;;  %v7145_v10 = vld [vmem:[#allocation65_spill] sm:$0xff]  ;;  %v1254_v62 = vsub.s32 6, %v4635_v23 }
 0x2dd   : > { %v1496_v18 = vpop.f32.mrf.mxu1  ;;  %v1557_v21 = vpop.f32.mrf.mxu0 }
 0x2de   : > { %7142 = vst [vmem:[#allocation144_spill] sm:$0xff] %v5962_v4  ;;  %7143 = vst [vmem:[#allocation145_spill] sm:$0xff] %v5965_v0  ;;  %2703 = vmatpush2.bf16.msra.mxu1 %v7144_v15  ;;  %2744 = vmatpush2.bf16.msra.mxu0 %v7145_v10  ;;  %v1250_v21 = vsub.s32 5, %v4635_v23  ;;  %v1258_v18 = vsub.s32 7, %v4635_v23 }
 0x2df   : > { %v1497_v61 = vpop.f32.mrf.mxu1  ;;  %v1558_v11 = vpop.f32.mrf.mxu0  ;;  %2754 = vmatprep.subr.bf16.mxu1 %v7146_v56  ;;  %2795 = vmatprep.subr.bf16.mxu0 %v7147_v58  ;;  %v5987_v58 = vrot.slane %v5856_v7, %v1254_v62 }
 0x2e0   : > { %v5984_v11 = vrot.slane %v5856_v7, %v1246_v5  ;;  %v5990_v15 = vrot.slane %v5856_v7, %v1250_v21  ;;  %v5993_v3 = vrot.slane %v5856_v7, %v1258_v18 }
 0x2e1   : > { %v5973_v4 = vpop.f32.mrf.mxu1  ;;  %v5975_v30 = vpop.f32.mrf.mxu0 }
 0x2e3   : > { %v5979_v0 = vpop.f32.mrf.mxu1  ;;  %v5981_v61 = vpop.f32.mrf.mxu0 }
 0x2e5   : > { %v1598_v56 = vpop.f32.mrf.mxu1  ;;  %v1659_v10 = vpop.f32.mrf.mxu0 }
 0x2e6   : > { %v5996_v23 = vadd.f32 %v1598_v56, %v5984_v11  ;;  %v5999_v57 = vadd.f32 %v1659_v10, %v5987_v58 }
 0x2e7   : > { %v1600_v43 = vpop.f32.mrf.mxu1  ;;  %v1661_v5 = vpop.f32.mrf.mxu0 }
 0x2e8   : > { %7148 = vst [vmem:[#allocation146_spill] sm:$0xff] %v5996_v23  ;;  %7149 = vst [vmem:[#allocation147_spill] sm:$0xff] %v5999_v57  ;;  %v6002_v42 = vadd.f32 %v1600_v43, %v5990_v15  ;;  %v6005_v62 = vadd.f32 %v1661_v5, %v5993_v3 }
 0x2e9   : > { %v1604_v37 = vpop.f32.mrf.mxu1  ;;  %v1665_v21 = vpop.f32.mrf.mxu0 }
 0x2ea   : > { %7150 = vst [vmem:[#allocation148_spill] sm:$0xff] %v6002_v42  ;;  %7151 = vst [vmem:[#allocation149_spill] sm:$0xff] %v6005_v62  ;;  %v6008_v36 = vadd.f32 %v1604_v37, %v5984_v11  ;;  %v6011_v7 = vadd.f32 %v1665_v21, %v5987_v58 }
 0x2eb   : > { %v1606_v56 = vpop.f32.mrf.mxu1  ;;  %v1667_v18 = vpop.f32.mrf.mxu0 }
 0x2ec   : > { %7152 = vst [vmem:[#allocation150_spill] sm:$0xff] %v6008_v36  ;;  %7153 = vst [vmem:[#allocation151_spill] sm:$0xff] %v6011_v7  ;;  %v6014_v10 = vadd.f32 %v1606_v56, %v5990_v15  ;;  %v6017_v57 = vadd.f32 %v1667_v18, %v5993_v3 }
 0x2ed   : > { %v1608_v43 = vpop.f32.mrf.mxu1  ;;  %v1669_v42 = vpop.f32.mrf.mxu0 }
 0x2ee   : > { %7154 = vst [vmem:[#allocation152_spill] sm:$0xff] %v6014_v10  ;;  %7155 = vst [vmem:[#allocation153_spill] sm:$0xff] %v6017_v57  ;;  %v6020_v5 = vadd.f32 %v1608_v43, %v5984_v11  ;;  %v6023_v62 = vadd.f32 %v1669_v42, %v5987_v58 }
 0x2ef   : > { %v1610_v37 = vpop.f32.mrf.mxu1  ;;  %v1671_v36 = vpop.f32.mrf.mxu0 }
 0x2f0   : > { %7156 = vst [vmem:[#allocation154_spill] sm:$0xff] %v6020_v5  ;;  %7157 = vst [vmem:[#allocation155_spill] sm:$0xff] %v6023_v62  ;;  %v6026_v21 = vadd.f32 %v1610_v37, %v5990_v15  ;;  %v6029_v7 = vadd.f32 %v1671_v36, %v5993_v3 }
 0x2f1   : > { %v1614_v56 = vpop.f32.mrf.mxu1  ;;  %v1675_v10 = vpop.f32.mrf.mxu0 }
 0x2f2   : > { %7158 = vst [vmem:[#allocation156_spill] sm:$0xff] %v6026_v21  ;;  %7159 = vst [vmem:[#allocation157_spill] sm:$0xff] %v6029_v7  ;;  %v6032_v18 = vadd.f32 %v1614_v56, %v5984_v11  ;;  %v6035_v57 = vadd.f32 %v1675_v10, %v5987_v58 }
 0x2f3   : > { %v1616_v43 = vpop.f32.mrf.mxu1  ;;  %v1677_v5 = vpop.f32.mrf.mxu0 }
 0x2f4   : > { %7160 = vst [vmem:[#allocation158_spill] sm:$0xff] %v6032_v18  ;;  %7161 = vst [vmem:[#allocation159_spill] sm:$0xff] %v6035_v57  ;;  %v6038_v42 = vadd.f32 %v1616_v43, %v5990_v15  ;;  %v6041_v62 = vadd.f32 %v1677_v5, %v5993_v3  ;;  %v1534_v43 = vadd.f32 %v5860_v55, %v5877_v6 }
 0x2f5   : > { %v1618_v37 = vpop.f32.mrf.mxu1  ;;  %v1679_v21 = vpop.f32.mrf.mxu0  ;;  %v1475_v5 = vadd.f32 %v5865_v35, %v5882_v20  ;;  %v1597_v35 = vadd.f32 %v5979_v0, %v5990_v15 }
 0x2f6   : > { %7162 = vst [vmem:[#allocation160_spill] sm:$0xff] %v6038_v42  ;;  %7163 = vst [vmem:[#allocation161_spill] sm:$0xff] %v6041_v62  ;;  %v7193_v42 = vld [vmem:[#allocation97_spill] sm:$0xff] }
 0x2f7   : > { %v1619_v36 = vpop.f32.mrf.mxu1  ;;  %v1680_v7 = vpop.f32.mrf.mxu0 }
 0x2f8   : > { %v1536_v7 = vadd.f32 %v5867_v14, %v5885_v2  ;;  %v1595_v2 = vadd.f32 %v5973_v4, %v5984_v11 }
 0x321   : > { %v2484_v23 = vpop.f32.mrf.mxu1  ;;  %v2525_v34 = vpop.f32.mrf.mxu0 }
 0x322   : > { %v2614_v21 = vadd.f32 %v2484_v23, %v1473_v27  ;;  %v2616_v37 = vadd.f32 %v2525_v34, %v1534_v43 }
 0x323   : > { %v2486_v33 = vpop.f32.mrf.mxu1  ;;  %v2527_v56 = vpop.f32.mrf.mxu0 }
 0x324   : > { %v2615_v36 = vadd.f32 %v2486_v33, %v1475_v5  ;;  %v4104_v62 = vmul.f32 -1.442695, %v2614_v21  ;;  %v1656_v33 = vadd.f32 %v5975_v30, %v5987_v58 }
 0x325   : > { %v2488_v18 = vpop.f32.mrf.mxu1  ;;  %v2529_v8 = vpop.f32.mrf.mxu0 }
 0x326   : > { %v2617_v18 = vadd.f32 %v2527_v56, %v1536_v7  ;;  %v4106_v8 = vmul.f32 -1.442695, %v2616_v37  ;;  %4322 = vpow2.f32 %v4104_v62  ;;  %v1658_v56 = vadd.f32 %v5981_v61, %v5993_v3 }
 0x327   : > { %v2489_v10 = vpop.f32.mrf.mxu1  ;;  %v2530_v57 = vpop.f32.mrf.mxu0 }
 0x328   : > { %v4105_v10 = vmul.f32 -1.442695, %v2615_v36  ;;  %v4107_v57 = vmul.f32 -1.442695, %v2617_v18  ;;  %4324 = vpow2.f32 %v4106_v8 }
 0x32a   : > { %4326 = vpow2.f32 %v4105_v10 }
 0x32b   : > { %4328 = vpow2.f32 %v4107_v57 }
 0x333   : > { %v4323_v12 = vpop.eup %4322 }
 0x334   : > { %v2640_v1 = vadd.f32 1.0, %v4323_v12 }
 0x335   : > { %v4325_v6 = vpop.eup %4324 }
 0x336   : > { %v2642_v27 = vadd.f32 1.0, %v4325_v6  ;;  %4330 = vrcp.f32 %v2640_v1 }
 0x337   : > { %v4327_v55 = vpop.eup %4326 }
 0x338   : > { %v4329_v20 = vpop.eup %4328  ;;  %v2641_v34 = vadd.f32 1.0, %v4327_v55  ;;  %4332 = vrcp.f32 %v2642_v27 }
 0x339   : > { %v2643_v14 = vadd.f32 1.0, %v4329_v20 }
 0x33a   : > { %4334 = vrcp.f32 %v2641_v34 }
 0x343   : > { %v4331_v3 = vpop.eup %4330 }
 0x345   : > { %v4333_v61 = vpop.eup %4332 }
 0x346   : > { %v2660_v57 = vmul.f32 0.0, %v4333_v61  ;;  %v7173_v61 = vld [vmem:[#allocation77_spill] sm:$0xff] }
 0x347   : > { %v4335_v18 = vpop.eup %4334 }
 0x361   : > { %v2566_v23 = vpop.f32.mrf.mxu1  ;;  %v2607_v62 = vpop.f32.mrf.mxu0 }
 0x362   : > { %v2618_v43 = vadd.f32 %v2566_v23, %v1595_v2  ;;  %v2620_v5 = vadd.f32 %v2607_v62, %v1656_v33 }
 0x363   : > { %v2568_v21 = vpop.f32.mrf.mxu1  ;;  %v2609_v37 = vpop.f32.mrf.mxu0 }
 0x364   : > { %v4108_v4 = vmul.f32 -1.442695, %v2618_v43  ;;  %4336 = vtanh.f32 %v2620_v5  ;;  %v2619_v11 = vadd.f32 %v2568_v21, %v1597_v35  ;;  %v2621_v58 = vadd.f32 %v2609_v37, %v1658_v56 }
 0x365   : > { %4338 = vrcp.f32 %v2643_v14  ;;  %v2570_v30 = vpop.f32.mrf.mxu1  ;;  %v2611_v0 = vpop.f32.mrf.mxu0 }
 0x366   : > { %4340 = vpow2.f32 %v4108_v4  ;;  %v4109_v15 = vmul.f32 -1.442695, %v2619_v11  ;;  %v7164_v4 = vld [vmem:[#allocation68_spill] sm:$0xff]  ;;  %v7165_v11 = vld [vmem:[#allocation69_spill] sm:$0xff]  ;;  %v7167_v30 = vld [vmem:[#allocation71_spill] sm:$0xff] }
 0x367   : > { %4342 = vtanh.f32 %v2621_v58  ;;  %v2571_v7 = vpop.f32.mrf.mxu1  ;;  %v2612_v36 = vpop.f32.mrf.mxu0  ;;  %v7166_v58 = vld [vmem:[#allocation70_spill] sm:$0xff]  ;;  %v7168_v0 = vld [vmem:[#allocation72_spill] sm:$0xff] }
 0x368   : > { %4344 = vpow2.f32 %v4109_v15  ;;  %v7169_v15 = vld [vmem:[#allocation73_spill] sm:$0xff]  ;;  %v7170_v7 = vld [vmem:[#allocation74_spill] sm:$0xff]  ;;  %v7171_v36 = vld [vmem:[#allocation75_spill] sm:$0xff] }
 0x371   : > { %v4337_v8 = vpop.eup %4336 }
 0x372   : > { %v4339_v10 = vpop.eup %4338  ;;  %v2662_v12 = vmul.f32 %v4337_v8, %v4331_v3  ;;  %v7172_v3 = vld [vmem:[#allocation76_spill] sm:$0xff]  ;;  %v7175_v8 = vld [vmem:[#allocation79_spill] sm:$0xff] }
 0x373   : > { %v4341_v6 = vpop.eup %4340  ;;  %v2661_v34 = vmul.f32 0.0, %v4339_v10  ;;  %v7176_v10 = vld [vmem:[#allocation80_spill] sm:$0xff] }
 0x374   : > { %v4343_v55 = vpop.eup %4342  ;;  %v2644_v1 = vadd.f32 1.0, %v4341_v6  ;;  %v6059_v20 = vadd.f32 %v2662_v12, %v2660_v57  ;;  %v7177_v57 = vld [vmem:[#allocation81_spill] sm:$0xff]  ;;  %v7178_v12 = vld [vmem:[#allocation82_spill] sm:$0xff]  ;;  %v7179_v6 = vld [vmem:[#allocation83_spill] sm:$0xff] }
 0x375   : > { %v4345_v27 = vpop.eup %4344  ;;  %v2663_v2 = vmul.f32 %v4343_v55, %v4335_v18  ;;  %v7174_v18 = vld [vmem:[#allocation78_spill] sm:$0xff]  ;;  %v7180_v55 = vld [vmem:[#allocation84_spill] sm:$0xff] }
 0x376   : > { %4346 = vrcp.f32 %v2644_v1  ;;  %v2645_v33 = vadd.f32 1.0, %v4345_v27  ;;  %v7181_v1 = vld [vmem:[#allocation85_spill] sm:$0xff]  ;;  %v7182_v27 = vld [vmem:[#allocation86_spill] sm:$0xff] }
 0x377   : > { %4348 = vtanh.f32 %v6059_v20  ;;  %v6062_v35 = vadd.f32 %v2663_v2, %v2661_v34  ;;  %v7183_v34 = vld [vmem:[#allocation87_spill] sm:$0xff]  ;;  %v7184_v2 = vld [vmem:[#allocation88_spill] sm:$0xff] }
 0x378   : > { %4350 = vrcp.f32 %v2645_v33  ;;  %v7185_v33 = vld [vmem:[#allocation89_spill] sm:$0xff] }
 0x379   : > { %4352 = vtanh.f32 %v6062_v35 }
 0x383   : > { %v4347_v14 = vpop.eup %4346 }
 0x384   : > { %v4349_v23 = vpop.eup %4348 }
 0x385   : > { %v4351_v62 = vpop.eup %4350  ;;  %v2668_v43 = vmul.f32 %v4349_v23, %v4347_v14  ;;  %v7186_v14 = vld [vmem:[#allocation90_spill] sm:$0xff]  ;;  %v7187_v23 = vld [vmem:[#allocation91_spill] sm:$0xff] }
 0x386   : > { %v4353_v56 = vpop.eup %4352 }
 0x387   : > { %v2669_v5 = vmul.f32 %v4353_v56, %v4351_v62  ;;  %v6065_v37 = vpack.c.bf16 %v2668_v43, %v2668_v43  ;;  %v7188_v62 = vld [vmem:[#allocation92_spill] sm:$0xff]  ;;  %v7189_v56 = vld [vmem:[#allocation93_spill] sm:$0xff]  ;;  %v7190_v43 = vld [vmem:[#allocation94_spill] sm:$0xff] }
 0x389   : > { %v2671_v21 = vpack.c.bf16 %v2669_v5, %v2669_v5  ;;  %v7191_v5 = vld [vmem:[#allocation95_spill] sm:$0xff] }
 0x38b   : > { %2704 = vmatprep.mubr.bf16.mxu1 %v2671_v21  ;;  %2745 = vmatprep.mubr.bf16.mxu0 %v2671_v21 }
 0x38c   : > { %2705 = vmatmul.mubr.bf16.vlgmr.msra.gmra.mxu1 %v6065_v37  ;;  %2746 = vmatmul.mubr.bf16.vlgmr.msra.gmra.mxu0 %v6065_v37 }
 0x38d   : > { %2755 = vmatpush1.bf16.msra.mxu1 %v7164_v4  ;;  %2796 = vmatpush1.bf16.msra.mxu0 %v7165_v11 }
 0x38e   : > { %2786 = vmatprep.mubr.bf16.mxu1 %v2671_v21  ;;  %2827 = vmatprep.mubr.bf16.mxu0 %v2671_v21  ;;  %v7192_v21 = vld [vmem:[#allocation96_spill] sm:$0xff] }
 0x38f   : > { %2756 = vmatprep.subr.bf16.mxu1 %v7166_v58  ;;  %2797 = vmatprep.subr.bf16.mxu0 %v7167_v30 }
 0x391   : > { %2757 = vmatpush1.bf16.msra.mxu1 %v7168_v0  ;;  %2798 = vmatpush1.bf16.msra.mxu0 %v7169_v15 }
 0x392   : > { %2758 = vmatprep.subr.bf16.mxu1 %v7170_v7  ;;  %2799 = vmatprep.subr.bf16.mxu0 %v7171_v36 }
 0x395   : > { %2759 = vmatpush1.bf16.msra.mxu1 %v7172_v3  ;;  %2800 = vmatpush1.bf16.msra.mxu0 %v7173_v61 }
 0x396   : > { %2760 = vmatprep.subr.bf16.mxu1 %v7174_v18  ;;  %2801 = vmatprep.subr.bf16.mxu0 %v7175_v8 }
 0x399   : > { %2761 = vmatpush1.bf16.msra.mxu1 %v7176_v10  ;;  %2802 = vmatpush1.bf16.msra.mxu0 %v7177_v57 }
 0x39a   : > { %2762 = vmatprep.subr.bf16.mxu1 %v7178_v12  ;;  %2803 = vmatprep.subr.bf16.mxu0 %v7179_v6 }
 0x39d   : > { %2763 = vmatpush1.bf16.msra.mxu1 %v7180_v55  ;;  %2804 = vmatpush1.bf16.msra.mxu0 %v7181_v1 }
 0x39e   : > { %2764 = vmatprep.subr.bf16.mxu1 %v7182_v27  ;;  %2805 = vmatprep.subr.bf16.mxu0 %v7183_v34  ;;  %v7194_v34 = vld [vmem:[#allocation98_spill] sm:$0xff] }
 0x3a1   : > { %2765 = vmatpush1.bf16.msra.mxu1 %v7184_v2  ;;  %2806 = vmatpush1.bf16.msra.mxu0 %v7185_v33  ;;  %v7195_v2 = vld [vmem:[#allocation99_spill] sm:$0xff]  ;;  %v7196_v33 = vld [vmem:[#allocation100_spill] sm:$0xff] }
 0x3a2   : > { %2766 = vmatprep.subr.bf16.mxu1 %v7186_v14  ;;  %2807 = vmatprep.subr.bf16.mxu0 %v7187_v23  ;;  %v7197_v14 = vld [vmem:[#allocation101_spill] sm:$0xff]  ;;  %v7198_v23 = vld [vmem:[#allocation102_spill] sm:$0xff] }
 0x3a5   : > { %2767 = vmatpush1.bf16.msra.mxu1 %v7188_v62  ;;  %2808 = vmatpush1.bf16.msra.mxu0 %v7189_v56  ;;  %v7199_v62 = vld [vmem:[#allocation103_spill] sm:$0xff]  ;;  %v7200_v56 = vld [vmem:[#allocation104_spill] sm:$0xff] }
 0x3a6   : > { %2768 = vmatprep.subr.bf16.mxu1 %v7190_v43  ;;  %2809 = vmatprep.subr.bf16.mxu0 %v7191_v5  ;;  %v7201_v43 = vld [vmem:[#allocation105_spill] sm:$0xff]  ;;  %v7202_v5 = vld [vmem:[#allocation106_spill] sm:$0xff] }
 0x3a9   : > { %2769 = vmatpush1.bf16.msra.mxu1 %v7192_v21  ;;  %2810 = vmatpush1.bf16.msra.mxu0 %v7193_v42  ;;  %v7203_v21 = vld [vmem:[#allocation107_spill] sm:$0xff]  ;;  %v7204_v42 = vld [vmem:[#allocation108_spill] sm:$0xff] }
 0x3aa   : > { %2770 = vmatprep.subr.bf16.mxu1 %v7194_v34  ;;  %2811 = vmatprep.subr.bf16.mxu0 %v7195_v2  ;;  %v7205_v34 = vld [vmem:[#allocation109_spill] sm:$0xff]  ;;  %v7206_v2 = vld [vmem:[#allocation110_spill] sm:$0xff] }
 0x3ad   : > { %2771 = vmatpush2.bf16.msra.mxu1 %v7196_v33  ;;  %2812 = vmatpush2.bf16.msra.mxu0 %v7197_v14  ;;  %v7207_v33 = vld [vmem:[#allocation111_spill] sm:$0xff]  ;;  %v7208_v14 = vld [vmem:[#allocation112_spill] sm:$0xff] }
 0x3ae   : > { %2772 = vmatprep.subr.bf16.mxu1 %v7198_v23  ;;  %2813 = vmatprep.subr.bf16.mxu0 %v7199_v62  ;;  %v7209_v23 = vld [vmem:[#allocation113_spill] sm:$0xff]  ;;  %v7210_v62 = vld [vmem:[#allocation114_spill] sm:$0xff] }
 0x3b1   : > { %2773 = vmatpush2.bf16.msra.mxu1 %v7200_v56  ;;  %2814 = vmatpush2.bf16.msra.mxu0 %v7201_v43  ;;  %v7211_v56 = vld [vmem:[#allocation115_spill] sm:$0xff]  ;;  %v7212_v43 = vld [vmem:[#allocation116_spill] sm:$0xff] }
 0x3b2   : > { %2774 = vmatprep.subr.bf16.mxu1 %v7202_v5  ;;  %2815 = vmatprep.subr.bf16.mxu0 %v7203_v21  ;;  %v7213_v5 = vld [vmem:[#allocation117_spill] sm:$0xff]  ;;  %v7214_v21 = vld [vmem:[#allocation118_spill] sm:$0xff] }
 0x3b5   : > { %2775 = vmatpush2.bf16.msra.mxu1 %v7204_v42  ;;  %2816 = vmatpush2.bf16.msra.mxu0 %v7205_v34  ;;  %v7215_v42 = vld [vmem:[#allocation119_spill] sm:$0xff]  ;;  %v7216_v34 = vld [vmem:[#allocation120_spill] sm:$0xff] }
 0x3b6   : > { %2776 = vmatprep.subr.bf16.mxu1 %v7206_v2  ;;  %2817 = vmatprep.subr.bf16.mxu0 %v7207_v33 }
 0x3b9   : > { %2777 = vmatpush2.bf16.msra.mxu1 %v7208_v14  ;;  %2818 = vmatpush2.bf16.msra.mxu0 %v7209_v23 }
 0x3ba   : > { %2778 = vmatprep.subr.bf16.mxu1 %v7210_v62  ;;  %2819 = vmatprep.subr.bf16.mxu0 %v7211_v56 }
 0x3bd   : > { %2779 = vmatpush2.bf16.msra.mxu1 %v7212_v43  ;;  %2820 = vmatpush2.bf16.msra.mxu0 %v7213_v5 }
 0x3be   : > { %2780 = vmatprep.subr.bf16.mxu1 %v7214_v21  ;;  %2821 = vmatprep.subr.bf16.mxu0 %v7215_v42 }
 0x3c1   : > { %2781 = vmatpush2.bf16.msra.mxu1 %v7216_v34  ;;  %2822 = vmatpush2.bf16.msra.mxu0 %v5782_v52 }
 0x3c2   : > { %2782 = vmatprep.subr.bf16.mxu1 %v5786_v44  ;;  %2823 = vmatprep.subr.bf16.mxu0 %v5788_v50 }
 0x3c5   : > { %2783 = vmatpush2.bf16.msra.mxu1 %v5804_v46  ;;  %2824 = vmatpush2.bf16.msra.mxu0 %v5806_v9 }
 0x3c6   : > { %2784 = vmatprep.subr.bf16.mxu1 %v5810_v24  ;;  %2825 = vmatprep.subr.bf16.mxu0 %v5812_v25 }
 0x3c9   : > { %2785 = vmatpush2.bf16.msra.mxu1 %v5816_v63  ;;  %2826 = vmatpush2.bf16.msra.mxu0 %v5818_v49 }
 0x3ca   : > { %2894 = vmatprep.subr.bf16.mxu1 %v5020_v53  ;;  %2935 = vmatprep.subr.bf16.mxu0 %v5022_v54 }
 0x3cc   : > { %2787 = vmatmul.mubr.bf16.vlgmr.msra.gmra.mxu1 %v6065_v37  ;;  %2828 = vmatmul.mubr.bf16.vlgmr.msra.gmra.mxu0 %v6065_v37  ;;  %v7217_v37 = vld [vmem:[#allocation24_spill] sm:$0xff] }
 0x3cd   : > { %2895 = vmatpush1.bf16.msra.mxu1 %v5066_v28  ;;  %2936 = vmatpush1.bf16.msra.mxu0 %v5068_v29 }
 0x3ce   : > { %2896 = vmatprep.subr.bf16.mxu1 %v5070_v31  ;;  %2937 = vmatprep.subr.bf16.mxu0 %v5072_v32 }
 0x3d1   : > { %2897 = vmatpush1.bf16.msra.mxu1 %v5092_v16  ;;  %2938 = vmatpush1.bf16.msra.mxu0 %v5094_v17  ;;  %v7262_v17 = vld [vmem:[#allocation131_spill] sm:$0xff]  ;;  %v7263_v16 = vld [vmem:[#allocation132_spill] sm:$0xff] }
 0x3d2   : > { %2898 = vmatprep.subr.bf16.mxu1 %v5098_v19  ;;  %2939 = vmatprep.subr.bf16.mxu0 %v5100_v26  ;;  %v7261_v19 = vld [vmem:[#allocation130_spill] sm:$0xff] }
 0x3d5   : > { %2899 = vmatpush1.bf16.msra.mxu1 %v5118_v45  ;;  %2940 = vmatpush1.bf16.msra.mxu0 %v5120_v39 }
 0x3d6   : > { %2900 = vmatprep.subr.bf16.mxu1 %v5124_v40  ;;  %2941 = vmatprep.subr.bf16.mxu0 %v5126_v41  ;;  %v7218_v40 = vld [vmem:[#allocation25_spill] sm:$0xff]  ;;  %v7219_v41 = vld [vmem:[#allocation26_spill] sm:$0xff] }
 0x3d9   : > { %2901 = vmatpush1.bf16.msra.mxu1 %v5144_v47  ;;  %2942 = vmatpush1.bf16.msra.mxu0 %v5146_v48  ;;  %v7220_v47 = vld [vmem:[#allocation27_spill] sm:$0xff]  ;;  %v7221_v48 = vld [vmem:[#allocation28_spill] sm:$0xff] }
 0x3da   : > { %2902 = vmatprep.subr.bf16.mxu1 %v5150_v51  ;;  %2943 = vmatprep.subr.bf16.mxu0 %v5152_v38  ;;  %v7222_v51 = vld [vmem:[#allocation29_spill] sm:$0xff]  ;;  %v7223_v38 = vld [vmem:[#allocation30_spill] sm:$0xff] }
 0x3dd   : > { %2903 = vmatpush1.bf16.msra.mxu1 %v5170_v59  ;;  %2944 = vmatpush1.bf16.msra.mxu0 %v5172_v13  ;;  %v7224_v59 = vld [vmem:[#allocation31_spill] sm:$0xff]  ;;  %v7225_v13 = vld [vmem:[#allocation32_spill] sm:$0xff] }
 0x3de   : > { %2904 = vmatprep.subr.bf16.mxu1 %v5176_v60  ;;  %2945 = vmatprep.subr.bf16.mxu0 %v5178_v22  ;;  %v7226_v60 = vld [vmem:[#allocation33_spill] sm:$0xff]  ;;  %v7227_v22 = vld [vmem:[#allocation34_spill] sm:$0xff] }
 0x3e1   : > { %2905 = vmatpush1.bf16.msra.mxu1 %v7217_v37  ;;  %2946 = vmatpush1.bf16.msra.mxu0 %v7218_v40  ;;  %v7228_v37 = vld [vmem:[#allocation35_spill] sm:$0xff]  ;;  %v7229_v40 = vld [vmem:[#allocation36_spill] sm:$0xff] }
 0x3e2   : > { %2906 = vmatprep.subr.bf16.mxu1 %v7219_v41  ;;  %2947 = vmatprep.subr.bf16.mxu0 %v7220_v47  ;;  %v7230_v41 = vld [vmem:[#allocation37_spill] sm:$0xff]  ;;  %v7231_v47 = vld [vmem:[#allocation38_spill] sm:$0xff] }
 0x3e5   : > { %2907 = vmatpush1.bf16.msra.mxu1 %v7221_v48  ;;  %2948 = vmatpush1.bf16.msra.mxu0 %v7222_v51  ;;  %v7232_v48 = vld [vmem:[#allocation39_spill] sm:$0xff]  ;;  %v7233_v51 = vld [vmem:[#allocation40_spill] sm:$0xff] }
 0x3e6   : > { %2908 = vmatprep.subr.bf16.mxu1 %v7223_v38  ;;  %2949 = vmatprep.subr.bf16.mxu0 %v7224_v59  ;;  %v7234_v38 = vld [vmem:[#allocation41_spill] sm:$0xff]  ;;  %v7235_v59 = vld [vmem:[#allocation42_spill] sm:$0xff] }
 0x3e9   : > { %2909 = vmatpush1.bf16.msra.mxu1 %v7225_v13  ;;  %2950 = vmatpush1.bf16.msra.mxu0 %v7226_v60  ;;  %v7236_v13 = vld [vmem:[#allocation43_spill] sm:$0xff]  ;;  %v7237_v60 = vld [vmem:[#allocation44_spill] sm:$0xff] }
 0x3ea   : > { %2910 = vmatprep.subr.bf16.mxu1 %v7227_v22  ;;  %2951 = vmatprep.subr.bf16.mxu0 %v7228_v37  ;;  %v7238_v22 = vld [vmem:[#allocation45_spill] sm:$0xff]  ;;  %v7239_v37 = vld [vmem:[#allocation46_spill] sm:$0xff] }
 0x3ed   : > { %2911 = vmatpush2.bf16.msra.mxu1 %v7229_v40  ;;  %2952 = vmatpush2.bf16.msra.mxu0 %v7230_v41  ;;  %v7240_v40 = vld [vmem:[#allocation47_spill] sm:$0xff]  ;;  %v7241_v41 = vld [vmem:[#allocation48_spill] sm:$0xff] }
 0x3ee   : > { %2912 = vmatprep.subr.bf16.mxu1 %v7231_v47  ;;  %2953 = vmatprep.subr.bf16.mxu0 %v7232_v48  ;;  %v7242_v47 = vld [vmem:[#allocation49_spill] sm:$0xff]  ;;  %v7243_v48 = vld [vmem:[#allocation50_spill] sm:$0xff] }
 0x3f1   : > { %2913 = vmatpush2.bf16.msra.mxu1 %v7233_v51  ;;  %2954 = vmatpush2.bf16.msra.mxu0 %v7234_v38  ;;  %v7244_v51 = vld [vmem:[#allocation51_spill] sm:$0xff]  ;;  %v7245_v38 = vld [vmem:[#allocation52_spill] sm:$0xff] }
 0x3f2   : > { %2914 = vmatprep.subr.bf16.mxu1 %v7235_v59  ;;  %2955 = vmatprep.subr.bf16.mxu0 %v7236_v13  ;;  %v7246_v59 = vld [vmem:[#allocation53_spill] sm:$0xff]  ;;  %v7247_v13 = vld [vmem:[#allocation54_spill] sm:$0xff] }
 0x3f5   : > { %2915 = vmatpush2.bf16.msra.mxu1 %v7237_v60  ;;  %2956 = vmatpush2.bf16.msra.mxu0 %v7238_v22  ;;  %v7248_v60 = vld [vmem:[#allocation55_spill] sm:$0xff]  ;;  %v7249_v22 = vld [vmem:[#allocation56_spill] sm:$0xff] }
 0x3f6   : > { %2916 = vmatprep.subr.bf16.mxu1 %v7239_v37  ;;  %2957 = vmatprep.subr.bf16.mxu0 %v7240_v40  ;;  %v7250_v37 = vld [vmem:[#allocation57_spill] sm:$0xff]  ;;  %v7251_v40 = vld [vmem:[#allocation58_spill] sm:$0xff] }
 0x3f9   : > { %2917 = vmatpush2.bf16.msra.mxu1 %v7241_v41  ;;  %2958 = vmatpush2.bf16.msra.mxu0 %v7242_v47  ;;  %v7252_v41 = vld [vmem:[#allocation59_spill] sm:$0xff]  ;;  %v7253_v47 = vld [vmem:[#allocation60_spill] sm:$0xff] }
 0x3fa   : > { %2918 = vmatprep.subr.bf16.mxu1 %v7243_v48  ;;  %2959 = vmatprep.subr.bf16.mxu0 %v7244_v51  ;;  %v7254_v48 = vld [vmem:[#allocation61_spill] sm:$0xff]  ;;  %v7255_v51 = vld [vmem:[#allocation62_spill] sm:$0xff] }
 0x3fd   : > { %2919 = vmatpush2.bf16.msra.mxu1 %v7245_v38  ;;  %2960 = vmatpush2.bf16.msra.mxu0 %v7246_v59  ;;  %v7256_v38 = vld [vmem:[#allocation63_spill] sm:$0xff]  ;;  %v7257_v59 = vld [vmem:[#allocation64_spill] sm:$0xff] }
 0x3fe   : > { %2920 = vmatprep.subr.bf16.mxu1 %v7247_v13  ;;  %2961 = vmatprep.subr.bf16.mxu0 %v7248_v60  ;;  %v7258_v13 = vld [vmem:[#allocation65_spill] sm:$0xff]  ;;  %v7259_v60 = vld [vmem:[#allocation66_spill] sm:$0xff] }
 0x401   : > { %2921 = vmatpush2.bf16.msra.mxu1 %v7249_v22  ;;  %2962 = vmatpush2.bf16.msra.mxu0 %v7250_v37  ;;  %v7260_v22 = vld [vmem:[#allocation67_spill] sm:$0xff] }
 0x402   : > { %2922 = vmatprep.subr.bf16.mxu1 %v7251_v40  ;;  %2963 = vmatprep.subr.bf16.mxu0 %v7252_v41 }
 0x405   : > { %2923 = vmatpush2.bf16.msra.mxu1 %v7253_v47  ;;  %2964 = vmatpush2.bf16.msra.mxu0 %v7254_v48 }
 0x406   : > { %2924 = vmatprep.subr.bf16.mxu1 %v7255_v51  ;;  %2965 = vmatprep.subr.bf16.mxu0 %v7256_v38 }
 0x409   : > { %2925 = vmatpush2.bf16.msra.mxu1 %v7257_v59  ;;  %2966 = vmatpush2.bf16.msra.mxu0 %v7258_v13  ;;  %v7264_v13 = vld [vmem:[#allocation133_spill] sm:$0xff] }
 0x40a   : > { %2976 = vmatprep.subr.bf16.mxu1 %v7259_v60  ;;  %3017 = vmatprep.subr.bf16.mxu0 %v7260_v22 }
 0x44c   : > { %v2706_v37 = vpop.f32.mrf.mxu1  ;;  %v2747_v40 = vpop.f32.mrf.mxu0 }
 0x44d   : > { %v2836_v51 = vadd.f32 %v2706_v37, %v7261_v19  ;;  %v2838_v38 = vadd.f32 %v2747_v40, %v7262_v17  ;;  %v7265_v40 = vld [vmem:[#allocation146_spill] sm:$0xff] }
 0x44e   : > { %v2708_v39 = vpop.f32.mrf.mxu1  ;;  %v2749_v41 = vpop.f32.mrf.mxu0 }
 0x44f   : > { %v2837_v59 = vadd.f32 %v2708_v39, %v7263_v16  ;;  %v4110_v32 = vmul.f32 -1.442695, %v2836_v51  ;;  %v2839_v31 = vadd.f32 %v2749_v41, %v7264_v13  ;;  %v4112_v60 = vmul.f32 -1.442695, %v2838_v38  ;;  %v7266_v51 = vld [vmem:[#allocation147_spill] sm:$0xff] }
 0x450   : > { %v2710_v45 = vpop.f32.mrf.mxu1  ;;  %v2751_v47 = vpop.f32.mrf.mxu0 }
 0x451   : > { %v4111_v29 = vmul.f32 -1.442695, %v2837_v59  ;;  %4354 = vpow2.f32 %v4110_v32  ;;  %v4113_v22 = vmul.f32 -1.442695, %v2839_v31  ;;  %v7267_v59 = vld [vmem:[#allocation148_spill] sm:$0xff] }
 0x452   : > { %v2711_v26 = vpop.f32.mrf.mxu1  ;;  %v2752_v48 = vpop.f32.mrf.mxu0  ;;  %4356 = vpow2.f32 %v4112_v60  ;;  %v7268_v60 = vld [vmem:[#allocation149_spill] sm:$0xff] }
 0x453   : > { %4358 = vpow2.f32 %v4111_v29 }
 0x454   : > { %4360 = vpow2.f32 %v4113_v22 }
 0x45e   : > { %v4355_v45 = vpop.eup %4354 }
 0x45f   : > { %v4357_v47 = vpop.eup %4356  ;;  %v2862_v48 = vadd.f32 1.0, %v4355_v45 }
 0x460   : > { %v4359_v26 = vpop.eup %4358  ;;  %v2864_v19 = vadd.f32 1.0, %v4357_v47 }
 0x461   : > { %v4361_v28 = vpop.eup %4360  ;;  %v2863_v37 = vadd.f32 1.0, %v4359_v26  ;;  %4362 = vrcp.f32 %v2862_v48 }
 0x462   : > { %v2865_v17 = vadd.f32 1.0, %v4361_v28  ;;  %4364 = vrcp.f32 %v2864_v19 }
 0x463   : > { %4366 = vrcp.f32 %v2863_v37 }
 0x46e   : > { %v4363_v19 = vpop.eup %4362 }
 0x48c   : > { %v2788_v16 = vpop.f32.mrf.mxu1  ;;  %v2829_v39 = vpop.f32.mrf.mxu0 }
 0x48d   : > { %v2840_v41 = vadd.f32 %v2788_v16, %v7265_v40  ;;  %v2842_v32 = vadd.f32 %v2829_v39, %v7266_v51  ;;  %v4365_v16 = vpop.eup %4364 }
 0x48e   : > { %v2790_v31 = vpop.f32.mrf.mxu1  ;;  %v2831_v29 = vpop.f32.mrf.mxu0 }
 0x48f   : > { %v4114_v38 = vmul.f32 -1.442695, %v2840_v41  ;;  %4368 = vtanh.f32 %v2842_v32  ;;  %v2841_v13 = vadd.f32 %v2790_v31, %v7267_v59  ;;  %v2843_v22 = vadd.f32 %v2831_v29, %v7268_v60  ;;  %v4367_v37 = vpop.eup %4366 }
 0x490   : > { %4370 = vrcp.f32 %v2865_v17  ;;  %v2792_v45 = vpop.f32.mrf.mxu1  ;;  %v2833_v47 = vpop.f32.mrf.mxu0  ;;  %v2882_v41 = vmul.f32 %v4365_v16, %v6059_v20 }
 0x491   : > { %4372 = vpow2.f32 %v4114_v38  ;;  %v4115_v28 = vmul.f32 -1.442695, %v2841_v13 }
 0x492   : > { %4374 = vtanh.f32 %v2843_v22  ;;  %v2793_v26 = vpop.f32.mrf.mxu1  ;;  %v2834_v48 = vpop.f32.mrf.mxu0 }
 0x493   : > { %4376 = vpow2.f32 %v4115_v28 }
 0x49c   : > { %v4369_v39 = vpop.eup %4368 }
 0x49d   : > { %v4371_v40 = vpop.eup %4370  ;;  %v2884_v51 = vmul.f32 %v4369_v39, %v4363_v19  ;;  %v7271_v39 = vld [vmem:[#allocation89_spill] sm:$0xff] }
 0x49e   : > { %v4373_v32 = vpop.eup %4372  ;;  %v2883_v38 = vmul.f32 %v4371_v40, %v6062_v35  ;;  %v7269_v35 = vld [vmem:[#allocation87_spill] sm:$0xff]  ;;  %v7272_v40 = vld [vmem:[#allocation90_spill] sm:$0xff] }
 0x49f   : > { %v4375_v31 = vpop.eup %4374  ;;  %v2866_v29 = vadd.f32 1.0, %v4373_v32  ;;  %v6208_v17 = vadd.f32 %v2884_v51, %v2882_v41  ;;  %v7273_v41 = vld [vmem:[#allocation91_spill] sm:$0xff]  ;;  %v7274_v51 = vld [vmem:[#allocation92_spill] sm:$0xff]  ;;  %v7275_v32 = vld [vmem:[#allocation93_spill] sm:$0xff] }
 0x4a0   : > { %v4377_v59 = vpop.eup %4376  ;;  %v2885_v13 = vmul.f32 %v4375_v31, %v4367_v37  ;;  %v7270_v37 = vld [vmem:[#allocation88_spill] sm:$0xff]  ;;  %v7276_v31 = vld [vmem:[#allocation94_spill] sm:$0xff] }
 0x4a1   : > { %4378 = vrcp.f32 %v2866_v29  ;;  %v2867_v60 = vadd.f32 1.0, %v4377_v59  ;;  %v7277_v29 = vld [vmem:[#allocation95_spill] sm:$0xff]  ;;  %v7278_v59 = vld [vmem:[#allocation96_spill] sm:$0xff] }
 0x4a2   : > { %4380 = vtanh.f32 %v6208_v17  ;;  %v6212_v22 = vadd.f32 %v2885_v13, %v2883_v38  ;;  %v7279_v38 = vld [vmem:[#allocation97_spill] sm:$0xff]  ;;  %v7280_v13 = vld [vmem:[#allocation98_spill] sm:$0xff] }
 0x4a3   : > { %4382 = vrcp.f32 %v2867_v60  ;;  %v7281_v60 = vld [vmem:[#allocation99_spill] sm:$0xff] }
 0x4a4   : > { %4384 = vtanh.f32 %v6212_v22 }
 0x4ae   : > { %v4379_v20 = vpop.eup %4378 }
 0x4af   : > { %v4381_v45 = vpop.eup %4380 }
 0x4b0   : > { %v4383_v47 = vpop.eup %4382  ;;  %v2890_v26 = vmul.f32 %v4381_v45, %v4379_v20  ;;  %v7282_v20 = vld [vmem:[#allocation100_spill] sm:$0xff]  ;;  %v7283_v45 = vld [vmem:[#allocation101_spill] sm:$0xff] }
 0x4b1   : > { %v4385_v28 = vpop.eup %4384 }
 0x4b2   : > { %v2891_v48 = vmul.f32 %v4385_v28, %v4383_v47  ;;  %v6215_v16 = vpack.c.bf16 %v2890_v26, %v2890_v26  ;;  %v7284_v47 = vld [vmem:[#allocation102_spill] sm:$0xff]  ;;  %v7285_v28 = vld [vmem:[#allocation103_spill] sm:$0xff]  ;;  %v7286_v26 = vld [vmem:[#allocation104_spill] sm:$0xff] }
 0x4b4   : > { %v2893_v19 = vpack.c.bf16 %v2891_v48, %v2891_v48  ;;  %v7287_v48 = vld [vmem:[#allocation105_spill] sm:$0xff] }
 0x4b6   : > { %2926 = vmatprep.mubr.bf16.mxu1 %v2893_v19  ;;  %2967 = vmatprep.mubr.bf16.mxu0 %v2893_v19 }
 0x4b7   : > { %2927 = vmatmul.mubr.bf16.vlgmr.msra.gmra.mxu1 %v6215_v16  ;;  %2968 = vmatmul.mubr.bf16.vlgmr.msra.gmra.mxu0 %v6215_v16 }
 0x4b8   : > { %2977 = vmatpush1.bf16.msra.mxu1 %v7164_v4  ;;  %3018 = vmatpush1.bf16.msra.mxu0 %v7165_v11 }
 0x4b9   : > { %3008 = vmatprep.mubr.bf16.mxu1 %v2893_v19  ;;  %3049 = vmatprep.mubr.bf16.mxu0 %v2893_v19  ;;  %v7288_v19 = vld [vmem:[#allocation106_spill] sm:$0xff] }
 0x4ba   : > { %2978 = vmatprep.subr.bf16.mxu1 %v7166_v58  ;;  %3019 = vmatprep.subr.bf16.mxu0 %v7167_v30 }
 0x4bc   : > { %2979 = vmatpush1.bf16.msra.mxu1 %v7168_v0  ;;  %3020 = vmatpush1.bf16.msra.mxu0 %v7169_v15 }
 0x4bd   : > { %2980 = vmatprep.subr.bf16.mxu1 %v7170_v7  ;;  %3021 = vmatprep.subr.bf16.mxu0 %v7171_v36 }
 0x4c0   : > { %2981 = vmatpush1.bf16.msra.mxu1 %v7172_v3  ;;  %3022 = vmatpush1.bf16.msra.mxu0 %v7173_v61 }
 0x4c1   : > { %2982 = vmatprep.subr.bf16.mxu1 %v7174_v18  ;;  %3023 = vmatprep.subr.bf16.mxu0 %v7175_v8 }
 0x4c4   : > { %2983 = vmatpush1.bf16.msra.mxu1 %v7176_v10  ;;  %3024 = vmatpush1.bf16.msra.mxu0 %v7177_v57 }
 0x4c5   : > { %2984 = vmatprep.subr.bf16.mxu1 %v7178_v12  ;;  %3025 = vmatprep.subr.bf16.mxu0 %v7179_v6 }
 0x4c8   : > { %2985 = vmatpush1.bf16.msra.mxu1 %v7180_v55  ;;  %3026 = vmatpush1.bf16.msra.mxu0 %v7181_v1 }
 0x4c9   : > { %2986 = vmatprep.subr.bf16.mxu1 %v7182_v27  ;;  %3027 = vmatprep.subr.bf16.mxu0 %v7269_v35 }
 0x4cc   : > { %2987 = vmatpush1.bf16.msra.mxu1 %v7270_v37  ;;  %3028 = vmatpush1.bf16.msra.mxu0 %v7271_v39 }
 0x4cd   : > { %2988 = vmatprep.subr.bf16.mxu1 %v7272_v40  ;;  %3029 = vmatprep.subr.bf16.mxu0 %v7273_v41 }
 0x4d0   : > { %2989 = vmatpush1.bf16.msra.mxu1 %v7274_v51  ;;  %3030 = vmatpush1.bf16.msra.mxu0 %v7275_v32 }
 0x4d1   : > { %2990 = vmatprep.subr.bf16.mxu1 %v7276_v31  ;;  %3031 = vmatprep.subr.bf16.mxu0 %v7277_v29 }
 0x4d4   : > { %2991 = vmatpush1.bf16.msra.mxu1 %v7278_v59  ;;  %3032 = vmatpush1.bf16.msra.mxu0 %v7279_v38  ;;  %v7289_v59 = vld [vmem:[#allocation107_spill] sm:$0xff]  ;;  %v7290_v38 = vld [vmem:[#allocation108_spill] sm:$0xff] }
 0x4d5   : > { %2992 = vmatprep.subr.bf16.mxu1 %v7280_v13  ;;  %3033 = vmatprep.subr.bf16.mxu0 %v7281_v60  ;;  %v7291_v13 = vld [vmem:[#allocation109_spill] sm:$0xff] }
 0x4d8   : > { %2993 = vmatpush2.bf16.msra.mxu1 %v7282_v20  ;;  %3034 = vmatpush2.bf16.msra.mxu0 %v7283_v45 }
 0x4d9   : > { %2994 = vmatprep.subr.bf16.mxu1 %v7284_v47  ;;  %3035 = vmatprep.subr.bf16.mxu0 %v7285_v28 }
 0x4dc   : > { %2995 = vmatpush2.bf16.msra.mxu1 %v7286_v26  ;;  %3036 = vmatpush2.bf16.msra.mxu0 %v7287_v48 }
 0x4dd   : > { %2996 = vmatprep.subr.bf16.mxu1 %v7288_v19  ;;  %3037 = vmatprep.subr.bf16.mxu0 %v7289_v59 }
 0x4e0   : > { %2997 = vmatpush2.bf16.msra.mxu1 %v7290_v38  ;;  %3038 = vmatpush2.bf16.msra.mxu0 %v7291_v13 }
 0x4e1   : > { %2998 = vmatprep.subr.bf16.mxu1 %v7206_v2  ;;  %3039 = vmatprep.subr.bf16.mxu0 %v7207_v33 }
 0x4e4   : > { %2999 = vmatpush2.bf16.msra.mxu1 %v7208_v14  ;;  %3040 = vmatpush2.bf16.msra.mxu0 %v7209_v23 }
 0x4e5   : > { %3000 = vmatprep.subr.bf16.mxu1 %v7210_v62  ;;  %3041 = vmatprep.subr.bf16.mxu0 %v7211_v56 }
 0x4e8   : > { %3001 = vmatpush2.bf16.msra.mxu1 %v7212_v43  ;;  %3042 = vmatpush2.bf16.msra.mxu0 %v7213_v5  ;;  %v7357_v5 = vld [vmem:[#allocation135_spill] sm:$0xff]  ;;  %v7358_v43 = vld [vmem:[#allocation136_spill] sm:$0xff] }
 0x4e9   : > { %3002 = vmatprep.subr.bf16.mxu1 %v7214_v21  ;;  %3043 = vmatprep.subr.bf16.mxu0 %v7215_v42  ;;  %v7356_v21 = vld [vmem:[#allocation134_spill] sm:$0xff] }
 0x4ec   : > { %3003 = vmatpush2.bf16.msra.mxu1 %v7216_v34  ;;  %3044 = vmatpush2.bf16.msra.mxu0 %v5782_v52 }
 0x4ed   : > { %3004 = vmatprep.subr.bf16.mxu1 %v5786_v44  ;;  %3045 = vmatprep.subr.bf16.mxu0 %v5788_v50  ;;  %v7292_v50 = vld [vmem:[#allocation4_spill] sm:$0xff]  ;;  %v7301_v44 = vld [vmem:[#allocation13_spill] sm:$0xff] }
 0x4f0   : > { %3005 = vmatpush2.bf16.msra.mxu1 %v5804_v46  ;;  %3046 = vmatpush2.bf16.msra.mxu0 %v5806_v9  ;;  %v7293_v46 = vld [vmem:[#allocation5_spill] sm:$0xff]  ;;  %v7294_v9 = vld [vmem:[#allocation6_spill] sm:$0xff] }
 0x4f1   : > { %3006 = vmatprep.subr.bf16.mxu1 %v5810_v24  ;;  %3047 = vmatprep.subr.bf16.mxu0 %v5812_v25  ;;  %v7295_v24 = vld [vmem:[#allocation7_spill] sm:$0xff]  ;;  %v7296_v25 = vld [vmem:[#allocation8_spill] sm:$0xff] }
 0x4f4   : > { %3007 = vmatpush2.bf16.msra.mxu1 %v5816_v63  ;;  %3048 = vmatpush2.bf16.msra.mxu0 %v5818_v49  ;;  %v7297_v63 = vld [vmem:[#allocation9_spill] sm:$0xff]  ;;  %v7298_v49 = vld [vmem:[#allocation10_spill] sm:$0xff] }
 0x4f5   : > { %3116 = vmatprep.subr.bf16.mxu1 %v5020_v53  ;;  %3157 = vmatprep.subr.bf16.mxu0 %v5022_v54  ;;  %v7299_v53 = vld [vmem:[#allocation11_spill] sm:$0xff]  ;;  %v7300_v54 = vld [vmem:[#allocation12_spill] sm:$0xff] }
 0x4f7   : > { %3009 = vmatmul.mubr.bf16.vlgmr.msra.gmra.mxu1 %v6215_v16  ;;  %3050 = vmatmul.mubr.bf16.vlgmr.msra.gmra.mxu0 %v6215_v16  ;;  %v7302_v16 = vld [vmem:[#allocation14_spill] sm:$0xff] }
 0x4f8   : > { %3117 = vmatpush1.bf16.msra.mxu1 %v7292_v50  ;;  %3158 = vmatpush1.bf16.msra.mxu0 %v7293_v46  ;;  %v7303_v50 = vld [vmem:[#allocation15_spill] sm:$0xff]  ;;  %v7304_v46 = vld [vmem:[#allocation16_spill] sm:$0xff] }
 0x4f9   : > { %3118 = vmatprep.subr.bf16.mxu1 %v7294_v9  ;;  %3159 = vmatprep.subr.bf16.mxu0 %v7295_v24  ;;  %v7305_v9 = vld [vmem:[#allocation17_spill] sm:$0xff]  ;;  %v7306_v24 = vld [vmem:[#allocation18_spill] sm:$0xff] }
 0x4fc   : > { %3119 = vmatpush1.bf16.msra.mxu1 %v7296_v25  ;;  %3160 = vmatpush1.bf16.msra.mxu0 %v7297_v63  ;;  %v7307_v25 = vld [vmem:[#allocation19_spill] sm:$0xff]  ;;  %v7308_v63 = vld [vmem:[#allocation20_spill] sm:$0xff] }
 0x4fd   : > { %3120 = vmatprep.subr.bf16.mxu1 %v7298_v49  ;;  %3161 = vmatprep.subr.bf16.mxu0 %v7299_v53  ;;  %v7309_v49 = vld [vmem:[#allocation21_spill] sm:$0xff]  ;;  %v7310_v53 = vld [vmem:[#allocation22_spill] sm:$0xff] }
 0x500   : > { %3121 = vmatpush1.bf16.msra.mxu1 %v7300_v54  ;;  %3162 = vmatpush1.bf16.msra.mxu0 %v7301_v44  ;;  %v7311_v54 = vld [vmem:[#allocation23_spill] sm:$0xff]  ;;  %v7312_v44 = vld [vmem:[#allocation24_spill] sm:$0xff] }
 0x501   : > { %3122 = vmatprep.subr.bf16.mxu1 %v7302_v16  ;;  %3163 = vmatprep.subr.bf16.mxu0 %v7303_v50  ;;  %v7313_v16 = vld [vmem:[#allocation25_spill] sm:$0xff]  ;;  %v7314_v50 = vld [vmem:[#allocation26_spill] sm:$0xff] }
 0x504   : > { %3123 = vmatpush1.bf16.msra.mxu1 %v7304_v46  ;;  %3164 = vmatpush1.bf16.msra.mxu0 %v7305_v9  ;;  %v7315_v46 = vld [vmem:[#allocation27_spill] sm:$0xff]  ;;  %v7316_v9 = vld [vmem:[#allocation28_spill] sm:$0xff] }
 0x505   : > { %3124 = vmatprep.subr.bf16.mxu1 %v7306_v24  ;;  %3165 = vmatprep.subr.bf16.mxu0 %v7307_v25  ;;  %v7317_v24 = vld [vmem:[#allocation29_spill] sm:$0xff]  ;;  %v7318_v25 = vld [vmem:[#allocation30_spill] sm:$0xff] }
 0x508   : > { %3125 = vmatpush1.bf16.msra.mxu1 %v7308_v63  ;;  %3166 = vmatpush1.bf16.msra.mxu0 %v7309_v49  ;;  %v7319_v63 = vld [vmem:[#allocation31_spill] sm:$0xff]  ;;  %v7320_v49 = vld [vmem:[#allocation32_spill] sm:$0xff] }
 0x509   : > { %3126 = vmatprep.subr.bf16.mxu1 %v7310_v53  ;;  %3167 = vmatprep.subr.bf16.mxu0 %v7311_v54  ;;  %v7321_v53 = vld [vmem:[#allocation33_spill] sm:$0xff]  ;;  %v7322_v54 = vld [vmem:[#allocation34_spill] sm:$0xff] }
 0x50c   : > { %3127 = vmatpush1.bf16.msra.mxu1 %v7312_v44  ;;  %3168 = vmatpush1.bf16.msra.mxu0 %v7313_v16  ;;  %v7323_v44 = vld [vmem:[#allocation35_spill] sm:$0xff]  ;;  %v7324_v16 = vld [vmem:[#allocation36_spill] sm:$0xff] }
 0x50d   : > { %3128 = vmatprep.subr.bf16.mxu1 %v7314_v50  ;;  %3169 = vmatprep.subr.bf16.mxu0 %v7315_v46  ;;  %v7325_v50 = vld [vmem:[#allocation37_spill] sm:$0xff]  ;;  %v7326_v46 = vld [vmem:[#allocation38_spill] sm:$0xff] }
 0x510   : > { %3129 = vmatpush1.bf16.msra.mxu1 %v7316_v9  ;;  %3170 = vmatpush1.bf16.msra.mxu0 %v7317_v24  ;;  %v7327_v9 = vld [vmem:[#allocation39_spill] sm:$0xff]  ;;  %v7328_v24 = vld [vmem:[#allocation40_spill] sm:$0xff] }
 0x511   : > { %3130 = vmatprep.subr.bf16.mxu1 %v7318_v25  ;;  %3171 = vmatprep.subr.bf16.mxu0 %v7319_v63  ;;  %v7329_v25 = vld [vmem:[#allocation41_spill] sm:$0xff]  ;;  %v7330_v63 = vld [vmem:[#allocation42_spill] sm:$0xff] }
 0x514   : > { %3131 = vmatpush1.bf16.msra.mxu1 %v7320_v49  ;;  %3172 = vmatpush1.bf16.msra.mxu0 %v7321_v53  ;;  %v7331_v49 = vld [vmem:[#allocation43_spill] sm:$0xff]  ;;  %v7332_v53 = vld [vmem:[#allocation44_spill] sm:$0xff] }
 0x515   : > { %3132 = vmatprep.subr.bf16.mxu1 %v7322_v54  ;;  %3173 = vmatprep.subr.bf16.mxu0 %v7323_v44  ;;  %v7333_v54 = vld [vmem:[#allocation45_spill] sm:$0xff]  ;;  %v7334_v44 = vld [vmem:[#allocation46_spill] sm:$0xff] }
 0x518   : > { %3133 = vmatpush2.bf16.msra.mxu1 %v7324_v16  ;;  %3174 = vmatpush2.bf16.msra.mxu0 %v7325_v50  ;;  %v7335_v16 = vld [vmem:[#allocation47_spill] sm:$0xff]  ;;  %v7336_v50 = vld [vmem:[#allocation48_spill] sm:$0xff] }
 0x519   : > { %3134 = vmatprep.subr.bf16.mxu1 %v7326_v46  ;;  %3175 = vmatprep.subr.bf16.mxu0 %v7327_v9  ;;  %v7337_v46 = vld [vmem:[#allocation49_spill] sm:$0xff]  ;;  %v7338_v9 = vld [vmem:[#allocation50_spill] sm:$0xff] }
 0x51c   : > { %3135 = vmatpush2.bf16.msra.mxu1 %v7328_v24  ;;  %3176 = vmatpush2.bf16.msra.mxu0 %v7329_v25  ;;  %v7339_v24 = vld [vmem:[#allocation51_spill] sm:$0xff]  ;;  %v7340_v25 = vld [vmem:[#allocation52_spill] sm:$0xff] }
 0x51d   : > { %3136 = vmatprep.subr.bf16.mxu1 %v7330_v63  ;;  %3177 = vmatprep.subr.bf16.mxu0 %v7331_v49  ;;  %v7341_v63 = vld [vmem:[#allocation53_spill] sm:$0xff]  ;;  %v7342_v49 = vld [vmem:[#allocation54_spill] sm:$0xff] }
 0x520   : > { %3137 = vmatpush2.bf16.msra.mxu1 %v7332_v53  ;;  %3178 = vmatpush2.bf16.msra.mxu0 %v7333_v54  ;;  %v7343_v53 = vld [vmem:[#allocation55_spill] sm:$0xff]  ;;  %v7344_v54 = vld [vmem:[#allocation56_spill] sm:$0xff] }
 0x521   : > { %3138 = vmatprep.subr.bf16.mxu1 %v7334_v44  ;;  %3179 = vmatprep.subr.bf16.mxu0 %v7335_v16  ;;  %v7345_v44 = vld [vmem:[#allocation57_spill] sm:$0xff]  ;;  %v7346_v16 = vld [vmem:[#allocation58_spill] sm:$0xff] }
 0x524   : > { %3139 = vmatpush2.bf16.msra.mxu1 %v7336_v50  ;;  %3180 = vmatpush2.bf16.msra.mxu0 %v7337_v46  ;;  %v7347_v50 = vld [vmem:[#allocation59_spill] sm:$0xff]  ;;  %v7348_v46 = vld [vmem:[#allocation60_spill] sm:$0xff] }
 0x525   : > { %3140 = vmatprep.subr.bf16.mxu1 %v7338_v9  ;;  %3181 = vmatprep.subr.bf16.mxu0 %v7339_v24  ;;  %v7349_v9 = vld [vmem:[#allocation61_spill] sm:$0xff]  ;;  %v7350_v24 = vld [vmem:[#allocation62_spill] sm:$0xff] }
 0x528   : > { %3141 = vmatpush2.bf16.msra.mxu1 %v7340_v25  ;;  %3182 = vmatpush2.bf16.msra.mxu0 %v7341_v63  ;;  %v7351_v25 = vld [vmem:[#allocation63_spill] sm:$0xff]  ;;  %v7352_v63 = vld [vmem:[#allocation64_spill] sm:$0xff] }
 0x529   : > { %3142 = vmatprep.subr.bf16.mxu1 %v7342_v49  ;;  %3183 = vmatprep.subr.bf16.mxu0 %v7343_v53  ;;  %v7353_v49 = vld [vmem:[#allocation65_spill] sm:$0xff]  ;;  %v7354_v53 = vld [vmem:[#allocation66_spill] sm:$0xff] }
 0x52c   : > { %3143 = vmatpush2.bf16.msra.mxu1 %v7344_v54  ;;  %3184 = vmatpush2.bf16.msra.mxu0 %v7345_v44  ;;  %v7355_v54 = vld [vmem:[#allocation67_spill] sm:$0xff] }
 0x52d   : > { %3144 = vmatprep.subr.bf16.mxu1 %v7346_v16  ;;  %3185 = vmatprep.subr.bf16.mxu0 %v7347_v50 }
 0x530   : > { %3145 = vmatpush2.bf16.msra.mxu1 %v7348_v46  ;;  %3186 = vmatpush2.bf16.msra.mxu0 %v7349_v9 }
 0x531   : > { %3146 = vmatprep.subr.bf16.mxu1 %v7350_v24  ;;  %3187 = vmatprep.subr.bf16.mxu0 %v7351_v25 }
 0x534   : > { %3147 = vmatpush2.bf16.msra.mxu1 %v7352_v63  ;;  %3188 = vmatpush2.bf16.msra.mxu0 %v7353_v49  ;;  %v7359_v49 = vld [vmem:[#allocation137_spill] sm:$0xff] }
 0x535   : > { %3198 = vmatprep.subr.bf16.mxu1 %v7354_v53  ;;  %3239 = vmatprep.subr.bf16.mxu0 %v7355_v54 }
 0x577   : > { %v2928_v44 = vpop.f32.mrf.mxu1  ;;  %v2969_v16 = vpop.f32.mrf.mxu0 }
 0x578   : > { %v3058_v24 = vadd.f32 %v2928_v44, %v7356_v21  ;;  %v3060_v25 = vadd.f32 %v2969_v16, %v7357_v5 }
 0x579   : > { %v2930_v52 = vpop.f32.mrf.mxu1  ;;  %v2971_v50 = vpop.f32.mrf.mxu0 }
 0x57a   : > { %v3059_v63 = vadd.f32 %v2930_v52, %v7358_v43  ;;  %v4116_v56 = vmul.f32 -1.442695, %v3058_v24  ;;  %v3061_v62 = vadd.f32 %v2971_v50, %v7359_v49  ;;  %v4118_v53 = vmul.f32 -1.442695, %v3060_v25  ;;  %v7360_v50 = vld [vmem:[#allocation150_spill] sm:$0xff]  ;;  %v7363_v43 = vld [vmem:[#allocation153_spill] sm:$0xff] }
 0x57b   : > { %v2932_v34 = vpop.f32.mrf.mxu1  ;;  %v2973_v46 = vpop.f32.mrf.mxu0 }
 0x57c   : > { %v4117_v23 = vmul.f32 -1.442695, %v3059_v63  ;;  %4386 = vpow2.f32 %v4116_v56  ;;  %v4119_v54 = vmul.f32 -1.442695, %v3061_v62  ;;  %v7361_v63 = vld [vmem:[#allocation151_spill] sm:$0xff]  ;;  %v7362_v62 = vld [vmem:[#allocation152_spill] sm:$0xff] }
 0x57d   : > { %v2933_v42 = vpop.f32.mrf.mxu1  ;;  %v2974_v9 = vpop.f32.mrf.mxu0  ;;  %4388 = vpow2.f32 %v4118_v53 }
 0x57e   : > { %4390 = vpow2.f32 %v4117_v23 }
 0x57f   : > { %4392 = vpow2.f32 %v4119_v54 }
 0x589   : > { %v4387_v34 = vpop.eup %4386 }
 0x58a   : > { %v4389_v46 = vpop.eup %4388  ;;  %v3084_v9 = vadd.f32 1.0, %v4387_v34 }
 0x58b   : > { %v4391_v42 = vpop.eup %4390  ;;  %v3086_v44 = vadd.f32 1.0, %v4389_v46 }
 0x58c   : > { %v4393_v14 = vpop.eup %4392  ;;  %v3085_v21 = vadd.f32 1.0, %v4391_v42  ;;  %4394 = vrcp.f32 %v3084_v9 }
 0x58d   : > { %v3087_v5 = vadd.f32 1.0, %v4393_v14  ;;  %4396 = vrcp.f32 %v3086_v44 }
 0x58e   : > { %4398 = vrcp.f32 %v3085_v21 }
 0x599   : > { %v4395_v44 = vpop.eup %4394 }
 0x5b7   : > { %v3010_v52 = vpop.f32.mrf.mxu1  ;;  %v3051_v24 = vpop.f32.mrf.mxu0 }
 0x5b8   : > { %v3062_v25 = vadd.f32 %v3010_v52, %v7360_v50  ;;  %v3064_v49 = vadd.f32 %v3051_v24, %v7361_v63  ;;  %v4397_v52 = vpop.eup %4396 }
 0x5b9   : > { %v3012_v53 = vpop.f32.mrf.mxu1  ;;  %v3053_v23 = vpop.f32.mrf.mxu0 }
 0x5ba   : > { %v4120_v54 = vmul.f32 -1.442695, %v3062_v25  ;;  %4400 = vtanh.f32 %v3064_v49  ;;  %v3063_v56 = vadd.f32 %v3012_v53, %v7362_v62  ;;  %v3065_v16 = vadd.f32 %v3053_v23, %v7363_v43  ;;  %v4399_v21 = vpop.eup %4398 }
 0x5bb   : > { %4402 = vrcp.f32 %v3087_v5  ;;  %v3014_v34 = vpop.f32.mrf.mxu1  ;;  %v3055_v46 = vpop.f32.mrf.mxu0  ;;  %v3104_v25 = vmul.f32 %v4397_v52, %v6208_v17 }
 0x5bc   : > { %4404 = vpow2.f32 %v4120_v54  ;;  %v4121_v14 = vmul.f32 -1.442695, %v3063_v56 }
 0x5bd   : > { %4406 = vtanh.f32 %v3065_v16  ;;  %v3015_v42 = vpop.f32.mrf.mxu1  ;;  %v3056_v9 = vpop.f32.mrf.mxu0 }
 0x5be   : > { %4408 = vpow2.f32 %v4121_v14 }
 0x5c7   : > { %v4401_v24 = vpop.eup %4400 }
 0x5c8   : > { %v4403_v50 = vpop.eup %4402  ;;  %v3106_v63 = vmul.f32 %v4401_v24, %v4395_v44  ;;  %v7366_v24 = vld [vmem:[#allocation98_spill] sm:$0xff] }
 0x5c9   : > { %v4405_v49 = vpop.eup %4404  ;;  %v3105_v54 = vmul.f32 %v4403_v50, %v6212_v22  ;;  %v7364_v22 = vld [vmem:[#allocation96_spill] sm:$0xff] }
 0x5ca   : > { %v4407_v53 = vpop.eup %4406  ;;  %v3088_v23 = vadd.f32 1.0, %v4405_v49  ;;  %v6358_v5 = vadd.f32 %v3106_v63, %v3104_v25  ;;  %v7367_v50 = vld [vmem:[#allocation112_spill] sm:$0xff]  ;;  %v7368_v25 = vld [vmem:[#allocation113_spill] sm:$0xff]  ;;  %v7369_v63 = vld [vmem:[#allocation114_spill] sm:$0xff] }
 0x5cb   : > { %v4409_v62 = vpop.eup %4408  ;;  %v3107_v56 = vmul.f32 %v4407_v53, %v4399_v21  ;;  %v7365_v21 = vld [vmem:[#allocation97_spill] sm:$0xff]  ;;  %v7370_v49 = vld [vmem:[#allocation115_spill] sm:$0xff]  ;;  %v7371_v53 = vld [vmem:[#allocation116_spill] sm:$0xff] }
 0x5cc   : > { %4410 = vrcp.f32 %v3088_v23  ;;  %v3089_v43 = vadd.f32 1.0, %v4409_v62  ;;  %v7372_v23 = vld [vmem:[#allocation117_spill] sm:$0xff]  ;;  %v7373_v62 = vld [vmem:[#allocation118_spill] sm:$0xff] }
 0x5cd   : > { %4412 = vtanh.f32 %v6358_v5  ;;  %v6362_v16 = vadd.f32 %v3107_v56, %v3105_v54  ;;  %v7374_v54 = vld [vmem:[#allocation119_spill] sm:$0xff]  ;;  %v7375_v56 = vld [vmem:[#allocation120_spill] sm:$0xff] }
 0x5ce   : > { %4414 = vrcp.f32 %v3089_v43  ;;  %v7376_v43 = vld [vmem:[#allocation121_spill] sm:$0xff] }
 0x5cf   : > { %4416 = vtanh.f32 %v6362_v16 }
 0x5d9   : > { %v4411_v17 = vpop.eup %4410 }
 0x5da   : > { %v4413_v34 = vpop.eup %4412 }
 0x5db   : > { %v4415_v46 = vpop.eup %4414  ;;  %v3112_v42 = vmul.f32 %v4413_v34, %v4411_v17  ;;  %v7377_v17 = vld [vmem:[#allocation122_spill] sm:$0xff]  ;;  %v7378_v34 = vld [vmem:[#allocation123_spill] sm:$0xff] }
 0x5dc   : > { %v4417_v14 = vpop.eup %4416 }
 0x5dd   : > { %v3113_v9 = vmul.f32 %v4417_v14, %v4415_v46  ;;  %v6365_v52 = vpack.c.bf16 %v3112_v42, %v3112_v42  ;;  %v7379_v46 = vld [vmem:[#allocation124_spill] sm:$0xff]  ;;  %v7380_v14 = vld [vmem:[#allocation125_spill] sm:$0xff]  ;;  %v7381_v42 = vld [vmem:[#allocation126_spill] sm:$0xff] }
 0x5df   : > { %v3115_v44 = vpack.c.bf16 %v3113_v9, %v3113_v9  ;;  %v7382_v9 = vld [vmem:[#allocation127_spill] sm:$0xff] }
 0x5e1   : > { %3148 = vmatprep.mubr.bf16.mxu1 %v3115_v44  ;;  %3189 = vmatprep.mubr.bf16.mxu0 %v3115_v44 }
 0x5e2   : > { %3149 = vmatmul.mubr.bf16.vlgmr.msra.gmra.mxu1 %v6365_v52  ;;  %3190 = vmatmul.mubr.bf16.vlgmr.msra.gmra.mxu0 %v6365_v52 }
 0x5e3   : > { %3199 = vmatpush1.bf16.msra.mxu1 %v7164_v4  ;;  %3240 = vmatpush1.bf16.msra.mxu0 %v7165_v11 }
 0x5e4   : > { %3230 = vmatprep.mubr.bf16.mxu1 %v3115_v44  ;;  %3271 = vmatprep.mubr.bf16.mxu0 %v3115_v44  ;;  %v7383_v44 = vld [vmem:[#allocation128_spill] sm:$0xff] }
 0x5e5   : > { %3200 = vmatprep.subr.bf16.mxu1 %v7166_v58  ;;  %3241 = vmatprep.subr.bf16.mxu0 %v7167_v30 }
 0x5e7   : > { %3201 = vmatpush1.bf16.msra.mxu1 %v7168_v0  ;;  %3242 = vmatpush1.bf16.msra.mxu0 %v7169_v15 }
 0x5e8   : > { %3202 = vmatprep.subr.bf16.mxu1 %v7170_v7  ;;  %3243 = vmatprep.subr.bf16.mxu0 %v7171_v36 }
 0x5eb   : > { %3203 = vmatpush1.bf16.msra.mxu1 %v7172_v3  ;;  %3244 = vmatpush1.bf16.msra.mxu0 %v7173_v61 }
 0x5ec   : > { %3204 = vmatprep.subr.bf16.mxu1 %v7174_v18  ;;  %3245 = vmatprep.subr.bf16.mxu0 %v7175_v8 }
 0x5ef   : > { %3205 = vmatpush1.bf16.msra.mxu1 %v7176_v10  ;;  %3246 = vmatpush1.bf16.msra.mxu0 %v7177_v57 }
 0x5f0   : > { %3206 = vmatprep.subr.bf16.mxu1 %v7178_v12  ;;  %3247 = vmatprep.subr.bf16.mxu0 %v7179_v6 }
 0x5f3   : > { %3207 = vmatpush1.bf16.msra.mxu1 %v7180_v55  ;;  %3248 = vmatpush1.bf16.msra.mxu0 %v7181_v1 }
 0x5f4   : > { %3208 = vmatprep.subr.bf16.mxu1 %v7182_v27  ;;  %3249 = vmatprep.subr.bf16.mxu0 %v7269_v35 }
 0x5f7   : > { %3209 = vmatpush1.bf16.msra.mxu1 %v7270_v37  ;;  %3250 = vmatpush1.bf16.msra.mxu0 %v7271_v39 }
 0x5f8   : > { %3210 = vmatprep.subr.bf16.mxu1 %v7272_v40  ;;  %3251 = vmatprep.subr.bf16.mxu0 %v7273_v41 }
 0x5fb   : > { %3211 = vmatpush1.bf16.msra.mxu1 %v7274_v51  ;;  %3252 = vmatpush1.bf16.msra.mxu0 %v7275_v32 }
 0x5fc   : > { %3212 = vmatprep.subr.bf16.mxu1 %v7276_v31  ;;  %3253 = vmatprep.subr.bf16.mxu0 %v7277_v29 }
 0x5ff   : > { %3213 = vmatpush1.bf16.msra.mxu1 %v7364_v22  ;;  %3254 = vmatpush1.bf16.msra.mxu0 %v7365_v21 }
 0x600   : > { %3214 = vmatprep.subr.bf16.mxu1 %v7366_v24  ;;  %3255 = vmatprep.subr.bf16.mxu0 %v7281_v60 }
 0x603   : > { %3215 = vmatpush2.bf16.msra.mxu1 %v7282_v20  ;;  %3256 = vmatpush2.bf16.msra.mxu0 %v7283_v45 }
 0x604   : > { %3216 = vmatprep.subr.bf16.mxu1 %v7284_v47  ;;  %3257 = vmatprep.subr.bf16.mxu0 %v7285_v28 }
 0x607   : > { %3217 = vmatpush2.bf16.msra.mxu1 %v7286_v26  ;;  %3258 = vmatpush2.bf16.msra.mxu0 %v7287_v48 }
 0x608   : > { %3218 = vmatprep.subr.bf16.mxu1 %v7288_v19  ;;  %3259 = vmatprep.subr.bf16.mxu0 %v7289_v59 }
 0x60b   : > { %3219 = vmatpush2.bf16.msra.mxu1 %v7290_v38  ;;  %3260 = vmatpush2.bf16.msra.mxu0 %v7291_v13 }
 0x60c   : > { %3220 = vmatprep.subr.bf16.mxu1 %v7206_v2  ;;  %3261 = vmatprep.subr.bf16.mxu0 %v7207_v33 }
 0x60f   : > { %3221 = vmatpush2.bf16.msra.mxu1 %v7367_v50  ;;  %3262 = vmatpush2.bf16.msra.mxu0 %v7368_v25  ;;  %v7453_v25 = vld [vmem:[#allocation140_spill] sm:$0xff] }
 0x610   : > { %3222 = vmatprep.subr.bf16.mxu1 %v7369_v63  ;;  %3263 = vmatprep.subr.bf16.mxu0 %v7370_v49  ;;  %v7451_v49 = vld [vmem:[#allocation138_spill] sm:$0xff]  ;;  %v7452_v63 = vld [vmem:[#allocation139_spill] sm:$0xff] }
 0x613   : > { %3223 = vmatpush2.bf16.msra.mxu1 %v7371_v53  ;;  %3264 = vmatpush2.bf16.msra.mxu0 %v7372_v23 }
 0x614   : > { %3224 = vmatprep.subr.bf16.mxu1 %v7373_v62  ;;  %3265 = vmatprep.subr.bf16.mxu0 %v7374_v54  ;;  %v7384_v62 = vld [vmem:[#allocation129_spill] sm:$0xff]  ;;  %v7385_v54 = vld [vmem:[#allocation2_spill] sm:$0xff] }
 0x617   : > { %3225 = vmatpush2.bf16.msra.mxu1 %v7375_v56  ;;  %3266 = vmatpush2.bf16.msra.mxu0 %v7376_v43  ;;  %v7386_v56 = vld [vmem:[#allocation3_spill] sm:$0xff] }
 0x618   : > { %3226 = vmatprep.subr.bf16.mxu1 %v7377_v17  ;;  %3267 = vmatprep.subr.bf16.mxu0 %v7378_v34  ;;  %v7387_v34 = vld [vmem:[#allocation4_spill] sm:$0xff]  ;;  %v7396_v17 = vld [vmem:[#allocation13_spill] sm:$0xff] }
 0x61b   : > { %3227 = vmatpush2.bf16.msra.mxu1 %v7379_v46  ;;  %3268 = vmatpush2.bf16.msra.mxu0 %v7380_v14  ;;  %v7388_v46 = vld [vmem:[#allocation5_spill] sm:$0xff]  ;;  %v7389_v14 = vld [vmem:[#allocation6_spill] sm:$0xff] }
 0x61c   : > { %3228 = vmatprep.subr.bf16.mxu1 %v7381_v42  ;;  %3269 = vmatprep.subr.bf16.mxu0 %v7382_v9  ;;  %v7390_v42 = vld [vmem:[#allocation7_spill] sm:$0xff]  ;;  %v7391_v9 = vld [vmem:[#allocation8_spill] sm:$0xff] }
 0x61f   : > { %3229 = vmatpush2.bf16.msra.mxu1 %v7383_v44  ;;  %3270 = vmatpush2.bf16.msra.mxu0 %v7384_v62  ;;  %v7392_v44 = vld [vmem:[#allocation9_spill] sm:$0xff]  ;;  %v7393_v62 = vld [vmem:[#allocation10_spill] sm:$0xff] }
 0x620   : > { %3338 = vmatprep.subr.bf16.mxu1 %v7385_v54  ;;  %3379 = vmatprep.subr.bf16.mxu0 %v7386_v56  ;;  %v7394_v54 = vld [vmem:[#allocation11_spill] sm:$0xff]  ;;  %v7395_v56 = vld [vmem:[#allocation12_spill] sm:$0xff] }
 0x622   : > { %3231 = vmatmul.mubr.bf16.vlgmr.msra.gmra.mxu1 %v6365_v52  ;;  %3272 = vmatmul.mubr.bf16.vlgmr.msra.gmra.mxu0 %v6365_v52  ;;  %v7397_v52 = vld [vmem:[#allocation14_spill] sm:$0xff] }
 0x623   : > { %3339 = vmatpush1.bf16.msra.mxu1 %v7387_v34  ;;  %3380 = vmatpush1.bf16.msra.mxu0 %v7388_v46  ;;  %v7398_v34 = vld [vmem:[#allocation15_spill] sm:$0xff]  ;;  %v7399_v46 = vld [vmem:[#allocation16_spill] sm:$0xff] }
 0x624   : > { %3340 = vmatprep.subr.bf16.mxu1 %v7389_v14  ;;  %3381 = vmatprep.subr.bf16.mxu0 %v7390_v42  ;;  %v7400_v14 = vld [vmem:[#allocation17_spill] sm:$0xff]  ;;  %v7401_v42 = vld [vmem:[#allocation18_spill] sm:$0xff] }
 0x627   : > { %3341 = vmatpush1.bf16.msra.mxu1 %v7391_v9  ;;  %3382 = vmatpush1.bf16.msra.mxu0 %v7392_v44  ;;  %v7402_v9 = vld [vmem:[#allocation19_spill] sm:$0xff]  ;;  %v7403_v44 = vld [vmem:[#allocation20_spill] sm:$0xff] }
 0x628   : > { %3342 = vmatprep.subr.bf16.mxu1 %v7393_v62  ;;  %3383 = vmatprep.subr.bf16.mxu0 %v7394_v54  ;;  %v7404_v62 = vld [vmem:[#allocation21_spill] sm:$0xff]  ;;  %v7405_v54 = vld [vmem:[#allocation22_spill] sm:$0xff] }
 0x62b   : > { %3343 = vmatpush1.bf16.msra.mxu1 %v7395_v56  ;;  %3384 = vmatpush1.bf16.msra.mxu0 %v7396_v17  ;;  %v7406_v56 = vld [vmem:[#allocation23_spill] sm:$0xff]  ;;  %v7407_v17 = vld [vmem:[#allocation24_spill] sm:$0xff] }
 0x62c   : > { %3344 = vmatprep.subr.bf16.mxu1 %v7397_v52  ;;  %3385 = vmatprep.subr.bf16.mxu0 %v7398_v34  ;;  %v7408_v52 = vld [vmem:[#allocation25_spill] sm:$0xff]  ;;  %v7409_v34 = vld [vmem:[#allocation26_spill] sm:$0xff] }
 0x62f   : > { %3345 = vmatpush1.bf16.msra.mxu1 %v7399_v46  ;;  %3386 = vmatpush1.bf16.msra.mxu0 %v7400_v14  ;;  %v7410_v46 = vld [vmem:[#allocation27_spill] sm:$0xff]  ;;  %v7411_v14 = vld [vmem:[#allocation28_spill] sm:$0xff] }
 0x630   : > { %3346 = vmatprep.subr.bf16.mxu1 %v7401_v42  ;;  %3387 = vmatprep.subr.bf16.mxu0 %v7402_v9  ;;  %v7412_v42 = vld [vmem:[#allocation29_spill] sm:$0xff]  ;;  %v7413_v9 = vld [vmem:[#allocation30_spill] sm:$0xff] }
 0x633   : > { %3347 = vmatpush1.bf16.msra.mxu1 %v7403_v44  ;;  %3388 = vmatpush1.bf16.msra.mxu0 %v7404_v62  ;;  %v7414_v44 = vld [vmem:[#allocation31_spill] sm:$0xff]  ;;  %v7415_v62 = vld [vmem:[#allocation32_spill] sm:$0xff] }
 0x634   : > { %3348 = vmatprep.subr.bf16.mxu1 %v7405_v54  ;;  %3389 = vmatprep.subr.bf16.mxu0 %v7406_v56  ;;  %v7416_v54 = vld [vmem:[#allocation33_spill] sm:$0xff]  ;;  %v7417_v56 = vld [vmem:[#allocation34_spill] sm:$0xff] }
 0x637   : > { %3349 = vmatpush1.bf16.msra.mxu1 %v7407_v17  ;;  %3390 = vmatpush1.bf16.msra.mxu0 %v7408_v52  ;;  %v7418_v17 = vld [vmem:[#allocation35_spill] sm:$0xff]  ;;  %v7419_v52 = vld [vmem:[#allocation36_spill] sm:$0xff] }
 0x638   : > { %3350 = vmatprep.subr.bf16.mxu1 %v7409_v34  ;;  %3391 = vmatprep.subr.bf16.mxu0 %v7410_v46  ;;  %v7420_v34 = vld [vmem:[#allocation37_spill] sm:$0xff]  ;;  %v7421_v46 = vld [vmem:[#allocation38_spill] sm:$0xff] }
 0x63b   : > { %3351 = vmatpush1.bf16.msra.mxu1 %v7411_v14  ;;  %3392 = vmatpush1.bf16.msra.mxu0 %v7412_v42  ;;  %v7422_v14 = vld [vmem:[#allocation39_spill] sm:$0xff]  ;;  %v7423_v42 = vld [vmem:[#allocation40_spill] sm:$0xff] }
 0x63c   : > { %3352 = vmatprep.subr.bf16.mxu1 %v7413_v9  ;;  %3393 = vmatprep.subr.bf16.mxu0 %v7414_v44  ;;  %v7424_v9 = vld [vmem:[#allocation41_spill] sm:$0xff]  ;;  %v7425_v44 = vld [vmem:[#allocation42_spill] sm:$0xff] }
 0x63f   : > { %3353 = vmatpush1.bf16.msra.mxu1 %v7415_v62  ;;  %3394 = vmatpush1.bf16.msra.mxu0 %v7416_v54  ;;  %v7426_v62 = vld [vmem:[#allocation43_spill] sm:$0xff]  ;;  %v7427_v54 = vld [vmem:[#allocation44_spill] sm:$0xff] }
 0x640   : > { %3354 = vmatprep.subr.bf16.mxu1 %v7417_v56  ;;  %3395 = vmatprep.subr.bf16.mxu0 %v7418_v17  ;;  %v7428_v56 = vld [vmem:[#allocation45_spill] sm:$0xff]  ;;  %v7429_v17 = vld [vmem:[#allocation46_spill] sm:$0xff] }
 0x643   : > { %3355 = vmatpush2.bf16.msra.mxu1 %v7419_v52  ;;  %3396 = vmatpush2.bf16.msra.mxu0 %v7420_v34  ;;  %v7430_v52 = vld [vmem:[#allocation47_spill] sm:$0xff]  ;;  %v7431_v34 = vld [vmem:[#allocation48_spill] sm:$0xff] }
 0x644   : > { %3356 = vmatprep.subr.bf16.mxu1 %v7421_v46  ;;  %3397 = vmatprep.subr.bf16.mxu0 %v7422_v14  ;;  %v7432_v46 = vld [vmem:[#allocation49_spill] sm:$0xff]  ;;  %v7433_v14 = vld [vmem:[#allocation50_spill] sm:$0xff] }
 0x647   : > { %3357 = vmatpush2.bf16.msra.mxu1 %v7423_v42  ;;  %3398 = vmatpush2.bf16.msra.mxu0 %v7424_v9  ;;  %v7434_v42 = vld [vmem:[#allocation51_spill] sm:$0xff]  ;;  %v7435_v9 = vld [vmem:[#allocation52_spill] sm:$0xff] }
 0x648   : > { %3358 = vmatprep.subr.bf16.mxu1 %v7425_v44  ;;  %3399 = vmatprep.subr.bf16.mxu0 %v7426_v62  ;;  %v7436_v44 = vld [vmem:[#allocation53_spill] sm:$0xff]  ;;  %v7437_v62 = vld [vmem:[#allocation54_spill] sm:$0xff] }
 0x64b   : > { %3359 = vmatpush2.bf16.msra.mxu1 %v7427_v54  ;;  %3400 = vmatpush2.bf16.msra.mxu0 %v7428_v56  ;;  %v7438_v54 = vld [vmem:[#allocation55_spill] sm:$0xff]  ;;  %v7439_v56 = vld [vmem:[#allocation56_spill] sm:$0xff] }
 0x64c   : > { %3360 = vmatprep.subr.bf16.mxu1 %v7429_v17  ;;  %3401 = vmatprep.subr.bf16.mxu0 %v7430_v52  ;;  %v7440_v17 = vld [vmem:[#allocation57_spill] sm:$0xff]  ;;  %v7441_v52 = vld [vmem:[#allocation58_spill] sm:$0xff] }
 0x64f   : > { %3361 = vmatpush2.bf16.msra.mxu1 %v7431_v34  ;;  %3402 = vmatpush2.bf16.msra.mxu0 %v7432_v46  ;;  %v7442_v34 = vld [vmem:[#allocation59_spill] sm:$0xff]  ;;  %v7443_v46 = vld [vmem:[#allocation60_spill] sm:$0xff] }
 0x650   : > { %3362 = vmatprep.subr.bf16.mxu1 %v7433_v14  ;;  %3403 = vmatprep.subr.bf16.mxu0 %v7434_v42  ;;  %v7444_v14 = vld [vmem:[#allocation61_spill] sm:$0xff]  ;;  %v7445_v42 = vld [vmem:[#allocation62_spill] sm:$0xff] }
 0x653   : > { %3363 = vmatpush2.bf16.msra.mxu1 %v7435_v9  ;;  %3404 = vmatpush2.bf16.msra.mxu0 %v7436_v44  ;;  %v7446_v9 = vld [vmem:[#allocation63_spill] sm:$0xff]  ;;  %v7447_v44 = vld [vmem:[#allocation64_spill] sm:$0xff] }
 0x654   : > { %3364 = vmatprep.subr.bf16.mxu1 %v7437_v62  ;;  %3405 = vmatprep.subr.bf16.mxu0 %v7438_v54  ;;  %v7448_v62 = vld [vmem:[#allocation65_spill] sm:$0xff]  ;;  %v7449_v54 = vld [vmem:[#allocation66_spill] sm:$0xff] }
 0x657   : > { %3365 = vmatpush2.bf16.msra.mxu1 %v7439_v56  ;;  %3406 = vmatpush2.bf16.msra.mxu0 %v7440_v17  ;;  %v7450_v56 = vld [vmem:[#allocation67_spill] sm:$0xff] }
 0x658   : > { %3366 = vmatprep.subr.bf16.mxu1 %v7441_v52  ;;  %3407 = vmatprep.subr.bf16.mxu0 %v7442_v34 }
 0x65b   : > { %3367 = vmatpush2.bf16.msra.mxu1 %v7443_v46  ;;  %3408 = vmatpush2.bf16.msra.mxu0 %v7444_v14 }
 0x65c   : > { %3368 = vmatprep.subr.bf16.mxu1 %v7445_v42  ;;  %3409 = vmatprep.subr.bf16.mxu0 %v7446_v9 }
 0x65f   : > { %3369 = vmatpush2.bf16.msra.mxu1 %v7447_v44  ;;  %3410 = vmatpush2.bf16.msra.mxu0 %v7448_v62  ;;  %v7454_v62 = vld [vmem:[#allocation141_spill] sm:$0xff] }
 0x660   : > { %3420 = vmatprep.subr.bf16.mxu1 %v7449_v54  ;;  %3461 = vmatprep.subr.bf16.mxu0 %v7450_v56 }
 0x6a2   : > { %v3150_v17 = vpop.f32.mrf.mxu1  ;;  %v3191_v52 = vpop.f32.mrf.mxu0 }
 0x6a3   : > { %v3280_v42 = vadd.f32 %v3150_v17, %v7451_v49  ;;  %v3282_v9 = vadd.f32 %v3191_v52, %v7452_v63  ;;  %v7455_v52 = vld [vmem:[#allocation154_spill] sm:$0xff] }
 0x6a4   : > { %v3152_v43 = vpop.f32.mrf.mxu1  ;;  %v3193_v34 = vpop.f32.mrf.mxu0 }
 0x6a5   : > { %v3281_v44 = vadd.f32 %v3152_v43, %v7453_v25  ;;  %v4122_v50 = vmul.f32 -1.442695, %v3280_v42  ;;  %v3283_v33 = vadd.f32 %v3193_v34, %v7454_v62  ;;  %v4124_v54 = vmul.f32 -1.442695, %v3282_v9  ;;  %v7456_v42 = vld [vmem:[#allocation155_spill] sm:$0xff] }
 0x6a6   : > { %v3154_v23 = vpop.f32.mrf.mxu1  ;;  %v3195_v46 = vpop.f32.mrf.mxu0 }
 0x6a7   : > { %v4123_v2 = vmul.f32 -1.442695, %v3281_v44  ;;  %4418 = vpow2.f32 %v4122_v50  ;;  %v4125_v56 = vmul.f32 -1.442695, %v3283_v33  ;;  %v7457_v44 = vld [vmem:[#allocation156_spill] sm:$0xff] }
 0x6a8   : > { %v3155_v53 = vpop.f32.mrf.mxu1  ;;  %v3196_v14 = vpop.f32.mrf.mxu0  ;;  %4420 = vpow2.f32 %v4124_v54  ;;  %v7458_v54 = vld [vmem:[#allocation157_spill] sm:$0xff] }
 0x6a9   : > { %4422 = vpow2.f32 %v4123_v2 }
 0x6aa   : > { %4424 = vpow2.f32 %v4125_v56 }
 0x6b4   : > { %v4419_v23 = vpop.eup %4418 }
 0x6b5   : > { %v4421_v46 = vpop.eup %4420  ;;  %v3306_v14 = vadd.f32 1.0, %v4419_v23 }
 0x6b6   : > { %v4423_v53 = vpop.eup %4422  ;;  %v3308_v49 = vadd.f32 1.0, %v4421_v46 }
 0x6b7   : > { %v4425_v13 = vpop.eup %4424  ;;  %v3307_v17 = vadd.f32 1.0, %v4423_v53  ;;  %4426 = vrcp.f32 %v3306_v14 }
 0x6b8   : > { %v3309_v63 = vadd.f32 1.0, %v4425_v13  ;;  %4428 = vrcp.f32 %v3308_v49 }
 0x6b9   : > { %4430 = vrcp.f32 %v3307_v17 }
 0x6c4   : > { %v4427_v49 = vpop.eup %4426 }
 0x6e2   : > { %v3232_v25 = vpop.f32.mrf.mxu1  ;;  %v3273_v43 = vpop.f32.mrf.mxu0 }
 0x6e3   : > { %v3284_v34 = vadd.f32 %v3232_v25, %v7455_v52  ;;  %v3286_v50 = vadd.f32 %v3273_v43, %v7456_v42  ;;  %v4429_v25 = vpop.eup %4428 }
 0x6e4   : > { %v3234_v33 = vpop.f32.mrf.mxu1  ;;  %v3275_v2 = vpop.f32.mrf.mxu0 }
 0x6e5   : > { %v4126_v9 = vmul.f32 -1.442695, %v3284_v34  ;;  %4432 = vtanh.f32 %v3286_v50  ;;  %v3285_v62 = vadd.f32 %v3234_v33, %v7457_v44  ;;  %v3287_v56 = vadd.f32 %v3275_v2, %v7458_v54  ;;  %v4431_v17 = vpop.eup %4430 }
 0x6e6   : > { %4434 = vrcp.f32 %v3309_v63  ;;  %v3236_v23 = vpop.f32.mrf.mxu1  ;;  %v3277_v46 = vpop.f32.mrf.mxu0  ;;  %v3326_v34 = vmul.f32 %v4429_v25, %v6358_v5 }
 0x6e7   : > { %4436 = vpow2.f32 %v4126_v9  ;;  %v4127_v13 = vmul.f32 -1.442695, %v3285_v62 }
 0x6e8   : > { %4438 = vtanh.f32 %v3287_v56  ;;  %v3237_v53 = vpop.f32.mrf.mxu1  ;;  %v3278_v14 = vpop.f32.mrf.mxu0 }
 0x6e9   : > { %4440 = vpow2.f32 %v4127_v13 }
 0x6f2   : > { %v4433_v43 = vpop.eup %4432 }
 0x6f3   : > { %v4435_v52 = vpop.eup %4434  ;;  %v3328_v42 = vmul.f32 %v4433_v43, %v4427_v49 }
 0x6f4   : > { %v4437_v50 = vpop.eup %4436  ;;  %v3327_v9 = vmul.f32 %v4435_v52, %v6362_v16  ;;  %v4493_v16 = vmov 0.0  }
 0x6f5   : > { %v4439_v33 = vpop.eup %4438  ;;  %v3310_v2 = vadd.f32 1.0, %v4437_v50  ;;  %v6508_v63 = vadd.f32 %v3328_v42, %v3326_v34 }
 0x6f6   : > { %v4441_v44 = vpop.eup %4440  ;;  %v3329_v62 = vmul.f32 %v4439_v33, %v4431_v17  ;;  %v4318_v17 = vld [vmem:[%s6702_s15 + $0x18] sm:$0xff]  }
 0x6f7   : > { %4442 = vrcp.f32 %v3310_v2  ;;  %v3311_v54 = vadd.f32 1.0, %v4441_v44 }
 0x6f8   : > { %4444 = vtanh.f32 %v6508_v63  ;;  %v6512_v56 = vadd.f32 %v3329_v62, %v3327_v9  ;;  %v7480_v9 = vld [vmem:[#allocation142_spill] sm:$0xff] }
 0x6f9   : > { %4446 = vrcp.f32 %v3311_v54  ;;  %v7481_v54 = vld [vmem:[#allocation143_spill] sm:$0xff] }
 0x6fa   : > { %4448 = vtanh.f32 %v6512_v56 }
 0x704   : > { %v4443_v5 = vpop.eup %4442 }
 0x705   : > { %v4445_v23 = vpop.eup %4444 }
 0x706   : > { %v4447_v46 = vpop.eup %4446  ;;  %v3334_v53 = vmul.f32 %v4445_v23, %v4443_v5  ;;  %v7482_v23 = vld [vmem:[#allocation144_spill] sm:$0xff] }
 0x707   : > { %v4449_v13 = vpop.eup %4448 }
 0x708   : > { %v3335_v14 = vmul.f32 %v4449_v13, %v4447_v46  ;;  %v6515_v25 = vpack.c.bf16 %v3334_v53, %v3334_v53  ;;  %v7483_v53 = vld [vmem:[#allocation145_spill] sm:$0xff] }
 0x70a   : > { %v3337_v49 = vpack.c.bf16 %v3335_v14, %v3335_v14 }
 0x70c   : > { %3370 = vmatprep.mubr.bf16.mxu1 %v3337_v49  ;;  %3411 = vmatprep.mubr.bf16.mxu0 %v3337_v49 }
 0x70d   : > { %3371 = vmatmul.mubr.bf16.vlgmr.msra.gmra.mxu1 %v6515_v25  ;;  %3412 = vmatmul.mubr.bf16.vlgmr.msra.gmra.mxu0 %v6515_v25 }
 0x70e   : > { %3421 = vmatpush1.bf16.msra.mxu1 %v7164_v4  ;;  %3462 = vmatpush1.bf16.msra.mxu0 %v7165_v11  ;;  %v7459_v4 = vld [vmem:[#allocation109_spill] sm:$0xff]  ;;  %v7460_v11 = vld [vmem:[#allocation110_spill] sm:$0xff] }
 0x70f   : > { %3452 = vmatprep.mubr.bf16.mxu1 %v3337_v49  ;;  %3493 = vmatprep.mubr.bf16.mxu0 %v3337_v49 }
 0x710   : > { %3422 = vmatprep.subr.bf16.mxu1 %v7166_v58  ;;  %3463 = vmatprep.subr.bf16.mxu0 %v7167_v30  ;;  %v7461_v58 = vld [vmem:[#allocation111_spill] sm:$0xff]  ;;  %v7462_v30 = vld [vmem:[#allocation112_spill] sm:$0xff] }
 0x712   : > { %3423 = vmatpush1.bf16.msra.mxu1 %v7168_v0  ;;  %3464 = vmatpush1.bf16.msra.mxu0 %v7169_v15  ;;  %v7463_v0 = vld [vmem:[#allocation113_spill] sm:$0xff]  ;;  %v7464_v15 = vld [vmem:[#allocation114_spill] sm:$0xff] }
 0x713   : > { %3424 = vmatprep.subr.bf16.mxu1 %v7170_v7  ;;  %3465 = vmatprep.subr.bf16.mxu0 %v7171_v36  ;;  %v7465_v7 = vld [vmem:[#allocation115_spill] sm:$0xff]  ;;  %v7466_v36 = vld [vmem:[#allocation116_spill] sm:$0xff] }
 0x716   : > { %3425 = vmatpush1.bf16.msra.mxu1 %v7172_v3  ;;  %3466 = vmatpush1.bf16.msra.mxu0 %v7173_v61  ;;  %v7467_v3 = vld [vmem:[#allocation117_spill] sm:$0xff]  ;;  %v7468_v61 = vld [vmem:[#allocation118_spill] sm:$0xff] }
 0x717   : > { %3426 = vmatprep.subr.bf16.mxu1 %v7174_v18  ;;  %3467 = vmatprep.subr.bf16.mxu0 %v7175_v8  ;;  %v7469_v18 = vld [vmem:[#allocation119_spill] sm:$0xff]  ;;  %v7470_v8 = vld [vmem:[#allocation120_spill] sm:$0xff] }
 0x71a   : > { %3427 = vmatpush1.bf16.msra.mxu1 %v7176_v10  ;;  %3468 = vmatpush1.bf16.msra.mxu0 %v7177_v57  ;;  %v7471_v10 = vld [vmem:[#allocation121_spill] sm:$0xff]  ;;  %v7472_v57 = vld [vmem:[#allocation122_spill] sm:$0xff] }
 0x71b   : > { %3428 = vmatprep.subr.bf16.mxu1 %v7178_v12  ;;  %3469 = vmatprep.subr.bf16.mxu0 %v7179_v6  ;;  %v7473_v12 = vld [vmem:[#allocation123_spill] sm:$0xff]  ;;  %v7474_v6 = vld [vmem:[#allocation124_spill] sm:$0xff] }
 0x71e   : > { %3429 = vmatpush1.bf16.msra.mxu1 %v7180_v55  ;;  %3470 = vmatpush1.bf16.msra.mxu0 %v7181_v1  ;;  %v7475_v55 = vld [vmem:[#allocation125_spill] sm:$0xff]  ;;  %v7476_v1 = vld [vmem:[#allocation126_spill] sm:$0xff] }
 0x71f   : > { %3430 = vmatprep.subr.bf16.mxu1 %v7182_v27  ;;  %3471 = vmatprep.subr.bf16.mxu0 %v7269_v35  ;;  %v7477_v27 = vld [vmem:[#allocation127_spill] sm:$0xff]  ;;  %v7478_v35 = vld [vmem:[#allocation128_spill] sm:$0xff] }
 0x722   : > { %3431 = vmatpush1.bf16.msra.mxu1 %v7270_v37  ;;  %3472 = vmatpush1.bf16.msra.mxu0 %v7271_v39  ;;  %v7479_v37 = vld [vmem:[#allocation129_spill] sm:$0xff] }
 0x723   : > { %3432 = vmatprep.subr.bf16.mxu1 %v7272_v40  ;;  %3473 = vmatprep.subr.bf16.mxu0 %v7273_v41  ;;  %v4298_v39 = vld [vmem:[%s6700_s13 + $0x78] sm:$0xff]   ;;  %v4300_v41 = vld [vmem:[%s6700_s13 + $0x70] sm:$0xff]  }
 0x724   : > { %v4299_v40 = vld [vmem:[%s6700_s13 + $0x38] sm:$0xff]  }
 0x726   : > { %3433 = vmatpush1.bf16.msra.mxu1 %v7274_v51  ;;  %3474 = vmatpush1.bf16.msra.mxu0 %v7275_v32  ;;  %v4301_v51 = vld [vmem:[%s6700_s13 + $0x30] sm:$0xff]   ;;  %v4302_v32 = vld [vmem:[%s6700_s13 + $0x68] sm:$0xff]  }
 0x727   : > { %3434 = vmatprep.subr.bf16.mxu1 %v7276_v31  ;;  %3475 = vmatprep.subr.bf16.mxu0 %v7277_v29  ;;  %v4303_v31 = vld [vmem:[%s6700_s13 + $0x28] sm:$0xff]   ;;  %v4304_v29 = vld [vmem:[%s6700_s13 + $0x60] sm:$0xff]  }
 0x72a   : > { %3435 = vmatpush1.bf16.msra.mxu1 %v7364_v22  ;;  %3476 = vmatpush1.bf16.msra.mxu0 %v7365_v21  ;;  %v4315_v22 = vld [vmem:[%s6702_s15 + $0x30] sm:$0xff]   ;;  %v4316_v21 = vld [vmem:[%s6702_s15 + $0x28] sm:$0xff]  }
 0x72b   : > { %3436 = vmatprep.subr.bf16.mxu1 %v7366_v24  ;;  %3477 = vmatprep.subr.bf16.mxu0 %v7281_v60  ;;  %v4307_v60 = vld [vmem:[%s6700_s13 + $0x18] sm:$0xff]   ;;  %v4317_v24 = vld [vmem:[%s6702_s15 + $0x20] sm:$0xff]  }
 0x72e   : > { %3437 = vmatpush2.bf16.msra.mxu1 %v7282_v20  ;;  %3478 = vmatpush2.bf16.msra.mxu0 %v7283_v45  ;;  %v4308_v20 = vld [vmem:[%s6700_s13 + $0x50] sm:$0xff]  }
 0x72f   : > { %3438 = vmatprep.subr.bf16.mxu1 %v7284_v47  ;;  %3479 = vmatprep.subr.bf16.mxu0 %v7285_v28  ;;  %v4309_v45 = vld [vmem:[%s6700_s13 + $0x10] sm:$0xff]   ;;  %v4310_v47 = vld [vmem:[%s6700_s13 + $0x48] sm:$0xff]  }
 0x730   : > { %v4311_v28 = vld [vmem:[%s6700_s13 + $0x8] sm:$0xff]  }
 0x732   : > { %3439 = vmatpush2.bf16.msra.mxu1 %v7286_v26  ;;  %3480 = vmatpush2.bf16.msra.mxu0 %v7287_v48  ;;  %v4312_v26 = vld [vmem:[%s6700_s13 + $0x40] sm:$0xff]  }
 0x733   : > { %3440 = vmatprep.subr.bf16.mxu1 %v7288_v19  ;;  %3481 = vmatprep.subr.bf16.mxu0 %v7289_v59  ;;  %v4305_v59 = vld [vmem:[%s6700_s13 + $0x20] sm:$0xff]   ;;  %v4314_v19 = vld [vmem:[%s6702_s15 + $0x38] sm:$0xff]  }
 0x734   : > { %v4313_v48 = vld [vmem:[%s6700_s13] sm:$0xff]  }
 0x736   : > { %3441 = vmatpush2.bf16.msra.mxu1 %v7290_v38  ;;  %3482 = vmatpush2.bf16.msra.mxu0 %v7459_v4  ;;  %v4306_v38 = vld [vmem:[%s6700_s13 + $0x58] sm:$0xff]  }
 0x737   : > { %3442 = vmatprep.subr.bf16.mxu1 %v7460_v11  ;;  %3483 = vmatprep.subr.bf16.mxu0 %v7461_v58 }
 0x73a   : > { %3443 = vmatpush2.bf16.msra.mxu1 %v7462_v30  ;;  %3484 = vmatpush2.bf16.msra.mxu0 %v7463_v0 }
 0x73b   : > { %3444 = vmatprep.subr.bf16.mxu1 %v7464_v15  ;;  %3485 = vmatprep.subr.bf16.mxu0 %v7465_v7 }
 0x73e   : > { %3445 = vmatpush2.bf16.msra.mxu1 %v7466_v36  ;;  %3486 = vmatpush2.bf16.msra.mxu0 %v7467_v3 }
 0x73f   : > { %3446 = vmatprep.subr.bf16.mxu1 %v7468_v61  ;;  %3487 = vmatprep.subr.bf16.mxu0 %v7469_v18 }
 0x742   : > { %3447 = vmatpush2.bf16.msra.mxu1 %v7470_v8  ;;  %3488 = vmatpush2.bf16.msra.mxu0 %v7471_v10  ;;  %v7484_v8 = vld [vmem:[#allocation158_spill] sm:$0xff] }
 0x743   : > { %3448 = vmatprep.subr.bf16.mxu1 %v7472_v57  ;;  %3489 = vmatprep.subr.bf16.mxu0 %v7473_v12  ;;  %v7485_v57 = vld [vmem:[#allocation159_spill] sm:$0xff] }
 0x746   : > { %3449 = vmatpush2.bf16.msra.mxu1 %v7474_v6  ;;  %3490 = vmatpush2.bf16.msra.mxu0 %v7475_v55 }
 0x747   : > { %3450 = vmatprep.subr.bf16.mxu1 %v7476_v1  ;;  %3491 = vmatprep.subr.bf16.mxu0 %v7477_v27  ;;  %v7486_v27 = vld [vmem:[#allocation160_spill] sm:$0xff] }
 0x74a   : > { %3451 = vmatpush2.bf16.msra.mxu1 %v7478_v35  ;;  %3492 = vmatpush2.bf16.msra.mxu0 %v7479_v37  ;;  %v7487_v37 = vld [vmem:[#allocation161_spill] sm:$0xff] }
 0x74b   : > { %4183 = vmatprep.subr.bf16.mxu1 %v4298_v39  ;;  %4246 = vmatprep.subr.bf16.mxu0 %v4493_v16 }
 0x74d   : > { %3453 = vmatmul.mubr.bf16.vlgmr.msra.gmra.mxu1 %v6515_v25  ;;  %3494 = vmatmul.mubr.bf16.vlgmr.msra.gmra.mxu0 %v6515_v25 }
 0x74e   : > { %4184 = vmatpush3.bf16.msra.mxu1 %v4299_v40  ;;  %4247 = vmatpush3.bf16.msra.mxu0 %v4314_v19 }
 0x74f   : > { %4185 = vmatprep.subr.bf16.mxu1 %v4300_v41  ;;  %4248 = vmatprep.subr.bf16.mxu0 %v4493_v16 }
 0x750   : > { %4262 = vmatprep.mubr.msk.bf16.mxu0 %vm4494_vm2, %v4493_v16 }
 0x752   : > { %4186 = vmatpush3.bf16.msra.mxu1 %v4301_v51  ;;  %4249 = vmatpush3.bf16.msra.mxu0 %v4315_v22 }
 0x753   : > { %4187 = vmatprep.subr.bf16.mxu1 %v4302_v32  ;;  %4250 = vmatprep.subr.bf16.mxu0 %v4493_v16 }
 0x756   : > { %4188 = vmatpush3.bf16.msra.mxu1 %v4303_v31  ;;  %4251 = vmatpush3.bf16.msra.mxu0 %v4316_v21 }
 0x757   : > { %4189 = vmatprep.subr.bf16.mxu1 %v4304_v29  ;;  %4252 = vmatprep.subr.bf16.mxu0 %v4493_v16 }
 0x75a   : > { %4190 = vmatpush3.bf16.msra.mxu1 %v4305_v59  ;;  %4253 = vmatpush3.bf16.msra.mxu0 %v4317_v24 }
 0x75b   : > { %4191 = vmatprep.subr.bf16.mxu1 %v4306_v38  ;;  %4254 = vmatprep.subr.bf16.mxu0 %v4493_v16 }
 0x75e   : > { %4192 = vmatpush3.bf16.msra.mxu1 %v4307_v60  ;;  %4255 = vmatpush3.bf16.msra.mxu0 %v4318_v17 }
 0x75f   : > { %4193 = vmatprep.subr.bf16.mxu1 %v4308_v20  ;;  %4256 = vmatprep.subr.bf16.mxu0 %v4493_v16 }
 0x762   : > { %4194 = vmatpush3.bf16.msra.mxu1 %v4309_v45 }
 0x763   : > { %4195 = vmatprep.subr.bf16.mxu1 %v4310_v47 }
 0x766   : > { %4196 = vmatpush3.bf16.msra.mxu1 %v4311_v28 }
 0x767   : > { %4197 = vmatprep.subr.bf16.mxu1 %v4312_v26 }
 0x76a   : > { %4198 = vmatpush3.bf16.msra.mxu1 %v4313_v48 }
 0x7cd   : > { %v3372_v43 = vpop.f32.mrf.mxu1  ;;  %v3413_v52 = vpop.f32.mrf.mxu0 }
 0x7ce   : > { %v3502_v62 = vadd.f32 %v3372_v43, %v7480_v9  ;;  %v3504_v5 = vadd.f32 %v3413_v52, %v7481_v54  ;;  %v4320_v9 = vld [vmem:[%s6702_s15 + $0x8] sm:$0xff]  }
 0x7cf   : > { %v3374_v34 = vpop.f32.mrf.mxu1  ;;  %v3415_v42 = vpop.f32.mrf.mxu0 }
 0x7d0   : > { %v3503_v46 = vadd.f32 %v3374_v34, %v7482_v23  ;;  %v4128_v13 = vmul.f32 -1.442695, %v3502_v62  ;;  %v3505_v14 = vadd.f32 %v3415_v42, %v7483_v53  ;;  %v4130_v49 = vmul.f32 -1.442695, %v3504_v5  ;;  %v4321_v62 = vld [vmem:[%s6702_s15] sm:$0xff]  }
 0x7d1   : > { %v3376_v50 = vpop.f32.mrf.mxu1  ;;  %v3417_v33 = vpop.f32.mrf.mxu0  ;;  %v4134_v5 = vld [vmem:[%s6701_s14] ss:$0 sm:$0xff] }
 0x7d2   : > { %v4129_v25 = vmul.f32 -1.442695, %v3503_v46  ;;  %4450 = vpow2.f32 %v4128_v13  ;;  %v4131_v4 = vmul.f32 -1.442695, %v3505_v14 }
 0x7d3   : > { %v3377_v2 = vpop.f32.mrf.mxu1  ;;  %v3418_v44 = vpop.f32.mrf.mxu0  ;;  %4452 = vpow2.f32 %v4130_v49 }
 0x7d4   : > { %4454 = vpow2.f32 %v4129_v25 }
 0x7d5   : > { %4456 = vpow2.f32 %v4131_v4  ;;  %v4151_v4 = vld [vmem:[%s6703_s16] ss:$0 sm:$0xff] }
 0x7df   : > { %v4451_v11 = vpop.eup %4450 }
 0x7e0   : > { %v4453_v58 = vpop.eup %4452  ;;  %v3528_v0 = vadd.f32 1.0, %v4451_v11 }
 0x7e1   : > { %v4455_v30 = vpop.eup %4454  ;;  %v3530_v7 = vadd.f32 1.0, %v4453_v58 }
 0x7e2   : > { %v4457_v15 = vpop.eup %4456  ;;  %v3529_v36 = vadd.f32 1.0, %v4455_v30  ;;  %4458 = vrcp.f32 %v3528_v0 }
 0x7e3   : > { %v3531_v3 = vadd.f32 1.0, %v4457_v15  ;;  %4460 = vrcp.f32 %v3530_v7 }
 0x7e4   : > { %4462 = vrcp.f32 %v3529_v36 }
 0x7ef   : > { %v4459_v29 = vpop.eup %4458 }
 0x7f0   : > { %v4461_v59 = vpop.eup %4460 }
 0x7f1   : > { %v4463_v38 = vpop.eup %4462  ;;  %v3548_v45 = vmul.f32 %v4461_v59, %v6508_v63 }
 0x80d   : > { %v3454_v61 = vpop.f32.mrf.mxu1  ;;  %v3495_v18 = vpop.f32.mrf.mxu0 }
 0x80e   : > { %v3506_v10 = vadd.f32 %v3454_v61, %v7484_v8  ;;  %v3508_v12 = vadd.f32 %v3495_v18, %v7485_v57 }
 0x80f   : > { %v3456_v6 = vpop.f32.mrf.mxu1  ;;  %v3497_v55 = vpop.f32.mrf.mxu0 }
 0x810   : > { %v4132_v1 = vmul.f32 -1.442695, %v3506_v10  ;;  %4464 = vtanh.f32 %v3508_v12  ;;  %v3507_v35 = vadd.f32 %v3456_v6, %v7486_v27  ;;  %v3509_v39 = vadd.f32 %v3497_v55, %v7487_v37 }
 0x811   : > { %4466 = vrcp.f32 %v3531_v3  ;;  %v3458_v40 = vpop.f32.mrf.mxu1  ;;  %v3499_v41 = vpop.f32.mrf.mxu0 }
 0x812   : > { %4468 = vpow2.f32 %v4132_v1  ;;  %v4133_v51 = vmul.f32 -1.442695, %v3507_v35 }
 0x813   : > { %4470 = vtanh.f32 %v3509_v39  ;;  %v3459_v32 = vpop.f32.mrf.mxu1  ;;  %v3500_v31 = vpop.f32.mrf.mxu0 }
 0x814   : > { %4472 = vpow2.f32 %v4133_v51 }
 0x81d   : > { %v4465_v60 = vpop.eup %4464 }
 0x81e   : > { %v4467_v20 = vpop.eup %4466  ;;  %v3550_v47 = vmul.f32 %v4465_v60, %v4459_v29 }
 0x81f   : > { %v4469_v28 = vpop.eup %4468  ;;  %v3549_v21 = vmul.f32 %v4467_v20, %v6512_v56  ;;  %v4319_v56 = vld [vmem:[%s6702_s15 + $0x10] sm:$0xff]  }
 0x820   : > { %v4471_v26 = vpop.eup %4470  ;;  %v3532_v48 = vadd.f32 1.0, %v4469_v28  ;;  %v3552_v19 = vadd.f32 %v3550_v47, %v3548_v45  ;;  %4257 = vmatpush3.bf16.msra.mxu0 %v4319_v56 }
 0x821   : > { %v4473_v22 = vpop.eup %4472  ;;  %v3551_v24 = vmul.f32 %v4471_v26, %v4463_v38  ;;  %4258 = vmatprep.subr.bf16.mxu0 %v4493_v16 }
 0x822   : > { %4474 = vrcp.f32 %v3532_v48  ;;  %v3533_v17 = vadd.f32 1.0, %v4473_v22 }
 0x823   : > { %4476 = vtanh.f32 %v3552_v19  ;;  %v3553_v43 = vadd.f32 %v3551_v24, %v3549_v21 }
 0x824   : > { %4478 = vrcp.f32 %v3533_v17  ;;  %4259 = vmatpush3.bf16.msra.mxu0 %v4320_v9 }
 0x825   : > { %4480 = vtanh.f32 %v3553_v43  ;;  %4260 = vmatprep.subr.bf16.mxu0 %v4493_v16 }
 0x828   : > { %4261 = vmatpush3.bf16.msra.mxu0 %v4321_v62 }
 0x82f   : > { %v4475_v52 = vpop.eup %4474 }
 0x830   : > { %v4477_v34 = vpop.eup %4476 }
 0x831   : > { %v4479_v42 = vpop.eup %4478  ;;  %v3556_v50 = vmul.f32 %v4477_v34, %v4475_v52 }
 0x832   : > { %v4481_v63 = vpop.eup %4480 }
 0x833   : > { %v3557_v33 = vmul.f32 %v4481_v63, %v4479_v42  ;;  %v3558_v44 = vpack.c.bf16 %v3556_v50, %v3556_v50 }
 0x835   : > { %v3559_v2 = vpack.c.bf16 %v3557_v33, %v3557_v33 }
 0x837   : > { %3727 = vmatprep.mubr.bf16.mxu1 %v3559_v2 }
 0x838   : > { %3728 = vmatmul.mubr.bf16.vlgmr.msra.gmra.mxu1 %v3558_v44 }
 0x8f8   : > { %v4199_v54 = vpop.f32.mrf.mxu1 }
 0x8fa   : > { %v4200_v23 = vpop.f32.mrf.mxu1 }
 0x8fb   : > { %v4201_v46 = vadd.f32 %v4200_v23, %v4199_v54 }
 0x8fc   : > { %v4202_v13 = vpop.f32.mrf.mxu1 }
 0x8fd   : > { %v3730_v53 = vadd.f32 %v4201_v46, %v4134_v5 }
 0x8fe   : > { %v4203_v14 = vpop.f32.mrf.mxu1 }
 0x8ff   : > { %v3735_v49 = vmax.f32 %v3730_v53, 0.0 }
 0x901   : > { %v3736_v25 = vpack.c.bf16 %v3735_v49, %v3735_v49 }
 0x903   : > { %4263 = vmatmul.mubr.bf16.vlgmr.msra.gmra.mxu0 %v3736_v25 }
 0x9c3   : > { %v3842_v16 = vpop.f32.mrf.mxu0 }
 0x9c4   : > { %v3843_v11 = vadd.f32 %v4151_v4, %v3842_v16 }
 0x9c5   : > { %v4264_v58 = vpop.f32.mrf.mxu0 }
 0x9c6   : > { %3848 = vst [vmem:[%s546_s19] sm:$0xff] %v3843_v11 }
 0x9c7   : > { %v3845_v30 = vpop.f32.mrf.mxu0 }
 0x9c9   : > { %v4265_v0 = vpop.f32.mrf.mxu0 }
 0x9ca PF: > { %s27_s24 = sadd.s32 1, %s4488_s24  }
 0x9cb   : > { %p24_p4 = scmp.ge.s32.totalorder %s27_s24, 4  }
 0x9cd   :  { %26 = sbr.rel (!%p24_p4) target bundleno = 3 (0x3), region = 118 }

</bundles_post_ra>
